<compile_context>
chip_gen: v7x
topology: tpu7x:2x2x1
jax: 0.10.0
libtpu: 0.0.40
codegen_flags: <defaults>
</compile_context>

<pallas_src>
import math
import functools

import jax
import jax.numpy as jnp
from jax import lax
from jax.experimental import pallas as pl
from jax.experimental.pallas import tpu as pltpu


# ----------------------------- hardware helpers -------------------------------

def _vmem_capacity_bytes():
    try:
        return int(pltpu.get_tpu_info().vmem_capacity_bytes)
    except Exception:
        return 0


_VMEM_CAP = _vmem_capacity_bytes()
_VMEM_LIMIT = (int(min(96 * 1024 * 1024, (_VMEM_CAP * 3) // 4))
               if _VMEM_CAP else 64 * 1024 * 1024)


def _device_kind():
    try:
        return jax.devices()[0].device_kind.lower()
    except Exception:
        return ""


def _largest_divisor(n, cap):
    for t in (512, 256, 128, 64, 32, 16, 8):
        if t <= cap and n % t == 0:
            return t
    return n


def _row_tile(T):
    return _largest_divisor(T, 256)


def _vocab_tile(V):
    for t in (2048, 1024, 512, 256, 128):
        if V % t == 0:
            return t
    # TODO(synk): pad the vocab dim to a multiple of 128 for vocabs like 50257.
    return V


def _ffn_tile(F):
    for t in (1024, 512, 256, 128):
        if F % t == 0:
            return t
    return F


def _attn_tile(T, nh, hd):
    """Per-generation attention tile: 128 on v5e (128-wide MXU), 256 on v6e,
    256 on 64-MiB-VMEM parts (v7x) only if the estimate fits the budget."""
    kind = _device_kind()
    cap = _VMEM_CAP or (128 << 20)
    if "v5" in kind:
        pref = 128
    elif cap <= 80 * (1 << 20):                 # v7x-class (64 MiB VMEM)
        t = 256
        est = (3 * 2 * nh * t * hd * 2          # q/k/v bf16 blocks, double-buffered
               + 2 * t * nh * hd * 2            # bf16 output block, double-buffered
               + nh * t * hd * 4                # f32 acc scratch
               + 2 * nh * t * t * 4)            # live f32 s / p temporaries
        pref = 256 if est <= cap // 2 else 128
    else:                                       # v6e-class
        pref = 256
    return _largest_divisor(T, pref)


def _const_spec(a):
    n = a.ndim
    return pl.BlockSpec(a.shape, lambda *_: (0,) * n)


# ----------------------------- in-kernel helpers ------------------------------

def _layer_norm(h, g, b, eps=1e-5):
    # PyTorch nn.LayerNorm: biased variance over last dim, f32 math.
    mu = jnp.mean(h, axis=-1, keepdims=True)
    var = jnp.mean((h - mu) ** 2, axis=-1, keepdims=True)
    return (h - mu) * lax.rsqrt(var + eps) * g + b


def _gelu_tanh(x):
    # nn.GELU(approximate='tanh')
    c = math.sqrt(2.0 / math.pi)
    return 0.5 * x * (1.0 + jnp.tanh(c * (x + 0.044715 * x * x * x)))


# ------------------------- kernel A: LN1 + QKV proj ---------------------------

def qkv_kernel(x_ref, g_ref, beta_ref, w_ref, bias_ref, q_ref, k_ref, v_ref,
               *, sm_scale):
    x = x_ref[0]                                   # (TQ, C) f32
    C = x.shape[-1]
    nh, hd = q_ref.shape[1], q_ref.shape[3]
    h = _layer_norm(x, g_ref[...], beta_ref[...]).astype(jnp.bfloat16)
    qkv = jnp.dot(h, w_ref[...], preferred_element_type=jnp.float32)
    qkv = qkv + bias_ref[...]                      # (TQ, 3C) f32
    # Fold the attention softmax scale into q once per token tile.
    q = qkv[:, 0 * C:1 * C] * sm_scale
    k = qkv[:, 1 * C:2 * C]
    v = qkv[:, 2 * C:3 * C]
    # Split heads with static lane slices: head-major output without any
    # in-kernel reshape/transpose and without XLA-level HBM transposes.
    for hh in range(nh):
        sl = slice(hh * hd, (hh + 1) * hd)
        q_ref[0, hh] = q[:, sl].astype(q_ref.dtype)
        k_ref[0, hh] = k[:, sl].astype(k_ref.dtype)
        v_ref[0, hh] = v[:, sl].astype(v_ref.dtype)


def qkv_call(x, lp, n_head):
    B, T, C = x.shape
    hd = C // n_head
    TQ = _row_tile(T)
    sm_scale = 1.0 / math.sqrt(hd)
    g, beta, w, bias = lp['ln1_g'], lp['ln1_b'], lp['w_qkv'], lp['b_qkv']
    row_spec = pl.BlockSpec((1, TQ, C), lambda bi, ri: (bi, ri, 0))
    head_spec = pl.BlockSpec((1, n_head, TQ, hd), lambda bi, ri: (bi, 0, ri, 0))
    head_sds = jax.ShapeDtypeStruct((B, n_head, T, hd), jnp.bfloat16)
    return pl.pallas_call(
        functools.partial(qkv_kernel, sm_scale=sm_scale),
        out_shape=(head_sds, head_sds, head_sds),
        grid=(B, T // TQ),
        in_specs=[row_spec, _const_spec(g), _const_spec(beta),
                  _const_spec(w), _const_spec(bias)],
        out_specs=(head_spec, head_spec, head_spec),
        compiler_params=pltpu.CompilerParams(
            dimension_semantics=("parallel", "parallel"),
            vmem_limit_bytes=_VMEM_LIMIT),
    )(x, g, beta, w, bias)


# ------------------ kernel B: flash-style causal attention --------------------

def attn_kernel(q_ref, k_ref, v_ref, o_ref, m_sc, l_sc, acc_sc):
    qi = pl.program_id(1)
    ki = pl.program_id(2)
    nh, TQ, hd = q_ref.shape[1], q_ref.shape[2], q_ref.shape[3]
    TK = k_ref.shape[2]

    @pl.when(ki == 0)
    def _init():
        m_sc[...] = jnp.full(m_sc.shape, -1e30, jnp.float32)
        l_sc[...] = jnp.zeros(l_sc.shape, jnp.float32)
        acc_sc[...] = jnp.zeros(acc_sc.shape, jnp.float32)

    def _tile(masked):
        q = q_ref[0]                               # (nh, TQ, hd) bf16, q pre-scaled
        k = k_ref[0]                               # (nh, TK, hd) bf16
        v = v_ref[0]                               # (nh, TK, hd) bf16
        s = jnp.einsum('hqd,hkd->hqk', q, k,
                       preferred_element_type=jnp.float32)
        if masked:
            # 2-D mask, only on the diagonal tile, broadcast over heads.
            row = lax.broadcasted_iota(jnp.int32, (TQ, TK), 0)
            col = lax.broadcasted_iota(jnp.int32, (TQ, TK), 1)
            s = jnp.where((col <= row)[None, :, :], s, -1e30)
        m_prev = m_sc[...]
        m_new = jnp.maximum(m_prev, jnp.max(s, axis=-1, keepdims=True))
        alpha = jnp.exp(m_prev - m_new)
        p = jnp.exp(s - m_new)
        l_sc[...] = alpha * l_sc[...] + jnp.sum(p, axis=-1, keepdims=True)
        acc_sc[...] = alpha * acc_sc[...] + jnp.einsum(
            'hqk,hkd->hqd', p.astype(jnp.bfloat16), v,
            preferred_element_type=jnp.float32)
        m_sc[...] = m_new

    @pl.when(ki < qi)          # fully below the diagonal: no mask needed
    def _off_diag():
        _tile(masked=False)

    @pl.when(ki == qi)         # diagonal tile: mask + finalize (last contributor)
    def _diag():
        _tile(masked=True)
        inv_l = pl.reciprocal(l_sc[...], approx=True)
        out = acc_sc[...] * inv_l                   # (nh, TQ, hd) f32
        # Merge heads back to a lane-dense (TQ, C) write with static slices.
        for h in range(nh):
            o_ref[0, :, h * hd:(h + 1) * hd] = out[h].astype(o_ref.dtype)


def attn_call(q, k, v):
    # q, k, v: (B, nh, T, hd) bf16 (q already scaled by 1/sqrt(hd))
    B, nh, T, hd = q.shape
    TQ = TK = _attn_tile(T, nh, hd)
    n_t = T // TQ
    q_spec = pl.BlockSpec((1, nh, TQ, hd), lambda b, qi, ki: (b, 0, qi, 0))
    # Clamp the kv block index to the diagonal: for ki > qi the index map
    # returns the same block as the previous step, so the pipeline skips the
    # (useless) DMA, while pl.when(ki <= qi) skips the compute.
    kv_spec = pl.BlockSpec((1, nh, TK, hd),
                           lambda b, qi, ki: (b, 0, jnp.minimum(ki, qi), 0))
    return pl.pallas_call(
        attn_kernel,
        out_shape=jax.ShapeDtypeStruct((B, T, nh * hd), jnp.bfloat16),
        grid=(B, n_t, n_t),
        in_specs=[q_spec, kv_spec, kv_spec],
        out_specs=pl.BlockSpec((1, TQ, nh * hd), lambda b, qi, ki: (b, qi, 0)),
        scratch_shapes=[pltpu.VMEM((nh, TQ, 1), jnp.float32),
                        pltpu.VMEM((nh, TQ, 1), jnp.float32),
                        pltpu.VMEM((nh, TQ, hd), jnp.float32)],
        compiler_params=pltpu.CompilerParams(
            dimension_semantics=("parallel", "parallel", "arbitrary"),
            vmem_limit_bytes=_VMEM_LIMIT),
    )(q, k, v)


# --------- kernel C: attn out-proj + residual + LN2 + MLP (FFN-tiled) ---------

def proj_mlp_kernel(x_ref, y_ref, wp_ref, bp_ref, g2_ref, b2_ref,
                    wf_ref, bf_ref, wm_ref, bm_ref, o_ref,
                    x1_sc, h_sc, acc_sc):
    fi = pl.program_id(2)

    @pl.when(fi == 0)
    def _prologue():
        x = x_ref[0]                               # (TQ, C) f32 residual stream
        y = y_ref[0]                               # (TQ, C) bf16 attn output
        attn_out = jnp.dot(y, wp_ref[...],
                           preferred_element_type=jnp.float32) + bp_ref[...]
        x1 = x + attn_out                          # residual 1
        x1_sc[...] = x1
        h_sc[...] = _layer_norm(x1, g2_ref[...], b2_ref[...]).astype(jnp.bfloat16)
        acc_sc[...] = jnp.zeros(acc_sc.shape, acc_sc.dtype)

    # FFN slab for this grid step: (C, TF) x (TF, C), accumulated in f32.
    hh = jnp.dot(h_sc[...], wf_ref[...],
                 preferred_element_type=jnp.float32) + bf_ref[...]
    hh = _gelu_tanh(hh).astype(jnp.bfloat16)
    acc_sc[...] += jnp.dot(hh, wm_ref[...], preferred_element_type=jnp.float32)

    @pl.when(fi == pl.num_programs(2) - 1)
    def _epilogue():
        o_ref[0] = x1_sc[...] + acc_sc[...] + bm_ref[...]   # residual 2


def proj_mlp_call(x, y, lp):
    B, T, C = x.shape
    TQ = _row_tile(T)
    F = 4 * C
    TF = _ffn_tile(F)
    row_spec = pl.BlockSpec((1, TQ, C), lambda bi, ri, fi: (bi, ri, 0))
    in_specs = [
        row_spec,                                               # x (f32 residual)
        row_spec,                                               # y (bf16 attn out)
        _const_spec(lp['w_proj']), _const_spec(lp['b_proj']),
        _const_spec(lp['ln2_g']), _const_spec(lp['ln2_b']),
        pl.BlockSpec((C, TF), lambda bi, ri, fi: (0, fi)),      # w_fc slab
        pl.BlockSpec((1, TF), lambda bi, ri, fi: (0, fi)),      # b_fc slab
        pl.BlockSpec((TF, C), lambda bi, ri, fi: (fi, 0)),      # w_mlp_proj slab
        _const_spec(lp['b_mlp_proj']),
    ]
    return pl.pallas_call(
        proj_mlp_kernel,
        out_shape=jax.ShapeDtypeStruct((B, T, C), jnp.float32),
        grid=(B, T // TQ, F // TF),
        in_specs=in_specs,
        out_specs=row_spec,
        scratch_shapes=[pltpu.VMEM((TQ, C), jnp.float32),       # x1 (residual 1)
                        pltpu.VMEM((TQ, C), jnp.bfloat16),      # ln2(x1)
                        pltpu.VMEM((TQ, C), jnp.float32)],      # MLP accumulator
        compiler_params=pltpu.CompilerParams(
            dimension_semantics=("parallel", "parallel", "arbitrary"),
            vmem_limit_bytes=_VMEM_LIMIT),
    )(x, y, lp['w_proj'], lp['b_proj'], lp['ln2_g'], lp['ln2_b'],
      lp['w_fc'], lp['b_fc'], lp['w_mlp_proj'], lp['b_mlp_proj'])


# ----------------------- kernel D: ln_f (applied once) ------------------------

def lnf_kernel(x_ref, g_ref, b_ref, o_ref):
    o_ref[0] = _layer_norm(x_ref[0], g_ref[...], b_ref[...]).astype(o_ref.dtype)


def lnf_call(x, g, b):
    B, T, C = x.shape
    TQ = _row_tile(T)
    row_spec = pl.BlockSpec((1, TQ, C), lambda bi, ri: (bi, ri, 0))
    return pl.pallas_call(
        lnf_kernel,
        out_shape=jax.ShapeDtypeStruct((B, T, C), jnp.bfloat16),
        grid=(B, T // TQ),
        in_specs=[row_spec, _const_spec(g), _const_spec(b)],
        out_specs=row_spec,
        compiler_params=pltpu.CompilerParams(
            dimension_semantics=("parallel", "parallel"),
            vmem_limit_bytes=_VMEM_LIMIT),
    )(x, g, b)


# --------------- kernel E: lm_head, pure matmul, vocab-tiled -------------------

def head_kernel(x_ref, w_ref, o_ref):
    o_ref[0] = jnp.dot(x_ref[0], w_ref[...],
                       preferred_element_type=jnp.float32).astype(o_ref.dtype)


def head_call(x, w_lm, logits_dtype=jnp.float32):
    # x: (B, T, C) bf16 (already ln_f-normalized).  Vocab tile outermost so each
    # weight slab is DMA'd once and the small bf16 activation tile is re-streamed.
    B, T, C = x.shape
    V = w_lm.shape[1]
    TQ = _row_tile(T)
    TV = _vocab_tile(V)
    return pl.pallas_call(
        head_kernel,
        out_shape=jax.ShapeDtypeStruct((B, T, V), logits_dtype),
        grid=(V // TV, B, T // TQ),
        in_specs=[pl.BlockSpec((1, TQ, C), lambda vi, bi, ri: (bi, ri, 0)),
                  pl.BlockSpec((C, TV), lambda vi, bi, ri: (0, vi))],
        out_specs=pl.BlockSpec((1, TQ, TV), lambda vi, bi, ri: (bi, ri, vi)),
        compiler_params=pltpu.CompilerParams(
            dimension_semantics=("parallel", "parallel", "parallel"),
            vmem_limit_bytes=_VMEM_LIMIT),
    )(x, w_lm)


# ------------------------------- full forward ---------------------------------

def gpt_forward(idx, params, n_head, logits_dtype=jnp.float32):
    B, T = idx.shape
    # Embedding gathers stay in plain JAX (glue).
    x = jnp.take(params['wte'], idx, axis=0) + params['wpe'][:T]   # (B,T,C) f32

    for lp in params['blocks']:
        q, k, v = qkv_call(x, lp, n_head)          # (B, nh, T, hd) bf16, q scaled
        y = attn_call(q, k, v)                     # (B, T, C) bf16, lane-dense
        x = proj_mlp_call(x, y, lp)                # (B, T, C) f32

    xn = lnf_call(x, params['lnf_g'], params['lnf_b'])   # (B, T, C) bf16
    logits = head_call(xn, params['w_lm'], logits_dtype)
    # targets=None path only: loss = None
    return logits
# TODO(synk): cross-entropy loss branch (targets is not None) not implemented.


# ------------------------------ param construction ----------------------------

def init_params(key, vocab_size, block_size, n_layer, n_embd):
    C = n_embd

    def nrm(k, shape, dtype=jnp.float32, scale=0.02):
        return (scale * jax.random.normal(k, shape, jnp.float32)).astype(dtype)

    keys = iter(jax.random.split(key, 3 + 4 * n_layer))
    params = {
        'wte': nrm(next(keys), (vocab_size, C)),
        'wpe': nrm(next(keys), (block_size, C)),
        'lnf_g': jnp.ones((1, C), jnp.float32),
        'lnf_b': jnp.zeros((1, C), jnp.float32),
        'w_lm': nrm(next(keys), (C, vocab_size), jnp.bfloat16),
        'blocks': [],
    }
    for _ in range(n_layer):
        params['blocks'].append({
            'ln1_g': jnp.ones((1, C), jnp.float32),
            'ln1_b': jnp.zeros((1, C), jnp.float32),
            'w_qkv': nrm(next(keys), (C, 3 * C), jnp.bfloat16),
            'b_qkv': jnp.zeros((1, 3 * C), jnp.float32),
            'w_proj': nrm(next(keys), (C, C), jnp.bfloat16),
            'b_proj': jnp.zeros((1, C), jnp.float32),
            'ln2_g': jnp.ones((1, C), jnp.float32),
            'ln2_b': jnp.zeros((1, C), jnp.float32),
            'w_fc': nrm(next(keys), (C, 4 * C), jnp.bfloat16),
            'b_fc': jnp.zeros((1, 4 * C), jnp.float32),
            'w_mlp_proj': nrm(next(keys), (4 * C, C), jnp.bfloat16),
            'b_mlp_proj': jnp.zeros((1, C), jnp.float32),
        })
    return params


# ------------------------------------ main -------------------------------------

if __name__ == "__main__":
    # Small GPTConfig-consistent shapes.
    vocab_size = 256
    block_size = 16
    n_layer = 2
    n_head = 2
    n_embd = 32
    B, T = 2, 8

    key = jax.random.PRNGKey(0)
    pkey, ikey = jax.random.split(key)
    params = init_params(pkey, vocab_size, block_size, n_layer, n_embd)
    idx = jax.random.randint(ikey, (B, T), 0, vocab_size, dtype=jnp.int32)

    fwd = jax.jit(functools.partial(gpt_forward, n_head=n_head))
    logits = fwd(idx, params)
    logits = jax.block_until_ready(logits)
    assert logits.shape == (B, T, vocab_size)
    assert bool(jnp.all(jnp.isfinite(logits)))
    print("KERNEL_OK")
</pallas_src>

<mosaic_0001>
module attributes {stable_mosaic.version = 11 : i64} {
  func.func @attn_kernel(%arg0: i32, %arg1: i32, %arg2: i32, %arg3: memref<1x2x8x16xbf16, #tpu.memory_space<vmem>>, %arg4: memref<1x2x8x16xbf16, #tpu.memory_space<vmem>>, %arg5: memref<1x2x8x16xbf16, #tpu.memory_space<vmem>>, %arg6: memref<1x8x32xbf16, #tpu.memory_space<vmem>>, %arg7: memref<2x8x1xf32, #tpu.memory_space<vmem>>, %arg8: memref<2x8x1xf32, #tpu.memory_space<vmem>>, %arg9: memref<2x8x16xf32, #tpu.memory_space<vmem>>) attributes {dimension_semantics = [#tpu.dimension_semantics<parallel>, #tpu.dimension_semantics<parallel>, #tpu.dimension_semantics<arbitrary>], iteration_bounds = array<i64: 2, 1, 1>, scalar_prefetch = 0 : i64, scratch_operands = 3 : i64, tpu.core_type = #tpu.core_type<tc>, window_params = [{transform_indices = @transform_0, window_bounds = array<i64: 1, 2, 8, 16>}, {transform_indices = @transform_1, window_bounds = array<i64: 1, 2, 8, 16>}, {transform_indices = @transform_2, window_bounds = array<i64: 1, 2, 8, 16>}, {transform_indices = @transform_3, window_bounds = array<i64: 1, 8, 32>}]} {
    %c0_i32 = arith.constant 0 : i32
    %0 = arith.cmpi eq, %arg2, %c0_i32 : i32
    %1 = arith.extui %0 : i1 to i32
    %c0_i32_0 = arith.constant 0 : i32
    %2 = arith.cmpi ne, %1, %c0_i32_0 : i32
    scf.if %2 {
      %cst = arith.constant -1.000000e+30 : f32
      %9 = vector.broadcast %cst : f32 to vector<2x8x1xf32>
      %c0 = arith.constant 0 : index
      %c0_3 = arith.constant 0 : index
      %c0_4 = arith.constant 0 : index
      %10 = vector.load %arg7[%c0, %c0_3, %c0_4] : memref<2x8x1xf32, #tpu.memory_space<vmem>>, vector<2x8x1xf32>
      tpu.vector_store %arg7[%c0, %c0_3, %c0_4], %9 {strides = array<i32>} : memref<2x8x1xf32, #tpu.memory_space<vmem>>, vector<2x8x1xf32>,
      %cst_5 = arith.constant 0.000000e+00 : f32
      %11 = vector.broadcast %cst_5 : f32 to vector<2x8x1xf32>
      %c0_6 = arith.constant 0 : index
      %c0_7 = arith.constant 0 : index
      %c0_8 = arith.constant 0 : index
      %12 = vector.load %arg8[%c0_6, %c0_7, %c0_8] : memref<2x8x1xf32, #tpu.memory_space<vmem>>, vector<2x8x1xf32>
      tpu.vector_store %arg8[%c0_6, %c0_7, %c0_8], %11 {strides = array<i32>} : memref<2x8x1xf32, #tpu.memory_space<vmem>>, vector<2x8x1xf32>,
      %cst_9 = arith.constant 0.000000e+00 : f32
      %13 = vector.broadcast %cst_9 : f32 to vector<2x8x16xf32>
      %c0_10 = arith.constant 0 : index
      %c0_11 = arith.constant 0 : index
      %c0_12 = arith.constant 0 : index
      %14 = vector.load %arg9[%c0_10, %c0_11, %c0_12] : memref<2x8x16xf32, #tpu.memory_space<vmem>>, vector<2x8x16xf32>
      tpu.vector_store %arg9[%c0_10, %c0_11, %c0_12], %13 {strides = array<i32>} : memref<2x8x16xf32, #tpu.memory_space<vmem>>, vector<2x8x16xf32>,
    } else {
    }
    %3 = arith.cmpi slt, %arg2, %arg1 : i32
    %4 = arith.extui %3 : i1 to i32
    %c0_i32_1 = arith.constant 0 : i32
    %5 = arith.cmpi ne, %4, %c0_i32_1 : i32
    scf.if %5 {
      %c0 = arith.constant 0 : index
      %c0_3 = arith.constant 0 : index
      %c0_4 = arith.constant 0 : index
      %c0_5 = arith.constant 0 : index
      %9 = vector.load %arg3[%c0, %c0_3, %c0_4, %c0_5] : memref<1x2x8x16xbf16, #tpu.memory_space<vmem>>, vector<1x2x8x16xbf16>
      %10 = vector.shape_cast %9 : vector<1x2x8x16xbf16> to vector<2x8x16xbf16>
      %c0_6 = arith.constant 0 : index
      %c0_7 = arith.constant 0 : index
      %c0_8 = arith.constant 0 : index
      %c0_9 = arith.constant 0 : index
      %11 = vector.load %arg4[%c0_6, %c0_7, %c0_8, %c0_9] : memref<1x2x8x16xbf16, #tpu.memory_space<vmem>>, vector<1x2x8x16xbf16>
      %12 = vector.shape_cast %11 : vector<1x2x8x16xbf16> to vector<2x8x16xbf16>
      %c0_10 = arith.constant 0 : index
      %c0_11 = arith.constant 0 : index
      %c0_12 = arith.constant 0 : index
      %c0_13 = arith.constant 0 : index
      %13 = vector.load %arg5[%c0_10, %c0_11, %c0_12, %c0_13] : memref<1x2x8x16xbf16, #tpu.memory_space<vmem>>, vector<1x2x8x16xbf16>
      %14 = vector.shape_cast %13 : vector<1x2x8x16xbf16> to vector<2x8x16xbf16>
      "tpu.trace_start"() <{level = 10 : i32, message = "hqd,hkd->hqk"}> : () -> ()
      %cst = arith.constant dense<0.000000e+00> : vector<2x8x8xf32>
      %15 = tpu.matmul %10, %12, %cst {dimension_numbers = #tpu.dot_dimension_numbers<[2], [2], [1], [1], [0, 0, 0, 1, 1, 1], [0], [0]>} : vector<2x8x16xbf16>, vector<2x8x16xbf16>, vector<2x8x8xf32> -> vector<2x8x8xf32>
      "tpu.trace_stop"() : () -> ()
      %c0_14 = arith.constant 0 : index
      %c0_15 = arith.constant 0 : index
      %c0_16 = arith.constant 0 : index
      %16 = vector.load %arg7[%c0_14, %c0_15, %c0_16] : memref<2x8x1xf32, #tpu.memory_space<vmem>>, vector<2x8x1xf32>
      %cst_17 = arith.constant dense<0xFF800000> : vector<2x8xf32>
      %17 = vector.multi_reduction <maximumf>, %15, %cst_17 [2] : vector<2x8x8xf32> to vector<2x8xf32>
      %18 = vector.shape_cast %17 : vector<2x8xf32> to vector<2x8x1xf32>
      %19 = arith.maximumf %16, %18 : vector<2x8x1xf32>
      %20 = arith.subf %16, %19 : vector<2x8x1xf32>
      %21 = math.exp %20 : vector<2x8x1xf32>
      %22 = vector.broadcast %19 : vector<2x8x1xf32> to vector<2x8x8xf32>
      %23 = arith.subf %15, %22 : vector<2x8x8xf32>
      %24 = math.exp %23 : vector<2x8x8xf32>
      %c0_18 = arith.constant 0 : index
      %c0_19 = arith.constant 0 : index
      %c0_20 = arith.constant 0 : index
      %25 = vector.load %arg8[%c0_18, %c0_19, %c0_20] : memref<2x8x1xf32, #tpu.memory_space<vmem>>, vector<2x8x1xf32>
      %26 = arith.mulf %21, %25 : vector<2x8x1xf32>
      %cst_21 = arith.constant dense<0.000000e+00> : vector<2x8xf32>
      %27 = vector.multi_reduction <add>, %24, %cst_21 [2] : vector<2x8x8xf32> to vector<2x8xf32>
      %28 = vector.shape_cast %27 : vector<2x8xf32> to vector<2x8x1xf32>
      %29 = arith.addf %26, %28 : vector<2x8x1xf32>
      %c0_22 = arith.constant 0 : index
      %c0_23 = arith.constant 0 : index
      %c0_24 = arith.constant 0 : index
      %30 = vector.load %arg8[%c0_22, %c0_23, %c0_24] : memref<2x8x1xf32, #tpu.memory_space<vmem>>, vector<2x8x1xf32>
      tpu.vector_store %arg8[%c0_22, %c0_23, %c0_24], %29 {strides = array<i32>} : memref<2x8x1xf32, #tpu.memory_space<vmem>>, vector<2x8x1xf32>,
      %c0_25 = arith.constant 0 : index
      %c0_26 = arith.constant 0 : index
      %c0_27 = arith.constant 0 : index
      %31 = vector.load %arg9[%c0_25, %c0_26, %c0_27] : memref<2x8x16xf32, #tpu.memory_space<vmem>>, vector<2x8x16xf32>
      %32 = vector.broadcast %21 : vector<2x8x1xf32> to vector<2x8x16xf32>
      %33 = arith.mulf %32, %31 : vector<2x8x16xf32>
      %34 = arith.truncf %24 : vector<2x8x8xf32> to vector<2x8x8xbf16>
      "tpu.trace_start"() <{level = 10 : i32, message = "hqk,hkd->hqd"}> : () -> ()
      %cst_28 = arith.constant dense<0.000000e+00> : vector<2x8x16xf32>
      %35 = tpu.matmul %34, %14, %cst_28 {dimension_numbers = #tpu.dot_dimension_numbers<[2], [1], [1], [2], [0, 0, 0, 1, 1, 2], [0], [0]>} : vector<2x8x8xbf16>, vector<2x8x16xbf16>, vector<2x8x16xf32> -> vector<2x8x16xf32>
      "tpu.trace_stop"() : () -> ()
      %36 = arith.addf %33, %35 : vector<2x8x16xf32>
      %c0_29 = arith.constant 0 : index
      %c0_30 = arith.constant 0 : index
      %c0_31 = arith.constant 0 : index
      %37 = vector.load %arg9[%c0_29, %c0_30, %c0_31] : memref<2x8x16xf32, #tpu.memory_space<vmem>>, vector<2x8x16xf32>
      tpu.vector_store %arg9[%c0_29, %c0_30, %c0_31], %36 {strides = array<i32>} : memref<2x8x16xf32, #tpu.memory_space<vmem>>, vector<2x8x16xf32>,
      %c0_32 = arith.constant 0 : index
      %c0_33 = arith.constant 0 : index
      %c0_34 = arith.constant 0 : index
      %38 = vector.load %arg7[%c0_32, %c0_33, %c0_34] : memref<2x8x1xf32, #tpu.memory_space<vmem>>, vector<2x8x1xf32>
      tpu.vector_store %arg7[%c0_32, %c0_33, %c0_34], %19 {strides = array<i32>} : memref<2x8x1xf32, #tpu.memory_space<vmem>>, vector<2x8x1xf32>,
    } else {
    }
    %6 = arith.cmpi eq, %arg2, %arg1 : i32
    %7 = arith.extui %6 : i1 to i32
    %c0_i32_2 = arith.constant 0 : i32
    %8 = arith.cmpi ne, %7, %c0_i32_2 : i32
    scf.if %8 {
      %c0 = arith.constant 0 : index
      %c0_3 = arith.constant 0 : index
      %c0_4 = arith.constant 0 : index
      %c0_5 = arith.constant 0 : index
      %9 = vector.load %arg3[%c0, %c0_3, %c0_4, %c0_5] : memref<1x2x8x16xbf16, #tpu.memory_space<vmem>>, vector<1x2x8x16xbf16>
      %10 = vector.shape_cast %9 : vector<1x2x8x16xbf16> to vector<2x8x16xbf16>
      %c0_6 = arith.constant 0 : index
      %c0_7 = arith.constant 0 : index
      %c0_8 = arith.constant 0 : index
      %c0_9 = arith.constant 0 : index
      %11 = vector.load %arg4[%c0_6, %c0_7, %c0_8, %c0_9] : memref<1x2x8x16xbf16, #tpu.memory_space<vmem>>, vector<1x2x8x16xbf16>
      %12 = vector.shape_cast %11 : vector<1x2x8x16xbf16> to vector<2x8x16xbf16>
      %c0_10 = arith.constant 0 : index
      %c0_11 = arith.constant 0 : index
      %c0_12 = arith.constant 0 : index
      %c0_13 = arith.constant 0 : index
      %13 = vector.load %arg5[%c0_10, %c0_11, %c0_12, %c0_13] : memref<1x2x8x16xbf16, #tpu.memory_space<vmem>>, vector<1x2x8x16xbf16>
      %14 = vector.shape_cast %13 : vector<1x2x8x16xbf16> to vector<2x8x16xbf16>
      "tpu.trace_start"() <{level = 10 : i32, message = "hqd,hkd->hqk"}> : () -> ()
      %cst = arith.constant dense<0.000000e+00> : vector<2x8x8xf32>
      %15 = tpu.matmul %10, %12, %cst {dimension_numbers = #tpu.dot_dimension_numbers<[2], [2], [1], [1], [0, 0, 0, 1, 1, 1], [0], [0]>} : vector<2x8x16xbf16>, vector<2x8x16xbf16>, vector<2x8x8xf32> -> vector<2x8x8xf32>
      "tpu.trace_stop"() : () -> ()
      %16 = tpu.iota {dimensions = array<i32: 0>} : vector<8x8xi32>
      %17 = tpu.iota {dimensions = array<i32: 1>} : vector<8x8xi32>
      %18 = arith.cmpi sle, %17, %16 : vector<8x8xi32>
      %19 = vector.shape_cast %18 : vector<8x8xi1> to vector<1x8x8xi1>
      %cst_14 = arith.constant -1.000000e+30 : f32
      %20 = vector.shape_cast %19 : vector<1x8x8xi1> to vector<1x8x8xi1>
      %21 = vector.broadcast %20 : vector<1x8x8xi1> to vector<2x8x8xi1>
      %22 = vector.broadcast %cst_14 : f32 to vector<2x8x8xf32>
      %23 = arith.select %21, %15, %22 : vector<2x8x8xi1>, vector<2x8x8xf32>
      %c0_15 = arith.constant 0 : index
      %c0_16 = arith.constant 0 : index
      %c0_17 = arith.constant 0 : index
      %24 = vector.load %arg7[%c0_15, %c0_16, %c0_17] : memref<2x8x1xf32, #tpu.memory_space<vmem>>, vector<2x8x1xf32>
      %cst_18 = arith.constant dense<0xFF800000> : vector<2x8xf32>
      %25 = vector.multi_reduction <maximumf>, %23, %cst_18 [2] : vector<2x8x8xf32> to vector<2x8xf32>
      %26 = vector.shape_cast %25 : vector<2x8xf32> to vector<2x8x1xf32>
      %27 = arith.maximumf %24, %26 : vector<2x8x1xf32>
      %28 = arith.subf %24, %27 : vector<2x8x1xf32>
      %29 = math.exp %28 : vector<2x8x1xf32>
      %30 = vector.broadcast %27 : vector<2x8x1xf32> to vector<2x8x8xf32>
      %31 = arith.subf %23, %30 : vector<2x8x8xf32>
      %32 = math.exp %31 : vector<2x8x8xf32>
      %c0_19 = arith.constant 0 : index
      %c0_20 = arith.constant 0 : index
      %c0_21 = arith.constant 0 : index
      %33 = vector.load %arg8[%c0_19, %c0_20, %c0_21] : memref<2x8x1xf32, #tpu.memory_space<vmem>>, vector<2x8x1xf32>
      %34 = arith.mulf %29, %33 : vector<2x8x1xf32>
      %cst_22 = arith.constant dense<0.000000e+00> : vector<2x8xf32>
      %35 = vector.multi_reduction <add>, %32, %cst_22 [2] : vector<2x8x8xf32> to vector<2x8xf32>
      %36 = vector.shape_cast %35 : vector<2x8xf32> to vector<2x8x1xf32>
      %37 = arith.addf %34, %36 : vector<2x8x1xf32>
      %c0_23 = arith.constant 0 : index
      %c0_24 = arith.constant 0 : index
      %c0_25 = arith.constant 0 : index
      %38 = vector.load %arg8[%c0_23, %c0_24, %c0_25] : memref<2x8x1xf32, #tpu.memory_space<vmem>>, vector<2x8x1xf32>
      tpu.vector_store %arg8[%c0_23, %c0_24, %c0_25], %37 {strides = array<i32>} : memref<2x8x1xf32, #tpu.memory_space<vmem>>, vector<2x8x1xf32>,
      %c0_26 = arith.constant 0 : index
      %c0_27 = arith.constant 0 : index
      %c0_28 = arith.constant 0 : index
      %39 = vector.load %arg9[%c0_26, %c0_27, %c0_28] : memref<2x8x16xf32, #tpu.memory_space<vmem>>, vector<2x8x16xf32>
      %40 = vector.broadcast %29 : vector<2x8x1xf32> to vector<2x8x16xf32>
      %41 = arith.mulf %40, %39 : vector<2x8x16xf32>
      %42 = arith.truncf %32 : vector<2x8x8xf32> to vector<2x8x8xbf16>
      "tpu.trace_start"() <{level = 10 : i32, message = "hqk,hkd->hqd"}> : () -> ()
      %cst_29 = arith.constant dense<0.000000e+00> : vector<2x8x16xf32>
      %43 = tpu.matmul %42, %14, %cst_29 {dimension_numbers = #tpu.dot_dimension_numbers<[2], [1], [1], [2], [0, 0, 0, 1, 1, 2], [0], [0]>} : vector<2x8x8xbf16>, vector<2x8x16xbf16>, vector<2x8x16xf32> -> vector<2x8x16xf32>
      "tpu.trace_stop"() : () -> ()
      %44 = arith.addf %41, %43 : vector<2x8x16xf32>
      %c0_30 = arith.constant 0 : index
      %c0_31 = arith.constant 0 : index
      %c0_32 = arith.constant 0 : index
      %45 = vector.load %arg9[%c0_30, %c0_31, %c0_32] : memref<2x8x16xf32, #tpu.memory_space<vmem>>, vector<2x8x16xf32>
      tpu.vector_store %arg9[%c0_30, %c0_31, %c0_32], %44 {strides = array<i32>} : memref<2x8x16xf32, #tpu.memory_space<vmem>>, vector<2x8x16xf32>,
      %c0_33 = arith.constant 0 : index
      %c0_34 = arith.constant 0 : index
      %c0_35 = arith.constant 0 : index
      %46 = vector.load %arg7[%c0_33, %c0_34, %c0_35] : memref<2x8x1xf32, #tpu.memory_space<vmem>>, vector<2x8x1xf32>
      tpu.vector_store %arg7[%c0_33, %c0_34, %c0_35], %27 {strides = array<i32>} : memref<2x8x1xf32, #tpu.memory_space<vmem>>, vector<2x8x1xf32>,
      %c0_36 = arith.constant 0 : index
      %c0_37 = arith.constant 0 : index
      %c0_38 = arith.constant 0 : index
      %47 = vector.load %arg8[%c0_36, %c0_37, %c0_38] : memref<2x8x1xf32, #tpu.memory_space<vmem>>, vector<2x8x1xf32>
      %48 = tpu.reciprocal %47 {approx = true} : vector<2x8x1xf32> -> vector<2x8x1xf32>
      %c0_39 = arith.constant 0 : index
      %c0_40 = arith.constant 0 : index
      %c0_41 = arith.constant 0 : index
      %49 = vector.load %arg9[%c0_39, %c0_40, %c0_41] : memref<2x8x16xf32, #tpu.memory_space<vmem>>, vector<2x8x16xf32>
      %50 = vector.broadcast %48 : vector<2x8x1xf32> to vector<2x8x16xf32>
      %51 = arith.mulf %49, %50 : vector<2x8x16xf32>
      %52 = vector.extract_strided_slice %51 {offsets = [0, 0, 0], sizes = [1, 8, 16], strides = [1, 1, 1]} : vector<2x8x16xf32> to vector<1x8x16xf32>
      %53 = vector.shape_cast %52 : vector<1x8x16xf32> to vector<8x16xf32>
      %54 = arith.truncf %53 : vector<8x16xf32> to vector<8x16xbf16>
      %c0_42 = arith.constant 0 : index
      %c0_43 = arith.constant 0 : index
      %c0_44 = arith.constant 0 : index
      %55 = vector.load %arg6[%c0_42, %c0_43, %c0_44] : memref<1x8x32xbf16, #tpu.memory_space<vmem>>, vector<1x8x16xbf16>
      %56 = vector.shape_cast %55 : vector<1x8x16xbf16> to vector<8x16xbf16>
      %57 = vector.shape_cast %54 : vector<8x16xbf16> to vector<1x8x16xbf16>
      tpu.vector_store %arg6[%c0_42, %c0_43, %c0_44], %57 {strides = array<i32>} : memref<1x8x32xbf16, #tpu.memory_space<vmem>>, vector<1x8x16xbf16>,
      %58 = vector.extract_strided_slice %51 {offsets = [1, 0, 0], sizes = [1, 8, 16], strides = [1, 1, 1]} : vector<2x8x16xf32> to vector<1x8x16xf32>
      %59 = vector.shape_cast %58 : vector<1x8x16xf32> to vector<8x16xf32>
      %60 = arith.truncf %59 : vector<8x16xf32> to vector<8x16xbf16>
      %c0_45 = arith.constant 0 : index
      %c0_46 = arith.constant 0 : index
      %c16 = arith.constant 16 : index
      %61 = vector.load %arg6[%c0_45, %c0_46, %c16] : memref<1x8x32xbf16, #tpu.memory_space<vmem>>, vector<1x8x16xbf16>
      %62 = vector.shape_cast %61 : vector<1x8x16xbf16> to vector<8x16xbf16>
      %63 = vector.shape_cast %60 : vector<8x16xbf16> to vector<1x8x16xbf16>
      tpu.vector_store %arg6[%c0_45, %c0_46, %c16], %63 {strides = array<i32>} : memref<1x8x32xbf16, #tpu.memory_space<vmem>>, vector<1x8x16xbf16>,
    } else {
    }
    return
  }
  func.func @transform_0(%arg0: i32, %arg1: i32, %arg2: i32) -> (i32, i32, i32, i32) {
    %c0_i32 = arith.constant 0 : i32
    %c0_i32_0 = arith.constant 0 : i32
    %c0_i32_1 = arith.constant 0 : i32
    return %arg0, %c0_i32, %arg1, %c0_i32_0 : i32, i32, i32, i32
  }
  func.func @transform_1(%arg0: i32, %arg1: i32, %arg2: i32) -> (i32, i32, i32, i32) {
    %0 = arith.minsi %arg2, %arg1 : i32
    %c0_i32 = arith.constant 0 : i32
    %c0_i32_0 = arith.constant 0 : i32
    %c0_i32_1 = arith.constant 0 : i32
    return %arg0, %c0_i32, %0, %c0_i32_0 : i32, i32, i32, i32
  }
  func.func @transform_2(%arg0: i32, %arg1: i32, %arg2: i32) -> (i32, i32, i32, i32) {
    %0 = arith.minsi %arg2, %arg1 : i32
    %c0_i32 = arith.constant 0 : i32
    %c0_i32_0 = arith.constant 0 : i32
    %c0_i32_1 = arith.constant 0 : i32
    return %arg0, %c0_i32, %0, %c0_i32_0 : i32, i32, i32, i32
  }
  func.func @transform_3(%arg0: i32, %arg1: i32, %arg2: i32) -> (i32, i32, i32) {
    %c0_i32 = arith.constant 0 : i32
    %c0_i32_0 = arith.constant 0 : i32
    return %arg0, %arg1, %c0_i32 : i32, i32, i32
  }
}

module attributes {stable_mosaic.version = 11 : i64} {
  func.func @qkv_kernel(%arg0: i32, %arg1: i32, %arg2: memref<1x8x32xf32, #tpu.memory_space<vmem>>, %arg3: memref<1x32xf32, #tpu.memory_space<vmem>>, %arg4: memref<1x32xf32, #tpu.memory_space<vmem>>, %arg5: memref<32x96xbf16, #tpu.memory_space<vmem>>, %arg6: memref<1x96xf32, #tpu.memory_space<vmem>>, %arg7: memref<1x2x8x16xbf16, #tpu.memory_space<vmem>>, %arg8: memref<1x2x8x16xbf16, #tpu.memory_space<vmem>>, %arg9: memref<1x2x8x16xbf16, #tpu.memory_space<vmem>>) attributes {dimension_semantics = [#tpu.dimension_semantics<parallel>, #tpu.dimension_semantics<parallel>], iteration_bounds = array<i64: 2, 1>, scalar_prefetch = 0 : i64, scratch_operands = 0 : i64, tpu.core_type = #tpu.core_type<tc>, window_params = [{transform_indices = @transform_0, window_bounds = array<i64: 1, 8, 32>}, {pipeline_mode = #tpu.pipeline_mode<synchronous>, transform_indices = @transform_1, window_bounds = array<i64: 1, 32>}, {pipeline_mode = #tpu.pipeline_mode<synchronous>, transform_indices = @transform_2, window_bounds = array<i64: 1, 32>}, {pipeline_mode = #tpu.pipeline_mode<synchronous>, transform_indices = @transform_3, window_bounds = array<i64: 32, 96>}, {pipeline_mode = #tpu.pipeline_mode<synchronous>, transform_indices = @transform_4, window_bounds = array<i64: 1, 96>}, {transform_indices = @transform_5, window_bounds = array<i64: 1, 2, 8, 16>}, {transform_indices = @transform_6, window_bounds = array<i64: 1, 2, 8, 16>}, {transform_indices = @transform_7, window_bounds = array<i64: 1, 2, 8, 16>}]} {
    %c0 = arith.constant 0 : index
    %c0_0 = arith.constant 0 : index
    %c0_1 = arith.constant 0 : index
    %0 = vector.load %arg2[%c0, %c0_0, %c0_1] : memref<1x8x32xf32, #tpu.memory_space<vmem>>, vector<1x8x32xf32>
    %1 = vector.shape_cast %0 : vector<1x8x32xf32> to vector<8x32xf32>
    %c0_2 = arith.constant 0 : index
    %c0_3 = arith.constant 0 : index
    %2 = vector.load %arg3[%c0_2, %c0_3] : memref<1x32xf32, #tpu.memory_space<vmem>>, vector<1x32xf32>
    %c0_4 = arith.constant 0 : index
    %c0_5 = arith.constant 0 : index
    %3 = vector.load %arg4[%c0_4, %c0_5] : memref<1x32xf32, #tpu.memory_space<vmem>>, vector<1x32xf32>
    %cst = arith.constant dense<0.000000e+00> : vector<8xf32>
    %4 = vector.multi_reduction <add>, %1, %cst [1] : vector<8x32xf32> to vector<8xf32>
    %5 = vector.shape_cast %4 : vector<8xf32> to vector<8x1xf32>
    %cst_6 = arith.constant 3.200000e+01 : f32
    %6 = vector.broadcast %cst_6 : f32 to vector<8x1xf32>
    %7 = arith.divf %5, %6 : vector<8x1xf32>
    %8 = vector.broadcast %7 : vector<8x1xf32> to vector<8x32xf32>
    %9 = arith.subf %1, %8 : vector<8x32xf32>
    %10 = arith.mulf %9, %9 : vector<8x32xf32>
    %cst_7 = arith.constant dense<0.000000e+00> : vector<8xf32>
    %11 = vector.multi_reduction <add>, %10, %cst_7 [1] : vector<8x32xf32> to vector<8xf32>
    %12 = vector.shape_cast %11 : vector<8xf32> to vector<8x1xf32>
    %cst_8 = arith.constant 3.200000e+01 : f32
    %13 = vector.broadcast %cst_8 : f32 to vector<8x1xf32>
    %14 = arith.divf %12, %13 : vector<8x1xf32>
    %15 = vector.broadcast %7 : vector<8x1xf32> to vector<8x32xf32>
    %16 = arith.subf %1, %15 : vector<8x32xf32>
    %cst_9 = arith.constant 9.99999974E-6 : f32
    %17 = vector.broadcast %cst_9 : f32 to vector<8x1xf32>
    %18 = arith.addf %14, %17 : vector<8x1xf32>
    %19 = math.rsqrt %18 : vector<8x1xf32>
    %20 = vector.broadcast %19 : vector<8x1xf32> to vector<8x32xf32>
    %21 = arith.mulf %16, %20 : vector<8x32xf32>
    %22 = vector.broadcast %2 : vector<1x32xf32> to vector<8x32xf32>
    %23 = arith.mulf %21, %22 : vector<8x32xf32>
    %24 = vector.broadcast %3 : vector<1x32xf32> to vector<8x32xf32>
    %25 = arith.addf %23, %24 : vector<8x32xf32>
    %26 = arith.truncf %25 : vector<8x32xf32> to vector<8x32xbf16>
    %c0_10 = arith.constant 0 : index
    %c0_11 = arith.constant 0 : index
    %27 = vector.load %arg5[%c0_10, %c0_11] : memref<32x96xbf16, #tpu.memory_space<vmem>>, vector<32x96xbf16>
    %cst_12 = arith.constant dense<0.000000e+00> : vector<8x96xf32>
    %28 = tpu.matmul %26, %27, %cst_12 {dimension_numbers = #tpu.dot_dimension_numbers<[1], [0], [0], [1], [0, 0, 1, 1], [], []>} : vector<8x32xbf16>, vector<32x96xbf16>, vector<8x96xf32> -> vector<8x96xf32>
    %c0_13 = arith.constant 0 : index
    %c0_14 = arith.constant 0 : index
    %29 = vector.load %arg6[%c0_13, %c0_14] : memref<1x96xf32, #tpu.memory_space<vmem>>, vector<1x96xf32>
    %30 = vector.broadcast %29 : vector<1x96xf32> to vector<8x96xf32>
    %31 = arith.addf %28, %30 : vector<8x96xf32>
    %32 = vector.extract_strided_slice %31 {offsets = [0, 0], sizes = [8, 32], strides = [1, 1]} : vector<8x96xf32> to vector<8x32xf32>
    %cst_15 = arith.constant 2.500000e-01 : f32
    %33 = vector.broadcast %cst_15 : f32 to vector<8x32xf32>
    %34 = arith.mulf %32, %33 : vector<8x32xf32>
    %35 = vector.extract_strided_slice %31 {offsets = [0, 32], sizes = [8, 32], strides = [1, 1]} : vector<8x96xf32> to vector<8x32xf32>
    %36 = vector.extract_strided_slice %31 {offsets = [0, 64], sizes = [8, 32], strides = [1, 1]} : vector<8x96xf32> to vector<8x32xf32>
    %37 = vector.extract_strided_slice %34 {offsets = [0, 0], sizes = [8, 16], strides = [1, 1]} : vector<8x32xf32> to vector<8x16xf32>
    %38 = arith.truncf %37 : vector<8x16xf32> to vector<8x16xbf16>
    %c0_16 = arith.constant 0 : index
    %c0_17 = arith.constant 0 : index
    %c0_18 = arith.constant 0 : index
    %c0_19 = arith.constant 0 : index
    %39 = vector.load %arg7[%c0_16, %c0_17, %c0_18, %c0_19] : memref<1x2x8x16xbf16, #tpu.memory_space<vmem>>, vector<1x1x8x16xbf16>
    %40 = vector.shape_cast %39 : vector<1x1x8x16xbf16> to vector<8x16xbf16>
    %41 = vector.shape_cast %38 : vector<8x16xbf16> to vector<1x1x8x16xbf16>
    tpu.vector_store %arg7[%c0_16, %c0_17, %c0_18, %c0_19], %41 {strides = array<i32>} : memref<1x2x8x16xbf16, #tpu.memory_space<vmem>>, vector<1x1x8x16xbf16>,
    %42 = vector.extract_strided_slice %35 {offsets = [0, 0], sizes = [8, 16], strides = [1, 1]} : vector<8x32xf32> to vector<8x16xf32>
    %43 = arith.truncf %42 : vector<8x16xf32> to vector<8x16xbf16>
    %c0_20 = arith.constant 0 : index
    %c0_21 = arith.constant 0 : index
    %c0_22 = arith.constant 0 : index
    %c0_23 = arith.constant 0 : index
    %44 = vector.load %arg8[%c0_20, %c0_21, %c0_22, %c0_23] : memref<1x2x8x16xbf16, #tpu.memory_space<vmem>>, vector<1x1x8x16xbf16>
    %45 = vector.shape_cast %44 : vector<1x1x8x16xbf16> to vector<8x16xbf16>
    %46 = vector.shape_cast %43 : vector<8x16xbf16> to vector<1x1x8x16xbf16>
    tpu.vector_store %arg8[%c0_20, %c0_21, %c0_22, %c0_23], %46 {strides = array<i32>} : memref<1x2x8x16xbf16, #tpu.memory_space<vmem>>, vector<1x1x8x16xbf16>,
    %47 = vector.extract_strided_slice %36 {offsets = [0, 0], sizes = [8, 16], strides = [1, 1]} : vector<8x32xf32> to vector<8x16xf32>
    %48 = arith.truncf %47 : vector<8x16xf32> to vector<8x16xbf16>
    %c0_24 = arith.constant 0 : index
    %c0_25 = arith.constant 0 : index
    %c0_26 = arith.constant 0 : index
    %c0_27 = arith.constant 0 : index
    %49 = vector.load %arg9[%c0_24, %c0_25, %c0_26, %c0_27] : memref<1x2x8x16xbf16, #tpu.memory_space<vmem>>, vector<1x1x8x16xbf16>
    %50 = vector.shape_cast %49 : vector<1x1x8x16xbf16> to vector<8x16xbf16>
    %51 = vector.shape_cast %48 : vector<8x16xbf16> to vector<1x1x8x16xbf16>
    tpu.vector_store %arg9[%c0_24, %c0_25, %c0_26, %c0_27], %51 {strides = array<i32>} : memref<1x2x8x16xbf16, #tpu.memory_space<vmem>>, vector<1x1x8x16xbf16>,
    %52 = vector.extract_strided_slice %34 {offsets = [0, 16], sizes = [8, 16], strides = [1, 1]} : vector<8x32xf32> to vector<8x16xf32>
    %53 = arith.truncf %52 : vector<8x16xf32> to vector<8x16xbf16>
    %c0_28 = arith.constant 0 : index
    %c1 = arith.constant 1 : index
    %c0_29 = arith.constant 0 : index
    %c0_30 = arith.constant 0 : index
    %54 = vector.load %arg7[%c0_28, %c1, %c0_29, %c0_30] : memref<1x2x8x16xbf16, #tpu.memory_space<vmem>>, vector<1x1x8x16xbf16>
    %55 = vector.shape_cast %54 : vector<1x1x8x16xbf16> to vector<8x16xbf16>
    %56 = vector.shape_cast %53 : vector<8x16xbf16> to vector<1x1x8x16xbf16>
    tpu.vector_store %arg7[%c0_28, %c1, %c0_29, %c0_30], %56 {strides = array<i32>} : memref<1x2x8x16xbf16, #tpu.memory_space<vmem>>, vector<1x1x8x16xbf16>,
    %57 = vector.extract_strided_slice %35 {offsets = [0, 16], sizes = [8, 16], strides = [1, 1]} : vector<8x32xf32> to vector<8x16xf32>
    %58 = arith.truncf %57 : vector<8x16xf32> to vector<8x16xbf16>
    %c0_31 = arith.constant 0 : index
    %c1_32 = arith.constant 1 : index
    %c0_33 = arith.constant 0 : index
    %c0_34 = arith.constant 0 : index
    %59 = vector.load %arg8[%c0_31, %c1_32, %c0_33, %c0_34] : memref<1x2x8x16xbf16, #tpu.memory_space<vmem>>, vector<1x1x8x16xbf16>
    %60 = vector.shape_cast %59 : vector<1x1x8x16xbf16> to vector<8x16xbf16>
    %61 = vector.shape_cast %58 : vector<8x16xbf16> to vector<1x1x8x16xbf16>
    tpu.vector_store %arg8[%c0_31, %c1_32, %c0_33, %c0_34], %61 {strides = array<i32>} : memref<1x2x8x16xbf16, #tpu.memory_space<vmem>>, vector<1x1x8x16xbf16>,
    %62 = vector.extract_strided_slice %36 {offsets = [0, 16], sizes = [8, 16], strides = [1, 1]} : vector<8x32xf32> to vector<8x16xf32>
    %63 = arith.truncf %62 : vector<8x16xf32> to vector<8x16xbf16>
    %c0_35 = arith.constant 0 : index
    %c1_36 = arith.constant 1 : index
    %c0_37 = arith.constant 0 : index
    %c0_38 = arith.constant 0 : index
    %64 = vector.load %arg9[%c0_35, %c1_36, %c0_37, %c0_38] : memref<1x2x8x16xbf16, #tpu.memory_space<vmem>>, vector<1x1x8x16xbf16>
    %65 = vector.shape_cast %64 : vector<1x1x8x16xbf16> to vector<8x16xbf16>
    %66 = vector.shape_cast %63 : vector<8x16xbf16> to vector<1x1x8x16xbf16>
    tpu.vector_store %arg9[%c0_35, %c1_36, %c0_37, %c0_38], %66 {strides = array<i32>} : memref<1x2x8x16xbf16, #tpu.memory_space<vmem>>, vector<1x1x8x16xbf16>,
    return
  }
  func.func @transform_0(%arg0: i32, %arg1: i32) -> (i32, i32, i32) {
    %c0_i32 = arith.constant 0 : i32
    %c0_i32_0 = arith.constant 0 : i32
    return %arg0, %arg1, %c0_i32 : i32, i32, i32
  }
  func.func @transform_1(%arg0: i32, %arg1: i32) -> (i32, i32) {
    %c0_i32 = arith.constant 0 : i32
    %c0_i32_0 = arith.constant 0 : i32
    %c0_i32_1 = arith.constant 0 : i32
    return %c0_i32, %c0_i32_0 : i32, i32
  }
  func.func @transform_2(%arg0: i32, %arg1: i32) -> (i32, i32) {
    %c0_i32 = arith.constant 0 : i32
    %c0_i32_0 = arith.constant 0 : i32
    %c0_i32_1 = arith.constant 0 : i32
    return %c0_i32, %c0_i32_0 : i32, i32
  }
  func.func @transform_3(%arg0: i32, %arg1: i32) -> (i32, i32) {
    %c0_i32 = arith.constant 0 : i32
    %c0_i32_0 = arith.constant 0 : i32
    %c0_i32_1 = arith.constant 0 : i32
    return %c0_i32, %c0_i32_0 : i32, i32
  }
  func.func @transform_4(%arg0: i32, %arg1: i32) -> (i32, i32) {
    %c0_i32 = arith.constant 0 : i32
    %c0_i32_0 = arith.constant 0 : i32
    %c0_i32_1 = arith.constant 0 : i32
    return %c0_i32, %c0_i32_0 : i32, i32
  }
  func.func @transform_5(%arg0: i32, %arg1: i32) -> (i32, i32, i32, i32) {
    %c0_i32 = arith.constant 0 : i32
    %c0_i32_0 = arith.constant 0 : i32
    %c0_i32_1 = arith.constant 0 : i32
    return %arg0, %c0_i32, %arg1, %c0_i32_0 : i32, i32, i32, i32
  }
  func.func @transform_6(%arg0: i32, %arg1: i32) -> (i32, i32, i32, i32) {
    %c0_i32 = arith.constant 0 : i32
    %c0_i32_0 = arith.constant 0 : i32
    %c0_i32_1 = arith.constant 0 : i32
    return %arg0, %c0_i32, %arg1, %c0_i32_0 : i32, i32, i32, i32
  }
  func.func @transform_7(%arg0: i32, %arg1: i32) -> (i32, i32, i32, i32) {
    %c0_i32 = arith.constant 0 : i32
    %c0_i32_0 = arith.constant 0 : i32
    %c0_i32_1 = arith.constant 0 : i32
    return %arg0, %c0_i32, %arg1, %c0_i32_0 : i32, i32, i32, i32
  }
}

module attributes {stable_mosaic.version = 11 : i64} {
  func.func @proj_mlp_kernel(%arg0: i32, %arg1: i32, %arg2: i32, %arg3: memref<1x8x32xf32, #tpu.memory_space<vmem>>, %arg4: memref<1x8x32xbf16, #tpu.memory_space<vmem>>, %arg5: memref<32x32xbf16, #tpu.memory_space<vmem>>, %arg6: memref<1x32xf32, #tpu.memory_space<vmem>>, %arg7: memref<1x32xf32, #tpu.memory_space<vmem>>, %arg8: memref<1x32xf32, #tpu.memory_space<vmem>>, %arg9: memref<32x128xbf16, #tpu.memory_space<vmem>>, %arg10: memref<1x128xf32, #tpu.memory_space<vmem>>, %arg11: memref<128x32xbf16, #tpu.memory_space<vmem>>, %arg12: memref<1x32xf32, #tpu.memory_space<vmem>>, %arg13: memref<1x8x32xf32, #tpu.memory_space<vmem>>, %arg14: memref<8x32xf32, #tpu.memory_space<vmem>>, %arg15: memref<8x32xbf16, #tpu.memory_space<vmem>>, %arg16: memref<8x32xf32, #tpu.memory_space<vmem>>) attributes {dimension_semantics = [#tpu.dimension_semantics<parallel>, #tpu.dimension_semantics<parallel>, #tpu.dimension_semantics<arbitrary>], iteration_bounds = array<i64: 2, 1, 1>, scalar_prefetch = 0 : i64, scratch_operands = 3 : i64, tpu.core_type = #tpu.core_type<tc>, window_params = [{transform_indices = @transform_0, window_bounds = array<i64: 1, 8, 32>}, {transform_indices = @transform_1, window_bounds = array<i64: 1, 8, 32>}, {pipeline_mode = #tpu.pipeline_mode<synchronous>, transform_indices = @transform_2, window_bounds = array<i64: 32, 32>}, {pipeline_mode = #tpu.pipeline_mode<synchronous>, transform_indices = @transform_3, window_bounds = array<i64: 1, 32>}, {pipeline_mode = #tpu.pipeline_mode<synchronous>, transform_indices = @transform_4, window_bounds = array<i64: 1, 32>}, {pipeline_mode = #tpu.pipeline_mode<synchronous>, transform_indices = @transform_5, window_bounds = array<i64: 1, 32>}, {transform_indices = @transform_6, window_bounds = array<i64: 32, 128>}, {transform_indices = @transform_7, window_bounds = array<i64: 1, 128>}, {transform_indices = @transform_8, window_bounds = array<i64: 128, 32>}, {pipeline_mode = #tpu.pipeline_mode<synchronous>, transform_indices = @transform_9, window_bounds = array<i64: 1, 32>}, {transform_indices = @transform_10, window_bounds = array<i64: 1, 8, 32>}]} {
    %c0_i32 = arith.constant 0 : i32
    %0 = arith.cmpi eq, %arg2, %c0_i32 : i32
    %1 = arith.extui %0 : i1 to i32
    %c0_i32_0 = arith.constant 0 : i32
    %2 = arith.cmpi ne, %1, %c0_i32_0 : i32
    scf.if %2 {
      %c0_19 = arith.constant 0 : index
      %c0_20 = arith.constant 0 : index
      %c0_21 = arith.constant 0 : index
      %31 = vector.load %arg3[%c0_19, %c0_20, %c0_21] : memref<1x8x32xf32, #tpu.memory_space<vmem>>, vector<1x8x32xf32>
      %32 = vector.shape_cast %31 : vector<1x8x32xf32> to vector<8x32xf32>
      %c0_22 = arith.constant 0 : index
      %c0_23 = arith.constant 0 : index
      %c0_24 = arith.constant 0 : index
      %33 = vector.load %arg4[%c0_22, %c0_23, %c0_24] : memref<1x8x32xbf16, #tpu.memory_space<vmem>>, vector<1x8x32xbf16>
      %34 = vector.shape_cast %33 : vector<1x8x32xbf16> to vector<8x32xbf16>
      %c0_25 = arith.constant 0 : index
      %c0_26 = arith.constant 0 : index
      %35 = vector.load %arg5[%c0_25, %c0_26] : memref<32x32xbf16, #tpu.memory_space<vmem>>, vector<32x32xbf16>
      %cst_27 = arith.constant dense<0.000000e+00> : vector<8x32xf32>
      %36 = tpu.matmul %34, %35, %cst_27 {dimension_numbers = #tpu.dot_dimension_numbers<[1], [0], [0], [1], [0, 0, 1, 1], [], []>} : vector<8x32xbf16>, vector<32x32xbf16>, vector<8x32xf32> -> vector<8x32xf32>
      %c0_28 = arith.constant 0 : index
      %c0_29 = arith.constant 0 : index
      %37 = vector.load %arg6[%c0_28, %c0_29] : memref<1x32xf32, #tpu.memory_space<vmem>>, vector<1x32xf32>
      %38 = vector.broadcast %37 : vector<1x32xf32> to vector<8x32xf32>
      %39 = arith.addf %36, %38 : vector<8x32xf32>
      %40 = arith.addf %32, %39 : vector<8x32xf32>
      %c0_30 = arith.constant 0 : index
      %c0_31 = arith.constant 0 : index
      %41 = vector.load %arg14[%c0_30, %c0_31] : memref<8x32xf32, #tpu.memory_space<vmem>>, vector<8x32xf32>
      tpu.vector_store %arg14[%c0_30, %c0_31], %40 {strides = array<i32>} : memref<8x32xf32, #tpu.memory_space<vmem>>, vector<8x32xf32>,
      %c0_32 = arith.constant 0 : index
      %c0_33 = arith.constant 0 : index
      %42 = vector.load %arg7[%c0_32, %c0_33] : memref<1x32xf32, #tpu.memory_space<vmem>>, vector<1x32xf32>
      %c0_34 = arith.constant 0 : index
      %c0_35 = arith.constant 0 : index
      %43 = vector.load %arg8[%c0_34, %c0_35] : memref<1x32xf32, #tpu.memory_space<vmem>>, vector<1x32xf32>
      %cst_36 = arith.constant dense<0.000000e+00> : vector<8xf32>
      %44 = vector.multi_reduction <add>, %40, %cst_36 [1] : vector<8x32xf32> to vector<8xf32>
      %45 = vector.shape_cast %44 : vector<8xf32> to vector<8x1xf32>
      %cst_37 = arith.constant 3.200000e+01 : f32
      %46 = vector.broadcast %cst_37 : f32 to vector<8x1xf32>
      %47 = arith.divf %45, %46 : vector<8x1xf32>
      %48 = vector.broadcast %47 : vector<8x1xf32> to vector<8x32xf32>
      %49 = arith.subf %40, %48 : vector<8x32xf32>
      %50 = arith.mulf %49, %49 : vector<8x32xf32>
      %cst_38 = arith.constant dense<0.000000e+00> : vector<8xf32>
      %51 = vector.multi_reduction <add>, %50, %cst_38 [1] : vector<8x32xf32> to vector<8xf32>
      %52 = vector.shape_cast %51 : vector<8xf32> to vector<8x1xf32>
      %cst_39 = arith.constant 3.200000e+01 : f32
      %53 = vector.broadcast %cst_39 : f32 to vector<8x1xf32>
      %54 = arith.divf %52, %53 : vector<8x1xf32>
      %55 = vector.broadcast %47 : vector<8x1xf32> to vector<8x32xf32>
      %56 = arith.subf %40, %55 : vector<8x32xf32>
      %cst_40 = arith.constant 9.99999974E-6 : f32
      %57 = vector.broadcast %cst_40 : f32 to vector<8x1xf32>
      %58 = arith.addf %54, %57 : vector<8x1xf32>
      %59 = math.rsqrt %58 : vector<8x1xf32>
      %60 = vector.broadcast %59 : vector<8x1xf32> to vector<8x32xf32>
      %61 = arith.mulf %56, %60 : vector<8x32xf32>
      %62 = vector.broadcast %42 : vector<1x32xf32> to vector<8x32xf32>
      %63 = arith.mulf %61, %62 : vector<8x32xf32>
      %64 = vector.broadcast %43 : vector<1x32xf32> to vector<8x32xf32>
      %65 = arith.addf %63, %64 : vector<8x32xf32>
      %66 = arith.truncf %65 : vector<8x32xf32> to vector<8x32xbf16>
      %c0_41 = arith.constant 0 : index
      %c0_42 = arith.constant 0 : index
      %67 = vector.load %arg15[%c0_41, %c0_42] : memref<8x32xbf16, #tpu.memory_space<vmem>>, vector<8x32xbf16>
      tpu.vector_store %arg15[%c0_41, %c0_42], %66 {strides = array<i32>} : memref<8x32xbf16, #tpu.memory_space<vmem>>, vector<8x32xbf16>,
      %cst_43 = arith.constant 0.000000e+00 : f32
      %68 = vector.broadcast %cst_43 : f32 to vector<8x32xf32>
      %c0_44 = arith.constant 0 : index
      %c0_45 = arith.constant 0 : index
      %69 = vector.load %arg16[%c0_44, %c0_45] : memref<8x32xf32, #tpu.memory_space<vmem>>, vector<8x32xf32>
      tpu.vector_store %arg16[%c0_44, %c0_45], %68 {strides = array<i32>} : memref<8x32xf32, #tpu.memory_space<vmem>>, vector<8x32xf32>,
    } else {
    }
    %c0 = arith.constant 0 : index
    %c0_1 = arith.constant 0 : index
    %3 = vector.load %arg15[%c0, %c0_1] : memref<8x32xbf16, #tpu.memory_space<vmem>>, vector<8x32xbf16>
    %c0_2 = arith.constant 0 : index
    %c0_3 = arith.constant 0 : index
    %4 = vector.load %arg9[%c0_2, %c0_3] : memref<32x128xbf16, #tpu.memory_space<vmem>>, vector<32x128xbf16>
    %cst = arith.constant dense<0.000000e+00> : vector<8x128xf32>
    %5 = tpu.matmul %3, %4, %cst {dimension_numbers = #tpu.dot_dimension_numbers<[1], [0], [0], [1], [0, 0, 1, 1], [], []>} : vector<8x32xbf16>, vector<32x128xbf16>, vector<8x128xf32> -> vector<8x128xf32>
    %c0_4 = arith.constant 0 : index
    %c0_5 = arith.constant 0 : index
    %6 = vector.load %arg10[%c0_4, %c0_5] : memref<1x128xf32, #tpu.memory_space<vmem>>, vector<1x128xf32>
    %7 = vector.broadcast %6 : vector<1x128xf32> to vector<8x128xf32>
    %8 = arith.addf %5, %7 : vector<8x128xf32>
    %cst_6 = arith.constant 5.000000e-01 : f32
    %9 = vector.broadcast %cst_6 : f32 to vector<8x128xf32>
    %10 = arith.mulf %9, %8 : vector<8x128xf32>
    %cst_7 = arith.constant 4.471500e-02 : f32
    %11 = vector.broadcast %cst_7 : f32 to vector<8x128xf32>
    %12 = arith.mulf %11, %8 : vector<8x128xf32>
    %13 = arith.mulf %12, %8 : vector<8x128xf32>
    %14 = arith.mulf %13, %8 : vector<8x128xf32>
    %15 = arith.addf %8, %14 : vector<8x128xf32>
    %cst_8 = arith.constant 0.797884583 : f32
    %16 = vector.broadcast %cst_8 : f32 to vector<8x128xf32>
    %17 = arith.mulf %16, %15 : vector<8x128xf32>
    %18 = math.tanh %17 : vector<8x128xf32>
    %cst_9 = arith.constant 1.000000e+00 : f32
    %19 = vector.broadcast %cst_9 : f32 to vector<8x128xf32>
    %20 = arith.addf %19, %18 : vector<8x128xf32>
    %21 = arith.mulf %10, %20 : vector<8x128xf32>
    %22 = arith.truncf %21 : vector<8x128xf32> to vector<8x128xbf16>
    %c0_10 = arith.constant 0 : index
    %c0_11 = arith.constant 0 : index
    %23 = vector.load %arg16[%c0_10, %c0_11] : memref<8x32xf32, #tpu.memory_space<vmem>>, vector<8x32xf32>
    %c0_12 = arith.constant 0 : index
    %c0_13 = arith.constant 0 : index
    %24 = vector.load %arg11[%c0_12, %c0_13] : memref<128x32xbf16, #tpu.memory_space<vmem>>, vector<128x32xbf16>
    %cst_14 = arith.constant dense<0.000000e+00> : vector<8x32xf32>
    %25 = tpu.matmul %22, %24, %cst_14 {dimension_numbers = #tpu.dot_dimension_numbers<[1], [0], [0], [1], [0, 0, 1, 1], [], []>} : vector<8x128xbf16>, vector<128x32xbf16>, vector<8x32xf32> -> vector<8x32xf32>
    %26 = arith.addf %23, %25 : vector<8x32xf32>
    %c0_15 = arith.constant 0 : index
    %c0_16 = arith.constant 0 : index
    %27 = vector.load %arg16[%c0_15, %c0_16] : memref<8x32xf32, #tpu.memory_space<vmem>>, vector<8x32xf32>
    tpu.vector_store %arg16[%c0_15, %c0_16], %26 {strides = array<i32>} : memref<8x32xf32, #tpu.memory_space<vmem>>, vector<8x32xf32>,
    %c0_i32_17 = arith.constant 0 : i32
    %28 = arith.cmpi eq, %arg2, %c0_i32_17 : i32
    %29 = arith.extui %28 : i1 to i32
    %c0_i32_18 = arith.constant 0 : i32
    %30 = arith.cmpi ne, %29, %c0_i32_18 : i32
    scf.if %30 {
      %c0_19 = arith.constant 0 : index
      %c0_20 = arith.constant 0 : index
      %31 = vector.load %arg14[%c0_19, %c0_20] : memref<8x32xf32, #tpu.memory_space<vmem>>, vector<8x32xf32>
      %c0_21 = arith.constant 0 : index
      %c0_22 = arith.constant 0 : index
      %32 = vector.load %arg16[%c0_21, %c0_22] : memref<8x32xf32, #tpu.memory_space<vmem>>, vector<8x32xf32>
      %33 = arith.addf %31, %32 : vector<8x32xf32>
      %c0_23 = arith.constant 0 : index
      %c0_24 = arith.constant 0 : index
      %34 = vector.load %arg12[%c0_23, %c0_24] : memref<1x32xf32, #tpu.memory_space<vmem>>, vector<1x32xf32>
      %35 = vector.broadcast %34 : vector<1x32xf32> to vector<8x32xf32>
      %36 = arith.addf %33, %35 : vector<8x32xf32>
      %c0_25 = arith.constant 0 : index
      %c0_26 = arith.constant 0 : index
      %c0_27 = arith.constant 0 : index
      %37 = vector.load %arg13[%c0_25, %c0_26, %c0_27] : memref<1x8x32xf32, #tpu.memory_space<vmem>>, vector<1x8x32xf32>
      %38 = vector.shape_cast %37 : vector<1x8x32xf32> to vector<8x32xf32>
      %39 = vector.shape_cast %36 : vector<8x32xf32> to vector<1x8x32xf32>
      tpu.vector_store %arg13[%c0_25, %c0_26, %c0_27], %39 {strides = array<i32>} : memref<1x8x32xf32, #tpu.memory_space<vmem>>, vector<1x8x32xf32>,
    } else {
    }
    return
  }
  func.func @transform_0(%arg0: i32, %arg1: i32, %arg2: i32) -> (i32, i32, i32) {
    %c0_i32 = arith.constant 0 : i32
    %c0_i32_0 = arith.constant 0 : i32
    return %arg0, %arg1, %c0_i32 : i32, i32, i32
  }
  func.func @transform_1(%arg0: i32, %arg1: i32, %arg2: i32) -> (i32, i32, i32) {
    %c0_i32 = arith.constant 0 : i32
    %c0_i32_0 = arith.constant 0 : i32
    return %arg0, %arg1, %c0_i32 : i32, i32, i32
  }
  func.func @transform_2(%arg0: i32, %arg1: i32, %arg2: i32) -> (i32, i32) {
    %c0_i32 = arith.constant 0 : i32
    %c0_i32_0 = arith.constant 0 : i32
    %c0_i32_1 = arith.constant 0 : i32
    return %c0_i32, %c0_i32_0 : i32, i32
  }
  func.func @transform_3(%arg0: i32, %arg1: i32, %arg2: i32) -> (i32, i32) {
    %c0_i32 = arith.constant 0 : i32
    %c0_i32_0 = arith.constant 0 : i32
    %c0_i32_1 = arith.constant 0 : i32
    return %c0_i32, %c0_i32_0 : i32, i32
  }
  func.func @transform_4(%arg0: i32, %arg1: i32, %arg2: i32) -> (i32, i32) {
    %c0_i32 = arith.constant 0 : i32
    %c0_i32_0 = arith.constant 0 : i32
    %c0_i32_1 = arith.constant 0 : i32
    return %c0_i32, %c0_i32_0 : i32, i32
  }
  func.func @transform_5(%arg0: i32, %arg1: i32, %arg2: i32) -> (i32, i32) {
    %c0_i32 = arith.constant 0 : i32
    %c0_i32_0 = arith.constant 0 : i32
    %c0_i32_1 = arith.constant 0 : i32
    return %c0_i32, %c0_i32_0 : i32, i32
  }
  func.func @transform_6(%arg0: i32, %arg1: i32, %arg2: i32) -> (i32, i32) {
    %c0_i32 = arith.constant 0 : i32
    %c0_i32_0 = arith.constant 0 : i32
    return %c0_i32, %arg2 : i32, i32
  }
  func.func @transform_7(%arg0: i32, %arg1: i32, %arg2: i32) -> (i32, i32) {
    %c0_i32 = arith.constant 0 : i32
    %c0_i32_0 = arith.constant 0 : i32
    return %c0_i32, %arg2 : i32, i32
  }
  func.func @transform_8(%arg0: i32, %arg1: i32, %arg2: i32) -> (i32, i32) {
    %c0_i32 = arith.constant 0 : i32
    %c0_i32_0 = arith.constant 0 : i32
    return %arg2, %c0_i32 : i32, i32
  }
  func.func @transform_9(%arg0: i32, %arg1: i32, %arg2: i32) -> (i32, i32) {
    %c0_i32 = arith.constant 0 : i32
    %c0_i32_0 = arith.constant 0 : i32
    %c0_i32_1 = arith.constant 0 : i32
    return %c0_i32, %c0_i32_0 : i32, i32
  }
  func.func @transform_10(%arg0: i32, %arg1: i32, %arg2: i32) -> (i32, i32, i32) {
    %c0_i32 = arith.constant 0 : i32
    %c0_i32_0 = arith.constant 0 : i32
    return %arg0, %arg1, %c0_i32 : i32, i32, i32
  }
}

module attributes {stable_mosaic.version = 11 : i64} {
  func.func @lnf_kernel(%arg0: i32, %arg1: i32, %arg2: memref<1x8x32xf32, #tpu.memory_space<vmem>>, %arg3: memref<1x32xf32, #tpu.memory_space<vmem>>, %arg4: memref<1x32xf32, #tpu.memory_space<vmem>>, %arg5: memref<1x8x32xbf16, #tpu.memory_space<vmem>>) attributes {dimension_semantics = [#tpu.dimension_semantics<parallel>, #tpu.dimension_semantics<parallel>], iteration_bounds = array<i64: 2, 1>, scalar_prefetch = 0 : i64, scratch_operands = 0 : i64, tpu.core_type = #tpu.core_type<tc>, window_params = [{transform_indices = @transform_0, window_bounds = array<i64: 1, 8, 32>}, {pipeline_mode = #tpu.pipeline_mode<synchronous>, transform_indices = @transform_1, window_bounds = array<i64: 1, 32>}, {pipeline_mode = #tpu.pipeline_mode<synchronous>, transform_indices = @transform_2, window_bounds = array<i64: 1, 32>}, {transform_indices = @transform_3, window_bounds = array<i64: 1, 8, 32>}]} {
    %c0 = arith.constant 0 : index
    %c0_0 = arith.constant 0 : index
    %c0_1 = arith.constant 0 : index
    %0 = vector.load %arg2[%c0, %c0_0, %c0_1] : memref<1x8x32xf32, #tpu.memory_space<vmem>>, vector<1x8x32xf32>
    %1 = vector.shape_cast %0 : vector<1x8x32xf32> to vector<8x32xf32>
    %c0_2 = arith.constant 0 : index
    %c0_3 = arith.constant 0 : index
    %2 = vector.load %arg3[%c0_2, %c0_3] : memref<1x32xf32, #tpu.memory_space<vmem>>, vector<1x32xf32>
    %c0_4 = arith.constant 0 : index
    %c0_5 = arith.constant 0 : index
    %3 = vector.load %arg4[%c0_4, %c0_5] : memref<1x32xf32, #tpu.memory_space<vmem>>, vector<1x32xf32>
    %cst = arith.constant dense<0.000000e+00> : vector<8xf32>
    %4 = vector.multi_reduction <add>, %1, %cst [1] : vector<8x32xf32> to vector<8xf32>
    %5 = vector.shape_cast %4 : vector<8xf32> to vector<8x1xf32>
    %cst_6 = arith.constant 3.200000e+01 : f32
    %6 = vector.broadcast %cst_6 : f32 to vector<8x1xf32>
    %7 = arith.divf %5, %6 : vector<8x1xf32>
    %8 = vector.broadcast %7 : vector<8x1xf32> to vector<8x32xf32>
    %9 = arith.subf %1, %8 : vector<8x32xf32>
    %10 = arith.mulf %9, %9 : vector<8x32xf32>
    %cst_7 = arith.constant dense<0.000000e+00> : vector<8xf32>
    %11 = vector.multi_reduction <add>, %10, %cst_7 [1] : vector<8x32xf32> to vector<8xf32>
    %12 = vector.shape_cast %11 : vector<8xf32> to vector<8x1xf32>
    %cst_8 = arith.constant 3.200000e+01 : f32
    %13 = vector.broadcast %cst_8 : f32 to vector<8x1xf32>
    %14 = arith.divf %12, %13 : vector<8x1xf32>
    %15 = vector.broadcast %7 : vector<8x1xf32> to vector<8x32xf32>
    %16 = arith.subf %1, %15 : vector<8x32xf32>
    %cst_9 = arith.constant 9.99999974E-6 : f32
    %17 = vector.broadcast %cst_9 : f32 to vector<8x1xf32>
    %18 = arith.addf %14, %17 : vector<8x1xf32>
    %19 = math.rsqrt %18 : vector<8x1xf32>
    %20 = vector.broadcast %19 : vector<8x1xf32> to vector<8x32xf32>
    %21 = arith.mulf %16, %20 : vector<8x32xf32>
    %22 = vector.broadcast %2 : vector<1x32xf32> to vector<8x32xf32>
    %23 = arith.mulf %21, %22 : vector<8x32xf32>
    %24 = vector.broadcast %3 : vector<1x32xf32> to vector<8x32xf32>
    %25 = arith.addf %23, %24 : vector<8x32xf32>
    %26 = arith.truncf %25 : vector<8x32xf32> to vector<8x32xbf16>
    %c0_10 = arith.constant 0 : index
    %c0_11 = arith.constant 0 : index
    %c0_12 = arith.constant 0 : index
    %27 = vector.load %arg5[%c0_10, %c0_11, %c0_12] : memref<1x8x32xbf16, #tpu.memory_space<vmem>>, vector<1x8x32xbf16>
    %28 = vector.shape_cast %27 : vector<1x8x32xbf16> to vector<8x32xbf16>
    %29 = vector.shape_cast %26 : vector<8x32xbf16> to vector<1x8x32xbf16>
    tpu.vector_store %arg5[%c0_10, %c0_11, %c0_12], %29 {strides = array<i32>} : memref<1x8x32xbf16, #tpu.memory_space<vmem>>, vector<1x8x32xbf16>,
    return
  }
  func.func @transform_0(%arg0: i32, %arg1: i32) -> (i32, i32, i32) {
    %c0_i32 = arith.constant 0 : i32
    %c0_i32_0 = arith.constant 0 : i32
    return %arg0, %arg1, %c0_i32 : i32, i32, i32
  }
  func.func @transform_1(%arg0: i32, %arg1: i32) -> (i32, i32) {
    %c0_i32 = arith.constant 0 : i32
    %c0_i32_0 = arith.constant 0 : i32
    %c0_i32_1 = arith.constant 0 : i32
    return %c0_i32, %c0_i32_0 : i32, i32
  }
  func.func @transform_2(%arg0: i32, %arg1: i32) -> (i32, i32) {
    %c0_i32 = arith.constant 0 : i32
    %c0_i32_0 = arith.constant 0 : i32
    %c0_i32_1 = arith.constant 0 : i32
    return %c0_i32, %c0_i32_0 : i32, i32
  }
  func.func @transform_3(%arg0: i32, %arg1: i32) -> (i32, i32, i32) {
    %c0_i32 = arith.constant 0 : i32
    %c0_i32_0 = arith.constant 0 : i32
    return %arg0, %arg1, %c0_i32 : i32, i32, i32
  }
}

module attributes {stable_mosaic.version = 11 : i64} {
  func.func @head_kernel(%arg0: i32, %arg1: i32, %arg2: i32, %arg3: memref<1x8x32xbf16, #tpu.memory_space<vmem>>, %arg4: memref<32x256xbf16, #tpu.memory_space<vmem>>, %arg5: memref<1x8x256xf32, #tpu.memory_space<vmem>>) attributes {dimension_semantics = [#tpu.dimension_semantics<parallel>, #tpu.dimension_semantics<parallel>, #tpu.dimension_semantics<parallel>], iteration_bounds = array<i64: 1, 2, 1>, scalar_prefetch = 0 : i64, scratch_operands = 0 : i64, tpu.core_type = #tpu.core_type<tc>, window_params = [{transform_indices = @transform_0, window_bounds = array<i64: 1, 8, 32>}, {transform_indices = @transform_1, window_bounds = array<i64: 32, 256>}, {transform_indices = @transform_2, window_bounds = array<i64: 1, 8, 256>}]} {
    %c0 = arith.constant 0 : index
    %c0_0 = arith.constant 0 : index
    %c0_1 = arith.constant 0 : index
    %0 = vector.load %arg3[%c0, %c0_0, %c0_1] : memref<1x8x32xbf16, #tpu.memory_space<vmem>>, vector<1x8x32xbf16>
    %1 = vector.shape_cast %0 : vector<1x8x32xbf16> to vector<8x32xbf16>
    %c0_2 = arith.constant 0 : index
    %c0_3 = arith.constant 0 : index
    %2 = vector.load %arg4[%c0_2, %c0_3] : memref<32x256xbf16, #tpu.memory_space<vmem>>, vector<32x256xbf16>
    %cst = arith.constant dense<0.000000e+00> : vector<8x256xf32>
    %3 = tpu.matmul %1, %2, %cst {dimension_numbers = #tpu.dot_dimension_numbers<[1], [0], [0], [1], [0, 0, 1, 1], [], []>} : vector<8x32xbf16>, vector<32x256xbf16>, vector<8x256xf32> -> vector<8x256xf32>
    %c0_4 = arith.constant 0 : index
    %c0_5 = arith.constant 0 : index
    %c0_6 = arith.constant 0 : index
    %4 = vector.load %arg5[%c0_4, %c0_5, %c0_6] : memref<1x8x256xf32, #tpu.memory_space<vmem>>, vector<1x8x256xf32>
    %5 = vector.shape_cast %4 : vector<1x8x256xf32> to vector<8x256xf32>
    %6 = vector.shape_cast %3 : vector<8x256xf32> to vector<1x8x256xf32>
    tpu.vector_store %arg5[%c0_4, %c0_5, %c0_6], %6 {strides = array<i32>} : memref<1x8x256xf32, #tpu.memory_space<vmem>>, vector<1x8x256xf32>,
    return
  }
  func.func @transform_0(%arg0: i32, %arg1: i32, %arg2: i32) -> (i32, i32, i32) {
    %c0_i32 = arith.constant 0 : i32
    %c0_i32_0 = arith.constant 0 : i32
    return %arg1, %arg2, %c0_i32 : i32, i32, i32
  }
  func.func @transform_1(%arg0: i32, %arg1: i32, %arg2: i32) -> (i32, i32) {
    %c0_i32 = arith.constant 0 : i32
    %c0_i32_0 = arith.constant 0 : i32
    return %c0_i32, %arg0 : i32, i32
  }
  func.func @transform_2(%arg0: i32, %arg1: i32, %arg2: i32) -> (i32, i32, i32) {
    %c0_i32 = arith.constant 0 : i32
    return %arg1, %arg2, %arg0 : i32, i32, i32
  }
}

</mosaic_0001>

<bundles_post_ra>
// kernel: gpt_forward.9
= control target key start
LH: loop header
LB: loop body
LE: loop exit
PB: predicated region body
PF: predicated region fallthrough
CT: control target
= control target key end

     0   :  { %s1719_s0 = inlined_call_operand.hbm [shape: bf16[2,2,8,16], index: 0, kind: input, shape index: {}]   ;;  %s1720_s1 = inlined_call_operand.hbm [shape: bf16[2,2,8,16], index: 1, kind: input, shape index: {}]   ;;  %s1721_s2 = inlined_call_operand.hbm [shape: bf16[2,2,8,16], index: 2, kind: input, shape index: {}]   ;;  %s1722_s3 = inlined_call_operand.hbm [shape: bf16[2,8,32], index: 3, kind: output, shape index: {}]  }
   0x1   :  { %1732 = sst [smem:[#allocation18_spill]] %s1720_s1 }
   0x2   :  { %8 = vsyncpa [#allocation6], 0 }
   0x3   :  { %10 = vsyncpa [#allocation6 + $0x1], 0 }
   0x4   :  { %11 = vsyncpa [#allocation9], 0 }
   0x5   :  { %13 = vsyncpa [#allocation9 + $0x1], 0 }
   0x6   :  { %14 = vsyncpa [#allocation7], 0 }
   0x7   :  { %16 = vsyncpa [#allocation7 + $0x1], 0  ;;  %s1411_s12 = smov 0   ;;  %s1413_s13 = smov 0  }
   0x8   :  { %s1415_s14 = smov 0   ;;  %s1417_s15 = smov 0  }
   0x9   :  { %s1419_s16 = smov 0   ;;  %s1421_s17 = smov 0  }
   0xa LB: > { %1733 = sst [smem:[#allocation15_spill]] %s1374_s16  ;;  %s1442_s18 = sadd.s32 4294967295, %s1378_s17   ;;  %s1378_s17 = sphi %s1421_s17, %s22_s17   ;;  %s1374_s16 = sphi %s1419_s16, %s1756_s16   ;;  %s1370_s15 = sphi %s1417_s15, %s1755_s15   ;;  %s1366_s14 = sphi %s1415_s14, %s1759_s14   ;;  %s1362_s13 = sphi %s1413_s13, %s1758_s13   ;;  %s1358_s12 = sphi %s1411_s12, %s1757_s12  }
   0xb   : > { %s1043_s19 = sadd.s32 4294967294, %s1378_s17   ;;  %s41_s20 = sadd.s32 1, %s1374_s16 }
   0xc   : > { %s50_s21 = sadd.s32 1, %s1366_s14  ;;  %p43_p0 = scmp.ge.s32.totalorder %s41_s20, 2 }
   0xd   : > { %p57_p1 = scmp.ne.s32.totalorder %s1366_s14, %s1362_s13  ;;  %p58_p2 = scmp.eq.s32.totalorder %s1378_s17, 0 }
   0xe   : > { %p63_p3 = scmp.ne.s32.totalorder %s1362_s13, %s1358_s12  ;;  %s1761_s20 = smov (%p43_p0, %s41_s20), 0 }
   0xf   : > { %1734 = sst [smem:[#allocation16_spill]] %s1761_s20  ;;  %p1454_p4 = por %p58_p2, %p57_p1 }
  0x10   : > { %p64_p5 = scmp.eq.s32.totalorder %s1442_s18, 0  ;;  %s45_s23 = ssub.s32 %s1374_s16, %s1761_s20 }
  0x11   : > { %p153_p6 = scmp.eq.s32.totalorder %s1442_s18, 1  ;;  %p48_p7 = scmp.eq.s32.totalorder %s45_s23, 0 }
  0x12   : > { %p1462_p8 = por %p64_p5, %p63_p3  ;;  %p159_p10 = scmp.eq.s32.totalorder %s1043_s19, 1 }
  0x13   : > { %p1466_p9 = por %p153_p6, %p57_p1  ;;  %p1131_p13 = scmp.lt.s32.totalorder %s1378_s17, 2 }
  0x14   : > { %s1736_s24 = scalar_select %p1462_p8, 1, 0 }
  0x15   : > { %s1737_s25 = scalar_select %p1466_p9, 1, 0 }
  0x16   : > { %s1471_s26 = scalar_select %p48_p7, %s1366_s14, %s50_s21  }
  0x17   : > { %p1473_p11 = por %p159_p10, %p63_p3  ;;  %s1725_s28 = sand.u32 1, %s1366_s14  }
  0x18   : > { %1738 = sst [smem:[#allocation17_spill]] %s1471_s26  ;;  %s1482_s29 = sshll.u32 %s1725_s28, 3 }
  0x19   : > { %s1739_s27 = scalar_select %p1473_p11, 1, 0 }
  0x1a   : > { %s1485_s30 = sshll.u32 %s1374_s16, 7  ;;  %p1489_p0 = pnand %p1131_p13, %p1454_p4 }
  0x1b   : > { %s201_s5 = sand.u32 1, %s1378_s17   ;;  %s1741_s1 = sld [smem:[#allocation18_spill]] }
  0x1c   : > { %s205_s9 = scalar_lea.vmem [#allocation8], %s1482_s29  ;;  %s1505_s11 = scalar_lea.sflag [#allocation9], %s201_s5 }
  0x1d   : > { %s215_s10 = sshll.u32 %s205_s9, 4  ;;  %p1511_p4 = pneg %p1489_p0  ;;  %s1502_s10 = int_to_ptr.vmem [resolvable:$true] %s215_s10 }
  0x21   : > { %s1498_s8 = scalar_lea.hbm %s1741_s1, %s1485_s30  ;;  %s1207_s6 = scalar_lea.hbm %s1741_s1, 256 }
  0x22   : > { %s1202_s19 = scalar_lea.hbm %s1498_s8, 128  ;;  %p1208_p7 = scmp.lt.u32.totalorder %s1498_s8, %s1741_s1 }
  0x23   : > { %p1203_p3 = scmp.ne.s32.totalorder %s1498_s8, %s1202_s19  ;;  %p1209_p10 = scmp.lt.u32.totalorder %s1207_s6, %s1202_s19 }
  0x24   : > { %p1211_p12 = scmp.lt.u32.totalorder %s1202_s19, %s1498_s8 }
  0x25   : > { %p1205_p5 = pnand %p1511_p4, %p1203_p3  ;;  %p1210_p13 = por %p1209_p10, %p1208_p7 }
  0x27   : > { %p1206_p6 = pneg %p1205_p5  ;;  %p1212_p1 = por %p1211_p12, %p1210_p13 }
  0x29   : > { %p1213_p2 = pnand %p1212_p1, %p1206_p6 }
  0x2b   : > { %1216 = shalt.err (!%p1213_p2)
}
  0x2c   : > { %s1217_s5 = scalar_lea.vmem %s1502_s10, 128  ;;  %s1380_s22 = smov [#allocation8]  }
  0x2d   : > { %p1218_p3 = scmp.ne.s32.totalorder %s1502_s10, %s1217_s5  ;;  %s1222_s23 = sshll.u32 %s1380_s22, 4  ;;  %s1223_s23 = int_to_ptr.vmem [resolvable:$false] %s1222_s23 }
  0x2e   : > { %s1224_s7 = scalar_lea.vmem %s1223_s23, 256  ;;  %p1225_p9 = scmp.lt.s32.totalorder %s1502_s10, %s1223_s23 }
  0x2f   : > { %p1220_p5 = pnand %p1218_p3, %p1511_p4  ;;  %p1226_p8 = scmp.lt.s32.totalorder %s1224_s7, %s1217_s5 }
  0x31   : > { %p1221_p11 = pneg %p1220_p5  ;;  %p1227_p7 = por %p1226_p8, %p1225_p9 }
  0x33   : > { %p1228_p10 = pnand %p1227_p7, %p1221_p11 }
  0x35   : > { %1231 = shalt.err (!%p1228_p10)
}
  0x36   : > { %s1726_s19 = smov 64   ;;  %s1728_s6 = smov 4  }
  0x37   : > { %1123 = dma.hbm_to_vmem [thread:$0]  (!%p1489_p0), %s1498_s8, 128, %s1502_s10, %s1505_s11, %s1726_s19, %s1726_s19, %s1728_s6  }
  0x38   : > { %p1743_p8 = scmp.lt.s32.totalorder %s1378_s17, 3  ;;  %p1744_p9 = scmp.ge.s32.totalorder %s1378_s17, 1 }
  0x39   : > { %s1550_s23 = scalar_lea.hbm %s1719_s0, %s1485_s30  ;;  %s183_s7 = scalar_lea.vmem [#allocation5], %s1482_s29 }
  0x3a   : > { %p1542_p11 = pnand %p1744_p9, %p1743_p8  ;;  %s191_s28 = sshll.u32 %s183_s7, 4  ;;  %s1553_s28 = int_to_ptr.vmem [resolvable:$true] %s191_s28 }
  0x3b   : > { %s1559_s19 = scalar_lea.hbm %s1721_s2, %s1485_s30  ;;  %s1746_s6 = sand.u32 1, %s1366_s14  }
  0x3c   : > { %s1745_s9 = scalar_select %p1542_p11, 1, 0 }
  0x3d   : > { %s1563_s1 = scalar_lea.sflag [#allocation6], %s1746_s6  ;;  %s1232_s20 = scalar_lea.hbm %s1550_s23, 128 }
  0x3e   : > { %p1233_p12 = scmp.ne.s32.totalorder %s1550_s23, %s1232_s20  ;;  %s1237_s16 = scalar_lea.hbm %s1719_s0, 256 }
  0x3f   : > { %p1238_p6 = scmp.lt.u32.totalorder %s1550_s23, %s1719_s0  ;;  %p1239_p13 = scmp.lt.u32.totalorder %s1237_s16, %s1232_s20 }
  0x40   : > { %p1235_p1 = pnand %p1233_p12, %p1511_p4  ;;  %p1241_p5 = scmp.lt.u32.totalorder %s1232_s20, %s1550_s23 }
  0x41   : > { %p1240_p3 = por %p1239_p13, %p1238_p6 }
  0x42   : > { %p1236_p2 = pneg %p1235_p1 }
  0x43   : > { %p1242_p7 = por %p1241_p5, %p1240_p3 }
  0x45   : > { %p1243_p10 = pnand %p1242_p7, %p1236_p2 }
  0x47   : > { %1246 = shalt.err (!%p1243_p10)
}
  0x48   : > { %s1247_s30 = scalar_lea.vmem %s1553_s28, 128  ;;  %s1383_s6 = smov [#allocation5]  }
  0x49   : > { %p1248_p8 = scmp.ne.s32.totalorder %s1553_s28, %s1247_s30  ;;  %s1252_s8 = sshll.u32 %s1383_s6, 4  ;;  %s1253_s8 = int_to_ptr.vmem [resolvable:$false] %s1252_s8 }
  0x4a   : > { %s1254_s26 = scalar_lea.vmem %s1253_s8, 256  ;;  %p1255_p1 = scmp.lt.s32.totalorder %s1553_s28, %s1253_s8 }
  0x4b   : > { %p1250_p9 = pnand %p1248_p8, %p1511_p4  ;;  %p1256_p11 = scmp.lt.s32.totalorder %s1254_s26, %s1247_s30 }
  0x4d   : > { %p1251_p12 = pneg %p1250_p9  ;;  %p1257_p6 = por %p1256_p11, %p1255_p1 }
  0x4f   : > { %p1258_p13 = pnand %p1257_p6, %p1251_p12 }
  0x51   : > { %1261 = shalt.err (!%p1258_p13)
}
  0x52   : > { %s1747_s16 = smov 4   ;;  %s1748_s20 = smov 64  }
  0x53   : > { %1120 = dma.hbm_to_vmem [thread:$0]  (!%p1489_p0), %s1550_s23, 128, %s1553_s28, %s1563_s1, %s1748_s20, %s1748_s20, %s1747_s16  }
  0x54   : > { %s229_s10 = scalar_lea.vmem [#allocation10], %s1482_s29  ;;  %s1262_s22 = scalar_lea.hbm %s1559_s19, 128 }
  0x55   : > { %s239_s5 = sshll.u32 %s229_s10, 4  ;;  %p1263_p11 = scmp.ne.s32.totalorder %s1559_s19, %s1262_s22  ;;  %s1591_s5 = int_to_ptr.vmem [resolvable:$true] %s239_s5 }
  0x56   : > { %s1267_s6 = scalar_lea.hbm %s1721_s2, 256  ;;  %p1268_p5 = scmp.lt.u32.totalorder %s1559_s19, %s1721_s2 }
  0x57   : > { %p1265_p2 = pnand %p1263_p11, %p1511_p4  ;;  %p1269_p7 = scmp.lt.u32.totalorder %s1267_s6, %s1262_s22 }
  0x58   : > { %p1271_p8 = scmp.lt.u32.totalorder %s1262_s22, %s1559_s19 }
  0x59   : > { %p1266_p3 = pneg %p1265_p2  ;;  %p1270_p10 = por %p1269_p7, %p1268_p5 }
  0x5b   : > { %p1272_p9 = por %p1271_p8, %p1270_p10 }
  0x5d   : > { %p1273_p12 = pnand %p1272_p9, %p1266_p3 }
  0x5f   : > { %1276 = shalt.err (!%p1273_p12)
}
  0x60   : > { %s1277_s1 = scalar_lea.vmem %s1591_s5, 128  ;;  %s1384_s28 = smov [#allocation10]  }
  0x61   : > { %p1278_p1 = scmp.ne.s32.totalorder %s1591_s5, %s1277_s1  ;;  %s1282_s29 = sshll.u32 %s1384_s28, 4  ;;  %s1283_s29 = int_to_ptr.vmem [resolvable:$false] %s1282_s29 }
  0x62   : > { %s1284_s23 = scalar_lea.vmem %s1283_s29, 256  ;;  %p1285_p11 = scmp.lt.s32.totalorder %s1591_s5, %s1283_s29 }
  0x63   : > { %p1280_p6 = pnand %p1278_p1, %p1511_p4  ;;  %p1286_p2 = scmp.lt.s32.totalorder %s1284_s23, %s1277_s1 }
  0x65   : > { %p1281_p13 = pneg %p1280_p6  ;;  %p1287_p5 = por %p1286_p2, %p1285_p11 }
  0x67   : > { %p1288_p7 = pnand %p1287_p5, %p1281_p13 }
  0x69   : > { %1291 = shalt.err (!%p1288_p7)
}
  0x6a   : > { %1126 = dma.hbm_to_vmem [thread:$0]  (!%p1489_p0), %s1559_s19, 128, %s1591_s5, %s1505_s11, %s1748_s20, %s1748_s20, %s1747_s16  }
  0x6b   : > { %p1749_p4 = scmp.ne.s32.totalorder %s1745_s9, 0 }
  0x6c   : > { %s1621_s21 = sand.u32 (!%p1749_p4), 1, %s1362_s13   ;;  %p1750_p3 = scmp.ne.s32.totalorder (!%p1749_p4), %s1736_s24, 0 }
  0x6d   : > { %251 = sbr.rel (%p1749_p4) target bundleno = 1056 (0x420), region = 32  ;;  %s1624_s10 = sshll.u32 (!%p1749_p4), %s1621_s21, 3 }
  0x6e   : > { %s254_s4 = scalar_lea.sflag (!%p1749_p4), [#allocation6], %s1621_s21  ;;  %s257_s22 = scalar_lea.vmem (!%p1749_p4), [#allocation5], %s1624_s10 }
  0x74   : > { %1345 = dma.done.wait (%p1750_p3), %s254_s4, 128  }
  0x75   : > { %1347 = vsyncadd (%p1750_p3), %s254_s4, 4294967168  ;;  %s262_s11 = sand.u32 1, %s1442_s18   ;;  %s266_s9 = scalar_lea.vmem [#allocation8], %s1624_s10 }
  0x76   : > { %s263_s19 = scalar_lea.sflag [#allocation9], %s262_s11 }
  0x77   : > { %1349 = dma.done.wait (%p1750_p3), %s263_s19, 256  }
  0x78   : > { %1351 = vsyncadd (%p1750_p3), %s263_s19, 4294967040  ;;  %vm322_vm0 = vcmask 130048   ;;  %v1385_v0 = vmov 0.0   ;;  %vm1386_vm1 = vmmov 0   ;;  %v598_v1 = vld [vmem:[%s266_s9 + $0x4] sm:$0xf]  ;;  %v694_v8 = vlaneseq }
  0x79   : > { %1091 = vmatprep.subr.bf16.mxu1 %v1385_v0  ;;  %323 = vst.msk [vmem:[#allocation4] sm:$0xff] %vm322_vm0, %v1385_v0  ;;  %324 = vst.msk [vmem:[#allocation4 + $0x8] sm:$0xff] %vm322_vm0, %v1385_v0  ;;  %1085 = vmatprep.subr.bf16.mxu0 %v1385_v0  ;;  %v597_v2 = vld [vmem:[%s266_s9] sm:$0xf]  ;;  %v652_v3 = vsel %vm322_vm0, %v598_v1, 0  ;;  %vm317_vm2 = vcmask 7168  }
  0x7a   : > { %1093 = vmatprep.mubr.msk.bf16.mxu1 %vm1386_vm1, %v1385_v0  ;;  %1087 = vmatprep.mubr.msk.bf16.mxu0 %vm1386_vm1, %v1385_v0  ;;  %v606_v4 = vsel %vm322_vm0, %v597_v2, 0  ;;  %v596_v5 = vld [vmem:[%s257_s22 + $0x4] sm:$0xf]  ;;  %v595_v6 = vld [vmem:[%s257_s22] sm:$0xf]  ;;  %320 = vst.msk [vmem:[#allocation3] sm:$0xff] %vm317_vm2, %v1385_v0 }
  0x7b   : > { %1092 = vmatpush3.bf16.xpose.msra.mxu1 %v652_v3  ;;  %1086 = vmatpush3.bf16.xpose.msra.mxu0 %v606_v4  ;;  %v1387_v7 = vmov -1e+30   ;;  %321 = vst.msk [vmem:[#allocation3 + $0x8] sm:$0xff] %vm317_vm2, %v1385_v0  ;;  %v695_v9 = vshrl.u32 %v694_v8, 7  ;;  %v697_v10 = vand.u32 127, %v694_v8  ;;  %vm705_vm4 = vcmask 64512  }
  0x7c   : > { %1103 = vmatprep.subr.bf16.mxu1 %v1385_v0  ;;  %1097 = vmatprep.subr.bf16.mxu0 %v1385_v0  ;;  %319 = vst.msk [vmem:[#allocation2 + $0x8] sm:$0xff] %vm317_vm2, %v1387_v7  ;;  %318 = vst.msk [vmem:[#allocation2] sm:$0xff] %vm317_vm2, %v1387_v7  ;;  %v1388_v23 = vmov 0   ;;  %vm770_vm5 = vcmask 1043456   ;;  %s275_s18 = scalar_lea.vmem [#allocation10], %s1624_s10  ;;  %s1059_s24 = sshll.u32 %s1621_s21, 2 }
  0x7d   : > { %vm698_vm3 = vcmp.le.s32.totalorder %v697_v10, %v695_v9  ;;  %1188 = vset.pattern.permute.xlu1 %v1388_v23  ;;  %1189 = vset.pattern.permute.xlu0 %v1388_v23  ;;  %v600_v32 = vld [vmem:[%s275_s18 + $0x4] sm:$0xf]  ;;  %v599_v34 = vld [vmem:[%s275_s18] sm:$0xf]  ;;  %s1389_s16 = smov 16   ;;  %vm885_vm6 = vcmask 125952  }
  0x7e   : > { %v818_v33 = vsel %vm770_vm5, %v600_v32, 0  ;;  %v772_v35 = vsel %vm770_vm5, %v599_v34, 0  ;;  %s307_s20 = scalar_lea.vmem [#allocation11], %s1059_s24  ;;  %s1070_s5 = sshll.u32 %s1370_s15, 6  ;;  %vm894_vm7 = vcmask 257152  }
  0x7f   : > { %s911_s7 = sshll.u32 %s307_s20, 4  ;;  %s1670_s8 = scalar_lea.hbm %s1722_s3, %s1070_s5  ;;  %s1672_s7 = int_to_ptr.vmem [resolvable:$true] %s911_s7 }
  0x80   : > { %v752_v1 = vld [vmem:[#allocation4 + $0x8] sm:$0xff]  ;;  %v751_v3 = vld [vmem:[#allocation4] sm:$0xff]  ;;  %s897_s26 = scalar_lea.sflag [#allocation7], %s1621_s21  ;;  %s1292_s1 = scalar_lea.vmem %s1672_s7, 64 }
  0x81   : > { %v736_v55 = vld [vmem:[#allocation3] sm:$0xff]  ;;  %p1293_p0 = scmp.ne.s32.totalorder %s1672_s7, %s1292_s1  ;;  %p1751_p10 = scmp.ne.s32.totalorder %s1737_s25, 0 }
  0x82   : > { %1094 = vmatmul.mubr.msk.bf16.vlgmr.msra.gmra.mrb[0].mxu1 %vm322_vm0, %v596_v5  ;;  %1088 = vmatmul.mubr.msk.bf16.vlgmr.msra.gmra.mrb[0].mxu0 %vm322_vm0, %v595_v6  ;;  %v737_v52 = vld [vmem:[#allocation3 + $0x8] sm:$0xff]  ;;  %s1390_s15 = smov [#allocation11]  }
  0x83   : > { %1105 = vmatprep.mubr.msk.bf16.mxu1 %vm1386_vm1, %v1385_v0  ;;  %1099 = vmatprep.mubr.msk.bf16.mxu0 %vm1386_vm1, %v1385_v0  ;;  %v704_v24 = vld [vmem:[#allocation2 + $0x8] sm:$0xff]  ;;  %v703_v27 = vld [vmem:[#allocation2] sm:$0xff]  ;;  %p1294_p8 = pnand %p1293_p0, %p1751_p10  ;;  %s1296_s28 = sshll.u32 %s1390_s15, 4  ;;  %s1297_s28 = int_to_ptr.vmem [resolvable:$false] %s1296_s28 }
  0x84   : > { %1104 = vmatpush3.bf16.msra.mxu1 %v818_v33  ;;  %1098 = vmatpush3.bf16.msra.mxu0 %v772_v35  ;;  %s1298_s29 = scalar_lea.vmem %s1297_s28, 128  ;;  %p1299_p12 = scmp.lt.s32.totalorder %s1672_s7, %s1297_s28 }
  0x85   : > { %p1295_p9 = pneg %p1294_p8  ;;  %p1300_p1 = scmp.lt.s32.totalorder %s1298_s29, %s1292_s1 }
  0x87   : > { %p1301_p6 = por %p1300_p1, %p1299_p12 }
  0x89   : > { %p1302_p13 = pnand %p1301_p6, %p1295_p9 }
 0x155   : > { %v688_v11 = vpop.f32.mrb[0].mxu1  ;;  %v642_v12 = vpop.f32.mrb[0].mxu0 }
 0x156   : > { %v702_v13 = vsel %vm698_vm3, %v688_v11, -1e+30  ;;  %v1095_v14 = vpop.f32.mrb[1].mxu1  ;;  %v701_v15 = vsel %vm698_vm3, %v642_v12, -1e+30  ;;  %v1089_v16 = vpop.f32.mrb[1].mxu0 }
 0x157   : > { %v691_v17 = vpop.f32.mrb[2].mxu1  ;;  %v709_v18 = vsel %vm705_vm4, %v702_v13, -inf  ;;  %v645_v19 = vpop.f32.mrb[2].mxu0  ;;  %v706_v22 = vsel %vm705_vm4, %v701_v15, -inf }
 0x158   : > { %710 = vmax.xlane.f32.xlu0 %v709_v18  ;;  %v1096_v20 = vpop.f32.mrb[3].mxu1  ;;  %v1090_v21 = vpop.f32.mrb[3].mxu0 }
 0x15c   : > { %707 = vmax.xlane.f32.xlu0 %v706_v22 }
 0x1e5   : > { %v711_v25 = vpop.xlane.xlu0 %710 }
 0x1e6   : > { %v713_v26 = vmax.f32 %v704_v24, %v711_v25 }
 0x1e8   : > { %v715_v28 = vsub.f32 %v704_v24, %v713_v26  ;;  %865 = vst.msk [vmem:[#allocation2 + $0x8] sm:$0xff] %vm317_vm2, %v713_v26  ;;  %727 = vperm.xlu1 %1188, %v713_v26  }
 0x1e9   : > { %v708_v29 = vpop.xlane.xlu0 %707 }
 0x1ea   : > { %v712_v30 = vmax.f32 %v703_v27, %v708_v29  ;;  %v718_v48 = vmul.f32 1.442695, %v715_v28 }
 0x1ec   : > { %v714_v31 = vsub.f32 %v703_v27, %v712_v30  ;;  %864 = vst.msk [vmem:[#allocation2] sm:$0xff] %vm317_vm2, %v712_v30  ;;  %722 = vperm.xlu1 %1188, %v712_v30  }
 0x1ee   : > { %v716_v49 = vmul.f32 1.442695, %v714_v31 }
 0x267   : > { %v728_v36 = vpop.permute.xlu1 %727 }
 0x268   : > { %v731_v37 = vsub.f32 %v702_v13, %v728_v36 }
 0x26a   : > { %v734_v38 = vmul.f32 1.442695, %v731_v37 }
 0x26b   : > { %v723_v39 = vpop.permute.xlu1 %722 }
 0x26c   : > { %1190 = vpow2.f32 %v734_v38  ;;  %v730_v40 = vsub.f32 %v701_v15, %v723_v39 }
 0x26e   : > { %v732_v41 = vmul.f32 1.442695, %v730_v40 }
 0x270   : > { %1192 = vpow2.f32 %v732_v41 }
 0x271   : > { %1194 = vpow2.f32 %v718_v48 }
 0x272   : > { %1196 = vpow2.f32 %v716_v49 }
 0x276   : > { %v1191_v42 = vpop.eup %1190 }
 0x277   : > { %v743_v43 = vsel %vm705_vm4, %v1191_v42, 0.0  ;;  %v766_v44 = vpack.c.bf16 %v1191_v42, %v1191_v42 }
 0x278   : > { %744 = vadd.xlane.f32.xlu0 %v743_v43 }
 0x279   : > { %1106 = vmatmul.mubr.msk.bf16.vlgmr.msra.gmra.mrb[4].mxu1 %vm705_vm4, %v766_v44 }
 0x27a   : > { %v1193_v45 = vpop.eup %1192 }
 0x27b   : > { %v740_v46 = vsel %vm705_vm4, %v1193_v45, 0.0  ;;  %v765_v47 = vpack.c.bf16 %v1193_v45, %v1193_v45  ;;  %v1195_v50 = vpop.eup %1194 }
 0x27c   : > { %741 = vadd.xlane.f32.xlu1 %v740_v46  ;;  %v1197_v51 = vpop.eup %1196  ;;  %v739_v53 = vmul.f32 %v1195_v50, %v737_v52 }
 0x27d   : > { %1100 = vmatmul.mubr.msk.bf16.vlgmr.msra.gmra.mrb[4].mxu0 %vm705_vm4, %v765_v47  ;;  %v738_v57 = vmul.f32 %v1197_v51, %v736_v55 }
 0x28e   : > { %760 = vperm.xlu0 %1189, %v1195_v50  }
 0x292   : > { %755 = vperm.xlu0 %1189, %v1197_v51  }
 0x305   : > { %v745_v54 = vpop.xlane.xlu0 %744 }
 0x306   : > { %v747_v56 = vadd.f32 %v745_v54, %v739_v53 }
 0x308   : > { %750 = vst.msk [vmem:[#allocation3 + $0x8] sm:$0xff] %vm317_vm2, %v747_v56 }
 0x309   : > { %v742_v58 = vpop.xlane.xlu1 %741 }
 0x30a   : > { %v746_v59 = vadd.f32 %v742_v58, %v738_v57 }
 0x30c   : > { %749 = vst.msk [vmem:[#allocation3] sm:$0xff] %vm317_vm2, %v746_v59 }
 0x30d   : > { %v761_v0 = vpop.permute.xlu0 %760 }
 0x30e   : > { %v764_v2 = vmul.f32 %v761_v0, %v752_v1 }
 0x30f   : > { %v867_v60 = vld [vmem:[#allocation3 + $0x8] sm:$0xff] }
 0x310   : > { %1198 = vrcp.f32 %v867_v60 }
 0x311   : > { %v756_v4 = vpop.permute.xlu0 %755 }
 0x312   : > { %v763_v9 = vmul.f32 %v756_v4, %v751_v3 }
 0x313   : > { %v866_v61 = vld [vmem:[#allocation3] sm:$0xff] }
 0x314   : > { %1200 = vrcp.f32 %v866_v61 }
 0x31a   : > { %v1199_v62 = vpop.eup %1198 }
 0x31b   : > { %879 = vperm.xlu1 %1188, %v1199_v62  }
 0x31e   : > { %v1201_v63 = vpop.eup %1200 }
 0x31f   : > { %874 = vperm.xlu0 %1189, %v1201_v63  }
 0x34c   : > { %v854_v5 = vpop.f32.mrb[4].mxu1 }
 0x34d   : > { %v861_v6 = vadd.f32 %v854_v5, %v764_v2  ;;  %v1107_v7 = vpop.f32.mrb[5].mxu1 }
 0x34e   : > { %v857_v8 = vpop.f32.mrb[6].mxu1 }
 0x34f   : > { %863 = vst.msk [vmem:[#allocation4 + $0x8] sm:$0xff] %vm322_vm0, %v861_v6  ;;  %v1108_v10 = vpop.f32.mrb[7].mxu1 }
 0x350   : > { %v808_v11 = vpop.f32.mrb[4].mxu0 }
 0x351   : > { %v860_v12 = vadd.f32 %v808_v11, %v763_v9  ;;  %v1101_v13 = vpop.f32.mrb[5].mxu0 }
 0x352   : > { %v811_v14 = vpop.f32.mrb[6].mxu0 }
 0x353   : > { %862 = vst.msk [vmem:[#allocation4] sm:$0xff] %vm322_vm0, %v860_v12  ;;  %v1102_v15 = vpop.f32.mrb[7].mxu0 }
 0x356   : > { %v871_v16 = vld [vmem:[#allocation4 + $0x8] sm:$0xff] }
 0x35a   : > { %v870_v20 = vld [vmem:[#allocation4] sm:$0xff] }
 0x39a   : > { %v880_v17 = vpop.permute.xlu1 %879 }
 0x39b   : > { %v883_v18 = vmul.f32 %v880_v17, %v871_v16 }
 0x39d   : > { %v1076_v19 = vpack.c.bf16 %v883_v18, %v883_v18 }
 0x39e   : > { %v875_v21 = vpop.permute.xlu0 %874 }
 0x39f   : > { %v882_v22 = vmul.f32 %v875_v21, %v870_v20  ;;  %891 = vrot.lane.b32.xlu1 %v1076_v19, %s1389_s16 }
 0x3a1   : > { %v884_v23 = vpack.c.bf16 %v882_v22, %v882_v22 }
 0x3a3   : > { %886 = vst.msk [vmem:[%s307_s20] sm:$0xf] %vm885_vm6, %v884_v23 }
 0x411   : > { %v892_v24 = vpop.permute.xlu1 %891 }
 0x412   : > { %895 = vst.msk [vmem:[%s307_s20] sm:$0xf] %vm894_vm7, %v892_v24 }
 0x413   : > { %1305 = shalt.err (!%p1302_p13)
}
 0x414   : > { %s1306_s23 = scalar_lea.hbm %s1670_s8, 64  ;;  %s1310_s4 = scalar_lea.hbm %s1722_s3, 128 }
 0x415   : > { %p1307_p11 = scmp.ne.s32.totalorder %s1670_s8, %s1306_s23  ;;  %p1311_p7 = scmp.lt.u32.totalorder %s1670_s8, %s1722_s3 }
 0x416   : > { %p1312_p4 = scmp.lt.u32.totalorder %s1310_s4, %s1306_s23  ;;  %p1314_p0 = scmp.lt.u32.totalorder %s1306_s23, %s1670_s8 }
 0x417   : > { %p1308_p2 = pnand %p1307_p11, %p1751_p10 }
 0x418   : > { %p1313_p3 = por %p1312_p4, %p1311_p7 }
 0x419   : > { %p1309_p5 = pneg %p1308_p2 }
 0x41a   : > { %p1315_p8 = por %p1314_p0, %p1313_p3 }
 0x41c   : > { %p1316_p9 = pnand %p1315_p8, %p1309_p5 }
 0x41e   : > { %1319 = shalt.err (!%p1316_p9)
}
 0x41f   : > { %1115 = dma.vmem_to_hbm [thread:$0]  (%p1751_p10), %s1672_s7, 64, %s1670_s8, %s897_s26  }
 0x420 PF: > { %s923_s19 = sand.u32 1, %s1358_s12   ;;  %p1752_p12 = scmp.ne.s32.totalorder %s1739_s27, 0 }
 0x421   : > { %p1753_p1 = scmp.ge.s32.totalorder %s1378_s17, 2  ;;  %s924_s9 = scalar_lea.sflag [#allocation7], %s923_s19 }
 0x423   : > { %p1128_p6 = pnand %p1753_p1, %p1752_p12 }
 0x425   : > { %1353 = dma.done.wait (!%p1128_p6), %s924_s9, 64  }
 0x426   : > { %1355 = vsyncadd (!%p1128_p6), %s924_s9, 4294967232  ;;  %s22_s17 = sadd.s32 1, %s1378_s17   ;;  %s1754_s25 = sld [smem:[#allocation17_spill]] }
 0x427   : > { %p19_p13 = scmp.ge.s32.totalorder %s22_s17, 4   ;;  %s1755_s15 = sld [smem:[#allocation15_spill]] }
 0x428   : > { %s1756_s16 = sld [smem:[#allocation16_spill]]  ;;  %s1757_s12 = smov %s1362_s13 }
 0x429   : > { %s1758_s13 = smov %s1366_s14  ;;  %21 = sbr.rel (!%p19_p13) target bundleno = 10 (0xa), region = 113 }
 0x42c   : > { %s1759_s14 = smov %s1754_s25 }
 0x430   :  { %929 = vsyncpa [#allocation6], 1 }
 0x431   :  { %931 = vsyncpa [#allocation6 + $0x1], 1 }
 0x432   :  { %932 = vsyncpa [#allocation9], 1 }
 0x433   :  { %934 = vsyncpa [#allocation9 + $0x1], 1 }
 0x434   :  { %935 = vsyncpa [#allocation7], 1 }
 0x435   :  { %937 = vsyncpa [#allocation7 + $0x1], 1 }

// kernel: gpt_forward.14
= control target key start
LH: loop header
LB: loop body
LE: loop exit
PB: predicated region body
PF: predicated region fallthrough
CT: control target
= control target key end

     0   :  { %8 = vsyncpa [#allocation3], 0  ;;  %s924_s0 = inlined_call_operand.hbm [shape: f32[2,8,32], index: 0, kind: input, shape index: {}]   ;;  %s925_s1 = inlined_call_operand.hbm [shape: f32[1,32], index: 1, kind: input, shape index: {}]   ;;  %s926_s2 = inlined_call_operand.hbm [shape: f32[1,32], index: 2, kind: input, shape index: {}]   ;;  %s927_s3 = inlined_call_operand.hbm [shape: bf16[2,8,32], index: 3, kind: output, shape index: {}]  }
   0x1   :  { %10 = vsyncpa [#allocation3 + $0x1], 0 }
   0x2   :  { %11 = vsyncpa [#allocation6], 0 }
   0x3   :  { %12 = vsyncpa [#allocation4], 0 }
   0x4   :  { %14 = vsyncpa [#allocation4 + $0x1], 0  ;;  %s679_s12 = smov 0   ;;  %s681_s13 = smov 0  }
   0x5   :  { %s683_s14 = smov 0   ;;  %s685_s15 = smov 0  }
   0x6   :  { %s687_s16 = smov 0   ;;  %s689_s17 = smov 0  }
   0x7 LB: > { %s377_s18 = sadd.s32 4294967295, %s653_s17   ;;  %s378_s19 = sadd.s32 4294967294, %s653_s17   ;;  %s653_s17 = sphi %s689_s17, %s20_s17   ;;  %s649_s16 = sphi %s687_s16, %s950_s16   ;;  %s645_s15 = sphi %s685_s15, %s949_s15   ;;  %s641_s14 = sphi %s683_s14, %s948_s14   ;;  %s637_s13 = sphi %s681_s13, %s947_s13   ;;  %s633_s12 = sphi %s679_s12, %s946_s12  }
   0x8   : > { %p54_p0 = scmp.ne.s32.totalorder %s637_s13, %s633_s12  ;;  %p713_p1 = scmp.eq.s32.totalorder %s377_s18, 0 }
   0x9   : > { %p717_p2 = scmp.eq.s32.totalorder %s377_s18, 1  ;;  %p128_p3 = scmp.eq.s32.totalorder %s378_s19, 1 }
   0xa   : > { %s932_s20 = scalar_select %p713_p1, 1, 0 }
   0xb   : > { %s933_s21 = scalar_select %p717_p2, 1, 0 }
   0xc   : > { %p723_p4 = por %p713_p1, %p54_p0  ;;  %p379_p5 = scmp.ge.s32.totalorder %s653_s17, 1 }
   0xd   : > { %p728_p6 = por %p128_p3, %p54_p0  ;;  %p135_p7 = scmp.lt.s32.totalorder %s653_s17, 3 }
   0xe   : > { %s934_s22 = scalar_select %p723_p4, 1, 0 }
   0xf   : > { %s935_s23 = scalar_select %p728_p6, 1, 0 }
  0x10   : > { %p733_p8 = pnand %p379_p5, %p135_p7  ;;  %s655_s25 = smov [#allocation5]  }
  0x11   : > { %s148_s26 = sshll.u32 %s655_s25, 4  ;;  %s656_s27 = smov [#allocation7]   ;;  %s149_s26 = int_to_ptr.vmem [resolvable:$true] %s148_s26 }
  0x12   : > { %s936_s24 = scalar_select %p733_p8, 1, 0 }
  0x13   : > { %p408_p10 = pneg %p733_p8  ;;  %s159_s28 = sshll.u32 %s656_s27, 4  ;;  %s746_s28 = int_to_ptr.vmem [resolvable:$true] %s159_s28 }
  0x14   : > { %s481_s5 = scalar_lea.hbm %s925_s1, 16 }
  0x15   : > { %p742_p11 = pnand %p408_p10, %p713_p1  ;;  %p482_p12 = scmp.ne.s32.totalorder %s925_s1, %s481_s5 }
  0x16   : > { %p488_p5 = scmp.lt.u32.totalorder %s481_s5, %s925_s1 }
  0x17   : > { %p483_p13 = pneg %p742_p11 }
  0x19   : > { %p484_p0 = pnand %p483_p13, %p482_p12 }
  0x1b   : > { %p485_p3 = pneg %p484_p0 }
  0x1d   : > { %p490_p7 = pnand %p488_p5, %p485_p3 }
  0x1f   : > { %493 = shalt.err (!%p490_p7)
}
  0x20   : > { %s494_s10 = scalar_lea.vmem %s149_s26, 16  ;;  %s501_s11 = scalar_lea.vmem %s149_s26, 32 }
  0x21   : > { %p495_p10 = scmp.ne.s32.totalorder %s149_s26, %s494_s10  ;;  %p502_p1 = scmp.lt.s32.totalorder %s149_s26, %s149_s26 }
  0x22   : > { %p503_p4 = scmp.lt.s32.totalorder %s501_s11, %s494_s10 }
  0x23   : > { %p497_p9 = pnand %p495_p10, %p483_p13 }
  0x24   : > { %p504_p8 = por %p503_p4, %p502_p1 }
  0x25   : > { %p498_p6 = pneg %p497_p9 }
  0x27   : > { %p505_p2 = pnand %p504_p8, %p498_p6 }
  0x29   : > { %508 = shalt.err (!%p505_p2)
}
  0x2a   : > { %411 = dma.hbm_to_vmem [thread:$0]  (!%p742_p11), %s925_s1, 16, %s149_s26, [#allocation6]  }
  0x2b   : > { %s509_s30 = scalar_lea.hbm %s926_s2, 16 }
  0x2c   : > { %p510_p9 = scmp.ne.s32.totalorder %s926_s2, %s509_s30  ;;  %p516_p2 = scmp.lt.u32.totalorder %s509_s30, %s926_s2 }
  0x2e   : > { %p512_p1 = pnand %p510_p9, %p483_p13 }
  0x30   : > { %p513_p4 = pneg %p512_p1 }
  0x32   : > { %p518_p6 = pnand %p516_p2, %p513_p4 }
  0x34   : > { %521 = shalt.err (!%p518_p6)
}
  0x35   : > { %s522_s26 = scalar_lea.vmem %s746_s28, 16  ;;  %s529_s8 = scalar_lea.vmem %s746_s28, 32 }
  0x36   : > { %p523_p8 = scmp.ne.s32.totalorder %s746_s28, %s522_s26  ;;  %p530_p3 = scmp.lt.s32.totalorder %s746_s28, %s746_s28 }
  0x37   : > { %p531_p5 = scmp.lt.s32.totalorder %s529_s8, %s522_s26 }
  0x38   : > { %p525_p12 = pnand %p523_p8, %p483_p13 }
  0x39   : > { %p532_p7 = por %p531_p5, %p530_p3 }
  0x3a   : > { %p526_p0 = pneg %p525_p12 }
  0x3c   : > { %p533_p10 = pnand %p532_p7, %p526_p0 }
  0x3e   : > { %536 = shalt.err (!%p533_p10)
}
  0x3f   : > { %414 = dma.hbm_to_vmem [thread:$0]  (!%p742_p11), %s926_s2, 16, %s746_s28, [#allocation6]  }
  0x40   : > { %s32_s11 = sadd.s32 1, %s649_s16  ;;  %s41_s18 = sadd.s32 1, %s641_s14 }
  0x41   : > { %p34_p13 = scmp.ge.s32.totalorder %s32_s11, 2  ;;  %p48_p9 = scmp.ne.s32.totalorder %s641_s14, %s637_s13 }
  0x42   : > { %p49_p1 = scmp.eq.s32.totalorder %s653_s17, 0  ;;  %p425_p4 = scmp.lt.s32.totalorder %s653_s17, 2 }
  0x43   : > { %s952_s11 = smov (%p34_p13, %s32_s11), 0  ;;  %p938_p6 = scmp.ne.s32.totalorder %s933_s21, 0 }
  0x44   : > { %p50_p2 = por %p49_p1, %p48_p9  ;;  %s36_s19 = ssub.s32 %s649_s16, %s952_s11 }
  0x45   : > { %p806_p8 = por %p938_p6, %p48_p9  ;;  %s170_s25 = sand.u32 1, %s641_s14  }
  0x46   : > { %p39_p12 = scmp.eq.s32.totalorder %s36_s19, 0  ;;  %s383_s28 = sshll.u32 %s170_s25, 3 }
  0x47   : > { %s384_s27 = sshll.u32 %s649_s16, 7  ;;  %s174_s21 = scalar_lea.vmem [#allocation2], %s383_s28 }
  0x48   : > { %s815_s30 = scalar_select %p39_p12, %s641_s14, %s41_s18  }
  0x49   : > { %s820_s6 = scalar_lea.hbm %s924_s0, %s384_s27  ;;  %s182_s7 = sshll.u32 %s174_s21, 4  ;;  %s828_s7 = int_to_ptr.vmem [resolvable:$true] %s182_s7 }
  0x4a   : > { %p824_p11 = pnand %p425_p4, %p50_p2  ;;  %s171_s8 = scalar_lea.sflag [#allocation3], %s170_s25 }
  0x4b   : > { %s537_s9 = scalar_lea.hbm %s820_s6, 128  ;;  %s542_s19 = scalar_lea.hbm %s924_s0, 256 }
  0x4c   : > { %p538_p0 = scmp.ne.s32.totalorder %s820_s6, %s537_s9  ;;  %p539_p3 = pneg %p824_p11 }
  0x4d   : > { %p543_p10 = scmp.lt.u32.totalorder %s820_s6, %s924_s0  ;;  %p544_p13 = scmp.lt.u32.totalorder %s542_s19, %s537_s9 }
  0x4e   : > { %p540_p5 = pnand %p539_p3, %p538_p0  ;;  %p546_p1 = scmp.lt.u32.totalorder %s537_s9, %s820_s6 }
  0x4f   : > { %p545_p9 = por %p544_p13, %p543_p10 }
  0x50   : > { %p541_p7 = pneg %p540_p5 }
  0x51   : > { %p547_p4 = por %p546_p1, %p545_p9 }
  0x53   : > { %p548_p2 = pnand %p547_p4, %p541_p7 }
  0x55   : > { %551 = shalt.err (!%p548_p2)
}
  0x56   : > { %s552_s25 = scalar_lea.vmem %s828_s7, 128  ;;  %s657_s4 = smov [#allocation2]  }
  0x57   : > { %p553_p6 = scmp.ne.s32.totalorder %s828_s7, %s552_s25  ;;  %s557_s5 = sshll.u32 %s657_s4, 4  ;;  %s558_s5 = int_to_ptr.vmem [resolvable:$false] %s557_s5 }
  0x58   : > { %s559_s21 = scalar_lea.vmem %s558_s5, 256  ;;  %p560_p5 = scmp.lt.s32.totalorder %s828_s7, %s558_s5 }
  0x59   : > { %p555_p12 = pnand %p553_p6, %p539_p3  ;;  %p561_p10 = scmp.lt.s32.totalorder %s559_s21, %s552_s25 }
  0x5b   : > { %p556_p0 = pneg %p555_p12  ;;  %p562_p13 = por %p561_p10, %p560_p5 }
  0x5d   : > { %p563_p9 = pnand %p562_p13, %p556_p0 }
  0x5f   : > { %566 = shalt.err (!%p563_p9)
}
  0x60   : > { %418 = dma.hbm_to_vmem [thread:$0]  (!%p824_p11), %s820_s6, 128, %s828_s7, %s171_s8  }
  0x61   : > { %p941_p7 = scmp.ne.s32.totalorder %s936_s24, 0 }
  0x62   : > { %s858_s9 = sand.u32 (!%p941_p7), 1, %s637_s13   ;;  %p942_p3 = scmp.ne.s32.totalorder (!%p941_p7), %s934_s22, 0 }
  0x63   : > { %191 = sbr.rel (%p941_p7) target bundleno = 440 (0x1b8), region = 32  ;;  %s386_s10 = sshll.u32 (!%p941_p7), %s858_s9, 3 }
  0x64   : > { %s194_s18 = scalar_lea.sflag (!%p941_p7), [#allocation3], %s858_s9  ;;  %s197_s19 = scalar_lea.vmem (!%p941_p7), [#allocation2], %s386_s10 }
  0x6a   : > { %620 = dma.done.wait (%p942_p3), %s194_s18, 128  }
  0x6b   : > { %622 = vsyncadd (%p942_p3), %s194_s18, 4294967168  ;;  %p943_p1 = scmp.ne.s32.totalorder %s932_s20, 0 }
  0x6d   : > { %624 = dma.done.wait (%p943_p1), [#allocation6], 32  }
  0x6e   : > { %626 = vsyncadd (%p943_p1), [#allocation6], 4294967264  ;;  %vm231_vm0 = vcmask 261120   ;;  %v228_v0 = vld [vmem:[%s197_s19] sm:$0xff]  ;;  %s389_s22 = sshll.u32 %s858_s9, 2  ;;  %s393_s20 = sshll.u32 %s645_s15, 6 }
  0x6f   : > { %v232_v1 = vsel %vm231_vm0, %v228_v0, 0.0  ;;  %v390_v11 = vld [vmem:[#allocation5] ss:$0 sm:$0xff]  ;;  %v391_v13 = vld [vmem:[#allocation7] ss:$0 sm:$0xff]  ;;  %s227_s24 = scalar_lea.vmem [#allocation8], %s389_s22  ;;  %s875_s8 = scalar_lea.hbm %s927_s3, %s393_s20 }
  0x70   : > { %233 = vadd.xlane.f32.xlu0 %v232_v1  ;;  %s278_s6 = sshll.u32 %s227_s24, 4  ;;  %vm261_vm1 = vcmask 257024   ;;  %s264_s28 = scalar_lea.sflag [#allocation4], %s858_s9  ;;  %s877_s6 = int_to_ptr.vmem [resolvable:$true] %s278_s6 }
  0x71   : > { %s567_s27 = scalar_lea.vmem %s877_s6, 64  ;;  %s658_s15 = smov [#allocation8]  }
  0x72   : > { %p568_p11 = scmp.ne.s32.totalorder %s877_s6, %s567_s27  ;;  %s571_s25 = sshll.u32 %s658_s15, 4  ;;  %s572_s25 = int_to_ptr.vmem [resolvable:$false] %s571_s25 }
  0x73   : > { %s573_s4 = scalar_lea.vmem %s572_s25, 128  ;;  %p574_p6 = scmp.lt.s32.totalorder %s877_s6, %s572_s25 }
  0x74   : > { %p569_p4 = pnand %p568_p11, %p806_p8  ;;  %p575_p12 = scmp.lt.s32.totalorder %s573_s4, %s567_s27 }
  0x76   : > { %p570_p2 = pneg %p569_p4  ;;  %p576_p0 = por %p575_p12, %p574_p6 }
  0x78   : > { %p577_p5 = pnand %p576_p0, %p570_p2 }
  0xfd   : > { %v234_v2 = vpop.xlane.xlu0 %233 }
  0xfe   : > { %v236_v3 = vmul.f32 0.03125, %v234_v2 }
 0x100   : > { %v237_v4 = vsub.f32 %v228_v0, %v236_v3 }
 0x102   : > { %v238_v5 = vmul.f32 %v237_v4, %v237_v4 }
 0x104   : > { %v239_v6 = vsel %vm231_vm0, %v238_v5, 0.0 }
 0x105   : > { %240 = vadd.xlane.f32.xlu0 %v239_v6 }
 0x192   : > { %v241_v7 = vpop.xlane.xlu0 %240 }
 0x193   : > { %v242_v8 = vmul.f32 0.03125, %v241_v7 }
 0x195   : > { %v243_v9 = vadd.f32 1e-05, %v242_v8 }
 0x197   : > { %479 = vrsqrt.f32 %v243_v9 }
 0x1a1   : > { %v480_v10 = vpop.eup %479 }
 0x1a2   : > { %v245_v12 = vmul.f32 %v480_v10, %v237_v4 }
 0x1a4   : > { %v252_v14 = vmul.f32 %v390_v11, %v245_v12 }
 0x1a6   : > { %v259_v15 = vadd.f32 %v391_v13, %v252_v14 }
 0x1a8   : > { %v260_v16 = vpack.c.bf16 %v259_v15, %v259_v15 }
 0x1aa   : > { %262 = vst.msk [vmem:[%s227_s24] sm:$0xf] %vm261_vm1, %v260_v16 }
 0x1ab   : > { %580 = shalt.err (!%p577_p5)
}
 0x1ac   : > { %s581_s5 = scalar_lea.hbm %s875_s8, 64  ;;  %s585_s10 = scalar_lea.hbm %s927_s3, 128 }
 0x1ad   : > { %p582_p10 = scmp.ne.s32.totalorder %s875_s8, %s581_s5  ;;  %p586_p7 = scmp.lt.u32.totalorder %s875_s8, %s927_s3 }
 0x1ae   : > { %p587_p3 = scmp.lt.u32.totalorder %s585_s10, %s581_s5  ;;  %p589_p11 = scmp.lt.u32.totalorder %s581_s5, %s875_s8 }
 0x1af   : > { %p583_p13 = pnand %p582_p10, %p806_p8 }
 0x1b0   : > { %p588_p1 = por %p587_p3, %p586_p7 }
 0x1b1   : > { %p584_p9 = pneg %p583_p13 }
 0x1b2   : > { %p590_p4 = por %p589_p11, %p588_p1 }
 0x1b4   : > { %p591_p2 = pnand %p590_p4, %p584_p9 }
 0x1b6   : > { %594 = shalt.err (!%p591_p2)
}
 0x1b7   : > { %406 = dma.vmem_to_hbm [thread:$0]  (%p806_p8), %s877_s6, 64, %s875_s8, %s264_s28  }
 0x1b8 PF: > { %s290_s22 = sand.u32 1, %s633_s12   ;;  %p944_p6 = scmp.ne.s32.totalorder %s935_s23, 0 }
 0x1b9   : > { %p945_p12 = scmp.ge.s32.totalorder %s653_s17, 2  ;;  %s291_s20 = scalar_lea.sflag [#allocation4], %s290_s22 }
 0x1bb   : > { %p420_p0 = pnand %p945_p12, %p944_p6 }
 0x1bd   : > { %628 = dma.done.wait (!%p420_p0), %s291_s20, 64  }
 0x1be   : > { %630 = vsyncadd (!%p420_p0), %s291_s20, 4294967232  ;;  %s20_s17 = sadd.s32 1, %s653_s17   ;;  %s946_s12 = smov %s637_s13 }
 0x1bf   : > { %p17_p5 = scmp.ge.s32.totalorder %s20_s17, 4   ;;  %s947_s13 = smov %s641_s14 }
 0x1c0   : > { %s948_s14 = smov %s815_s30  ;;  %s949_s15 = smov %s649_s16 }
 0x1c1   : > { %s950_s16 = smov %s952_s11  ;;  %19 = sbr.rel (!%p17_p5) target bundleno = 7 (0x7), region = 85 }
 0x1c8   :  { %296 = vsyncpa [#allocation3], 1 }
 0x1c9   :  { %298 = vsyncpa [#allocation3 + $0x1], 1 }
 0x1ca   :  { %299 = vsyncpa [#allocation6], 1 }
 0x1cb   :  { %300 = vsyncpa [#allocation4], 1 }
 0x1cc   :  { %302 = vsyncpa [#allocation4 + $0x1], 1 }

// kernel: gpt_forward.8
= control target key start
LH: loop header
LB: loop body
LE: loop exit
PB: predicated region body
PF: predicated region fallthrough
CT: control target
= control target key end

     0   :  { %s1694_s0 = inlined_call_operand.hbm [shape: f32[2,8,32], index: 0, kind: input, shape index: {}]   ;;  %s1695_s1 = inlined_call_operand.hbm [shape: f32[1,32], index: 1, kind: input, shape index: {}]   ;;  %s1696_s2 = inlined_call_operand.hbm [shape: f32[1,32], index: 2, kind: input, shape index: {}]   ;;  %s1697_s3 = inlined_call_operand.hbm [shape: bf16[32,96], index: 3, kind: input, shape index: {}]   ;;  %s1698_s4 = inlined_call_operand.hbm [shape: f32[1,96], index: 4, kind: input, shape index: {}]   ;;  %s1699_s5 = inlined_call_operand.hbm [shape: bf16[2,2,8,16], index: 5, kind: output, shape index: {0}]   ;;  %s1700_s6 = inlined_call_operand.hbm [shape: bf16[2,2,8,16], index: 6, kind: output, shape index: {1}]   ;;  %s1701_s7 = inlined_call_operand.hbm [shape: bf16[2,2,8,16], index: 7, kind: output, shape index: {2}]  }
   0x1   :  { %1708 = sst [smem:[#allocation20_spill]] %s1694_s0 }
   0x2   :  { %1709 = sst [smem:[#allocation21_spill]] %s1695_s1 }
   0x3   :  { %1710 = sst [smem:[#allocation22_spill]] %s1696_s2 }
   0x4   :  { %1711 = sst [smem:[#allocation23_spill]] %s1697_s3 }
   0x5   :  { %1712 = sst [smem:[#allocation24_spill]] %s1698_s4 }
   0x6   :  { %13 = vsyncpa [#allocation3], 0 }
   0x7   :  { %15 = vsyncpa [#allocation3 + $0x1], 0 }
   0x8   :  { %16 = vsyncpa [#allocation6], 0 }
   0x9   :  { %17 = vsyncpa [#allocation9], 0 }
   0xa   :  { %18 = vsyncpa [#allocation4], 0 }
   0xb   :  { %20 = vsyncpa [#allocation4 + $0x1], 0 }
   0xc   :  { %21 = vsyncpa [#allocation13], 0 }
   0xd   :  { %23 = vsyncpa [#allocation13 + $0x1], 0  ;;  %s1301_s24 = smov 0   ;;  %s1303_s25 = smov 0  }
   0xe   :  { %s1305_s26 = smov 0   ;;  %s1307_s27 = smov 0  }
   0xf   :  { %s1309_s28 = smov 0   ;;  %s1311_s29 = smov 0  }
  0x10 LB: > { %s1332_s30 = sadd.s32 4294967295, %s1241_s29   ;;  %p767_p0 = scmp.ge.s32.totalorder %s1241_s29, 1  ;;  %s1241_s29 = sphi %s1311_s29, %s29_s29   ;;  %s1237_s28 = sphi %s1309_s28, %s1741_s28   ;;  %s1233_s27 = sphi %s1307_s27, %s1740_s27   ;;  %s1229_s26 = sphi %s1305_s26, %s1739_s26   ;;  %s1225_s25 = sphi %s1303_s25, %s1738_s25   ;;  %s1221_s24 = sphi %s1301_s24, %s1737_s24  }
  0x11   : > { %p1702_p1 = scmp.eq.s32.totalorder %s1332_s30, 0  ;;  %p242_p2 = scmp.lt.s32.totalorder %s1241_s29, 3 }
  0x12   : > { %s1243_s9 = smov [#allocation5]   ;;  %s1244_s11 = smov [#allocation8]  }
  0x13   : > { %p1337_p3 = pnand %p767_p0, %p242_p2  ;;  %s255_s10 = sshll.u32 %s1243_s9, 4  ;;  %s256_s10 = int_to_ptr.vmem [resolvable:$true] %s255_s10 }
  0x14   : > { %s276_s12 = sshll.u32 %s1244_s11, 4  ;;  %s1245_s14 = smov [#allocation7]   ;;  %s1350_s12 = int_to_ptr.vmem [resolvable:$true] %s276_s12 }
  0x15   : > { %s1713_s8 = scalar_select %p1337_p3, 1, 0 }
  0x16   : > { %p846_p5 = pneg %p1337_p3  ;;  %s1352_s15 = sshll.u32 %s1245_s14, 4  ;;  %s267_s15 = int_to_ptr.vmem [resolvable:$true] %s1352_s15 }
  0x17   : > { %s1715_s1 = sld [smem:[#allocation21_spill]] }
  0x18   : > { %p1346_p6 = pnand %p846_p5, %p1702_p1 }
  0x1a   : > { %p1362_p8 = pneg %p1346_p6 }
  0x1d   : > { %s949_s18 = scalar_lea.hbm %s1715_s1, 16 }
  0x1e   : > { %p950_p7 = scmp.ne.s32.totalorder %s1715_s1, %s949_s18  ;;  %p956_p11 = scmp.lt.u32.totalorder %s949_s18, %s1715_s1 }
  0x20   : > { %p952_p9 = pnand %p1362_p8, %p950_p7 }
  0x22   : > { %p953_p10 = pneg %p952_p9 }
  0x24   : > { %p958_p12 = pnand %p956_p11, %p953_p10 }
  0x26   : > { %961 = shalt.err (!%p958_p12)
}
  0x27   : > { %s962_s9 = scalar_lea.vmem %s256_s10, 16  ;;  %s969_s11 = scalar_lea.vmem %s256_s10, 32 }
  0x28   : > { %p963_p13 = scmp.ne.s32.totalorder %s256_s10, %s962_s9  ;;  %p970_p5 = scmp.lt.s32.totalorder %s256_s10, %s256_s10 }
  0x29   : > { %p971_p4 = scmp.lt.s32.totalorder %s969_s11, %s962_s9 }
  0x2a   : > { %p965_p0 = pnand %p963_p13, %p1362_p8 }
  0x2b   : > { %p972_p1 = por %p971_p4, %p970_p5 }
  0x2c   : > { %p966_p2 = pneg %p965_p0 }
  0x2e   : > { %p973_p3 = pnand %p972_p1, %p966_p2 }
  0x30   : > { %976 = shalt.err (!%p973_p3)
}
  0x31   : > { %849 = dma.hbm_to_vmem [thread:$0]  (!%p1346_p6), %s1715_s1, 16, %s256_s10, [#allocation6]  }
  0x32   : > { %s1717_s3 = sld [smem:[#allocation23_spill]] }
  0x38   : > { %s977_s19 = scalar_lea.hbm %s1717_s3, 256 }
  0x39   : > { %p978_p7 = scmp.ne.s32.totalorder %s1717_s3, %s977_s19  ;;  %p984_p1 = scmp.lt.u32.totalorder %s977_s19, %s1717_s3 }
  0x3b   : > { %p980_p9 = pnand %p978_p7, %p1362_p8 }
  0x3d   : > { %p981_p4 = pneg %p980_p9 }
  0x3f   : > { %p986_p3 = pnand %p984_p1, %p981_p4 }
  0x41   : > { %989 = shalt.err (!%p986_p3)
}
  0x42   : > { %s990_s10 = scalar_lea.vmem %s1350_s12, 256  ;;  %p998_p13 = scmp.lt.s32.totalorder %s1350_s12, %s1350_s12 }
  0x43   : > { %p991_p10 = scmp.ne.s32.totalorder %s1350_s12, %s990_s10  ;;  %p999_p0 = scmp.lt.s32.totalorder %s990_s10, %s990_s10 }
  0x45   : > { %p993_p11 = pnand %p991_p10, %p1362_p8  ;;  %p1000_p2 = por %p999_p0, %p998_p13 }
  0x47   : > { %p994_p12 = pneg %p993_p11 }
  0x49   : > { %p1001_p5 = pnand %p1000_p2, %p994_p12 }
  0x4b   : > { %1004 = shalt.err (!%p1001_p5)
}
  0x4c   : > { %s1246_s11 = smov 64   ;;  %s1247_s14 = smov 4  }
  0x4d   : > { %855 = dma.hbm_to_vmem [thread:$0]  (!%p1346_p6), %s1717_s3, 256, %s1350_s12, [#allocation9], %s1246_s11, %s1246_s11, %s1247_s14  }
  0x4e   : > { %s1718_s2 = sld [smem:[#allocation22_spill]] }
  0x54   : > { %s1005_s20 = scalar_lea.hbm %s1718_s2, 16 }
  0x55   : > { %p1006_p7 = scmp.ne.s32.totalorder %s1718_s2, %s1005_s20  ;;  %p1012_p1 = scmp.lt.u32.totalorder %s1005_s20, %s1718_s2 }
  0x57   : > { %p1008_p9 = pnand %p1006_p7, %p1362_p8 }
  0x59   : > { %p1009_p4 = pneg %p1008_p9 }
  0x5b   : > { %p1014_p3 = pnand %p1012_p1, %p1009_p4 }
  0x5d   : > { %1017 = shalt.err (!%p1014_p3)
}
  0x5e   : > { %s1018_s16 = scalar_lea.vmem %s267_s15, 16  ;;  %s1025_s12 = scalar_lea.vmem %s267_s15, 32 }
  0x5f   : > { %p1019_p10 = scmp.ne.s32.totalorder %s267_s15, %s1018_s16  ;;  %p1026_p13 = scmp.lt.s32.totalorder %s267_s15, %s267_s15 }
  0x60   : > { %p1027_p0 = scmp.lt.s32.totalorder %s1025_s12, %s1018_s16 }
  0x61   : > { %p1021_p11 = pnand %p1019_p10, %p1362_p8 }
  0x62   : > { %p1028_p2 = por %p1027_p0, %p1026_p13 }
  0x63   : > { %p1022_p12 = pneg %p1021_p11 }
  0x65   : > { %p1029_p5 = pnand %p1028_p2, %p1022_p12 }
  0x67   : > { %1032 = shalt.err (!%p1029_p5)
}
  0x68   : > { %852 = dma.hbm_to_vmem [thread:$0]  (!%p1346_p6), %s1718_s2, 16, %s267_s15, [#allocation6]  }
  0x69   : > { %s1248_s17 = smov [#allocation10]   ;;  %s1719_s4 = sld [smem:[#allocation24_spill]] }
  0x6a   : > { %s290_s18 = sshll.u32 %s1248_s17, 4  ;;  %s291_s18 = int_to_ptr.vmem [resolvable:$true] %s290_s18 }
  0x6f   : > { %s1033_s22 = scalar_lea.hbm %s1719_s4, 16 }
  0x70   : > { %p1034_p7 = scmp.ne.s32.totalorder %s1719_s4, %s1033_s22  ;;  %p1040_p1 = scmp.lt.u32.totalorder %s1033_s22, %s1719_s4 }
  0x72   : > { %p1036_p9 = pnand %p1034_p7, %p1362_p8 }
  0x74   : > { %p1037_p4 = pneg %p1036_p9 }
  0x76   : > { %p1042_p3 = pnand %p1040_p1, %p1037_p4 }
  0x78   : > { %1045 = shalt.err (!%p1042_p3)
}
  0x79   : > { %s1046_s15 = scalar_lea.vmem %s291_s18, 16  ;;  %s1053_s12 = scalar_lea.vmem %s291_s18, 32 }
  0x7a   : > { %p1047_p10 = scmp.ne.s32.totalorder %s291_s18, %s1046_s15  ;;  %p1054_p13 = scmp.lt.s32.totalorder %s291_s18, %s291_s18 }
  0x7b   : > { %p1055_p0 = scmp.lt.s32.totalorder %s1053_s12, %s1046_s15 }
  0x7c   : > { %p1049_p11 = pnand %p1047_p10, %p1362_p8 }
  0x7d   : > { %p1056_p2 = por %p1055_p0, %p1054_p13 }
  0x7e   : > { %p1050_p12 = pneg %p1049_p11 }
  0x80   : > { %p1057_p5 = pnand %p1056_p2, %p1050_p12 }
  0x82   : > { %1060 = shalt.err (!%p1057_p5)
}
  0x83   : > { %858 = dma.hbm_to_vmem [thread:$0]  (!%p1346_p6), %s1719_s4, 16, %s291_s18, [#allocation9]  }
  0x84   : > { %s1704_s21 = sadd.s32 4294967294, %s1241_s29   ;;  %s41_s17 = sadd.s32 1, %s1237_s28 }
  0x85   : > { %p43_p8 = scmp.ge.s32.totalorder %s41_s17, 2  ;;  %s50_s13 = sadd.s32 1, %s1229_s26 }
  0x86   : > { %p57_p7 = scmp.ne.s32.totalorder %s1229_s26, %s1225_s25  ;;  %p58_p9 = scmp.eq.s32.totalorder %s1241_s29, 0 }
  0x87   : > { %s1743_s17 = smov (%p43_p8, %s41_s17), 0  ;;  %p63_p1 = scmp.ne.s32.totalorder %s1225_s25, %s1221_s24 }
  0x88   : > { %p1446_p4 = por %p58_p9, %p57_p7  ;;  %s45_s18 = ssub.s32 %s1237_s28, %s1743_s17 }
  0x89   : > { %p173_p6 = scmp.eq.s32.totalorder %s1332_s30, 1  ;;  %p48_p3 = scmp.eq.s32.totalorder %s45_s18, 0 }
  0x8a   : > { %p1721_p10 = scmp.eq.s32.totalorder %s1332_s30, 0  ;;  %p179_p13 = scmp.eq.s32.totalorder %s1704_s21, 1 }
  0x8b   : > { %p1461_p12 = por %p173_p6, %p57_p7  ;;  %p877_p2 = scmp.lt.s32.totalorder %s1241_s29, 2 }
  0x8c   : > { %p1457_p11 = por %p1721_p10, %p63_p1  ;;  %p1470_p0 = por %p179_p13, %p63_p1 }
  0x8d   : > { %s1723_s22 = scalar_select %p1461_p12, 1, 0 }
  0x8e   : > { %s1468_s23 = scalar_select %p48_p3, %s1229_s26, %s50_s13  }
  0x8f   : > { %s1724_s9 = scalar_select %p1470_p0, 1, 0 }
  0x90   : > { %s301_s10 = sand.u32 1, %s1229_s26   ;;  %s774_s16 = sshll.u32 %s1237_s28, 7 }
  0x91   : > { %s773_s15 = sshll.u32 %s301_s10, 3  ;;  %s1725_s0 = sld [smem:[#allocation20_spill]] }
  0x92   : > { %s305_s18 = scalar_lea.vmem [#allocation2], %s773_s15  ;;  %p1484_p5 = pnand %p877_p2, %p1446_p4 }
  0x93   : > { %s313_s13 = sshll.u32 %s305_s18, 4  ;;  %s302_s1 = scalar_lea.sflag [#allocation3], %s301_s10  ;;  %s1488_s13 = int_to_ptr.vmem [resolvable:$true] %s313_s13 }
  0x94   : > { %p1063_p7 = pneg %p1484_p5 }
  0x97   : > { %s1480_s14 = scalar_lea.hbm %s1725_s0, %s774_s16  ;;  %s1066_s19 = scalar_lea.hbm %s1725_s0, 256 }
  0x98   : > { %s1061_s2 = scalar_lea.hbm %s1480_s14, 128  ;;  %p1067_p4 = scmp.lt.u32.totalorder %s1480_s14, %s1725_s0 }
  0x99   : > { %p1062_p8 = scmp.ne.s32.totalorder %s1480_s14, %s1061_s2  ;;  %p1068_p6 = scmp.lt.u32.totalorder %s1066_s19, %s1061_s2 }
  0x9a   : > { %p1070_p10 = scmp.lt.u32.totalorder %s1061_s2, %s1480_s14 }
  0x9b   : > { %p1064_p9 = pnand %p1063_p7, %p1062_p8  ;;  %p1069_p3 = por %p1068_p6, %p1067_p4 }
  0x9d   : > { %p1065_p1 = pneg %p1064_p9  ;;  %p1071_p13 = por %p1070_p10, %p1069_p3 }
  0x9f   : > { %p1072_p2 = pnand %p1071_p13, %p1065_p1 }
  0xa1   : > { %1075 = shalt.err (!%p1072_p2)
}
  0xa2   : > { %s1076_s10 = scalar_lea.vmem %s1488_s13, 128  ;;  %s1249_s18 = smov [#allocation2]  }
  0xa3   : > { %p1077_p8 = scmp.ne.s32.totalorder %s1488_s13, %s1076_s10  ;;  %s1081_s16 = sshll.u32 %s1249_s18, 4  ;;  %s1082_s16 = int_to_ptr.vmem [resolvable:$false] %s1081_s16 }
  0xa4   : > { %s1083_s15 = scalar_lea.vmem %s1082_s16, 256  ;;  %p1084_p12 = scmp.lt.s32.totalorder %s1488_s13, %s1082_s16 }
  0xa5   : > { %p1079_p9 = pnand %p1077_p8, %p1063_p7  ;;  %p1085_p4 = scmp.lt.s32.totalorder %s1083_s15, %s1076_s10 }
  0xa7   : > { %p1080_p0 = pneg %p1079_p9  ;;  %p1086_p6 = por %p1085_p4, %p1084_p12 }
  0xa9   : > { %p1087_p3 = pnand %p1086_p6, %p1080_p0 }
  0xab   : > { %1090 = shalt.err (!%p1087_p3)
}
  0xac   : > { %862 = dma.hbm_to_vmem [thread:$0]  (!%p1484_p5), %s1480_s14, 128, %s1488_s13, %s302_s1  }
  0xad   : > { %p1727_p1 = scmp.ne.s32.totalorder %s1713_s8, 0 }
  0xae   : > { %s1518_s2 = sand.u32 (!%p1727_p1), 1, %s1225_s25  }
  0xaf   : > { %322 = sbr.rel (%p1727_p1) target bundleno = 903 (0x387), region = 40  ;;  %s1521_s19 = sshll.u32 (!%p1727_p1), %s1518_s2, 3 }
  0xb0   : > { %s325_s12 = scalar_lea.sflag (!%p1727_p1), [#allocation3], %s1518_s2  ;;  %s328_s11 = scalar_lea.vmem (!%p1727_p1), [#allocation2], %s1521_s19 }
  0xb6   : > { %1200 = dma.done.wait (%p1457_p11), %s325_s12, 128  }
  0xb7   : > { %1202 = vsyncadd (%p1457_p11), %s325_s12, 4294967168  ;;  %p1728_p12 = scmp.eq.s32.totalorder %s1332_s30, 0 }
  0xb9   : > { %1204 = dma.done.wait (%p1728_p12), [#allocation6], 32   ;;  %p1729_p0 = pmov %p1728_p12 }
  0xbb   : > { %1206 = vsyncadd (%p1729_p0), [#allocation6], 4294967264  ;;  %p1730_p5 = pmov %p1729_p0 }
  0xbc   : > { %p1731_p7 = pmov %p1729_p0 }
  0xbd   : > { %1208 = dma.done.wait (%p1730_p5), [#allocation9], 272  }
  0xbe   : > { %1210 = vsyncadd (%p1731_p7), [#allocation9], 4294967024  ;;  %vm389_vm0 = vcmask 261120   ;;  %v386_v0 = vld [vmem:[%s328_s11] sm:$0xff]  ;;  %v945_v7 = vld [vmem:[#allocation8] sm:$0xff]   ;;  %v1250_v8 = vmov 0.0  }
  0xbf   : > { %v390_v1 = vsel %vm389_vm0, %v386_v0, 0.0  ;;  %814 = vmatprep.subr.bf16.mxu0 %v1250_v8  ;;  %vm1251_vm1 = vmmov 0   ;;  %v946_v9 = vld [vmem:[#allocation8 + $0x8] sm:$0xff]   ;;  %v784_v14 = vld [vmem:[#allocation5] ss:$0 sm:$0xff]  ;;  %vm487_vm2 = vcmask 125952  }
  0xc0   : > { %391 = vadd.xlane.f32.xlu0 %v390_v1  ;;  %818 = vmatprep.mubr.msk.bf16.mxu0 %vm1251_vm1, %v1250_v8  ;;  %v785_v16 = vld [vmem:[#allocation7] ss:$0 sm:$0xff]  ;;  %v786_v20 = vld [vmem:[#allocation10] ss:$0 sm:$0xff]  ;;  %s1706_s1 = smov 64   ;;  %s1253_s8 = smov 96  }
  0xc1   : > { %815 = vmatpush3.bf16.msra.mxu0 %v945_v7  ;;  %s1542_s21 = scalar_lea.vmem [#allocation11], %s1521_s19  ;;  %s1254_s20 = smov 80  }
  0xc2   : > { %816 = vmatprep.subr.bf16.mxu0 %v1250_v8  ;;  %s1255_s14 = smov 112   ;;  %s1256_s13 = smov 48  }
  0xc3   : > { %s377_s10 = scalar_lea.vmem [#allocation12], %s1521_s19  ;;  %s524_s16 = sand.u32 1, %s1332_s30  }
  0xc4   : > { %s561_s18 = sshll.u32 %s377_s10, 4  ;;  %s1549_s15 = sshll.u32 %s1233_s27, 7  ;;  %s1556_s18 = int_to_ptr.vmem [resolvable:$true] %s561_s18 }
  0xc5   : > { %817 = vmatpush3.bf16.msra.mxu0 %v946_v9  ;;  %s1552_s12 = scalar_lea.vmem [#allocation14], %s1521_s19  ;;  %s544_s11 = sshll.u32 %s1542_s21, 4  ;;  %s1567_s11 = int_to_ptr.vmem [resolvable:$true] %s544_s11 }
  0xc6   : > { %s1569_s27 = scalar_lea.sflag [#allocation13], %s524_s16  ;;  %s1091_s19 = scalar_lea.vmem %s1556_s18, 128 }
  0xc7   : > { %p1092_p11 = scmp.ne.s32.totalorder %s1556_s18, %s1091_s19  ;;  %p1732_p10 = scmp.ne.s32.totalorder %s1723_s22, 0 }
  0xc9   : > { %p1093_p13 = pnand %p1092_p11, %p1732_p10 }
  0xcb   : > { %p1094_p2 = pneg %p1093_p13 }
 0x14d   : > { %v392_v2 = vpop.xlane.xlu0 %391 }
 0x14e   : > { %v394_v3 = vmul.f32 0.03125, %v392_v2 }
 0x150   : > { %v395_v4 = vsub.f32 %v386_v0, %v394_v3 }
 0x152   : > { %v396_v5 = vmul.f32 %v395_v4, %v395_v4 }
 0x154   : > { %v397_v6 = vsel %vm389_vm0, %v396_v5, 0.0 }
 0x155   : > { %398 = vadd.xlane.f32.xlu0 %v397_v6 }
 0x1e2   : > { %v399_v10 = vpop.xlane.xlu0 %398 }
 0x1e3   : > { %v400_v11 = vmul.f32 0.03125, %v399_v10 }
 0x1e5   : > { %v401_v12 = vadd.f32 1e-05, %v400_v11 }
 0x1e7   : > { %947 = vrsqrt.f32 %v401_v12 }
 0x1f1   : > { %v948_v13 = vpop.eup %947 }
 0x1f2   : > { %v403_v15 = vmul.f32 %v948_v13, %v395_v4 }
 0x1f4   : > { %v410_v17 = vmul.f32 %v784_v14, %v403_v15 }
 0x1f6   : > { %v417_v18 = vadd.f32 %v785_v16, %v410_v17 }
 0x1f8   : > { %v418_v19 = vpack.c.bf16 %v417_v18, %v417_v18 }
 0x1fa   : > { %819 = vmatmul.mubr.msk.bf16.vlgmr.msra.gmra.mrb[0].mxu0 %vm389_vm0, %v418_v19 }
 0x2cd   : > { %v479_v21 = vpop.f32.mrb[0].mxu0 }
 0x2ce   : > { %v480_v22 = vadd.f32 %v786_v20, %v479_v21  ;;  %v820_v23 = vpop.f32.mrb[1].mxu0 }
 0x2cf   : > { %v482_v24 = vpop.f32.mrb[2].mxu0 }
 0x2d0   : > { %v485_v25 = vmul.f32 0.25, %v480_v22  ;;  %v806_v26 = vpack.c.bf16 %v480_v22, %v480_v22  ;;  %v821_v27 = vpop.f32.mrb[3].mxu0 }
 0x2d2   : > { %v486_v28 = vpack.c.bf16 %v485_v25, %v485_v25  ;;  %497 = vrot.lane.b32.xlu0 %v806_v26, %s1706_s1  ;;  %493 = vrot.lane.b32.xlu1 %v806_v26, %s1253_s8 }
 0x2d4   : > { %488 = vst.msk [vmem:[%s1542_s21] sm:$0xf] %vm487_vm2, %v486_v28 }
 0x2d6   : > { %509 = vrot.lane.b32.xlu1 %v806_v26, %s1254_s20  ;;  %s1564_s20 = scalar_lea.hbm %s1700_s6, %s1549_s15 }
 0x2da   : > { %504 = vrot.lane.b32.xlu1 %v486_v28, %s1255_s14  ;;  %s1257_s14 = smov [#allocation12]  }
 0x2de   : > { %514 = vrot.lane.b32.xlu1 %v806_v26, %s1256_s13  ;;  %s1095_s13 = sshll.u32 %s1257_s14, 4  ;;  %s1096_s13 = int_to_ptr.vmem [resolvable:$false] %s1095_s13 }
 0x2df   : > { %s1097_s1 = scalar_lea.vmem %s1096_s13, 256  ;;  %p1098_p8 = scmp.lt.s32.totalorder %s1556_s18, %s1096_s13 }
 0x2e0   : > { %p1099_p9 = scmp.lt.s32.totalorder %s1097_s1, %s1091_s19 }
 0x2e2   : > { %p1100_p4 = por %p1099_p9, %p1098_p8 }
 0x2e4   : > { %p1101_p6 = pnand %p1100_p4, %p1094_p2 }
 0x344   : > { %v498_v29 = vpop.permute.xlu0 %497  ;;  %v494_v30 = vpop.permute.xlu1 %493 }
 0x345   : > { %500 = vst.msk [vmem:[%s1552_s12] sm:$0xf] %vm487_vm2, %v498_v29  ;;  %496 = vst.msk [vmem:[%s377_s10] sm:$0xf] %vm487_vm2, %v494_v30 }
 0x348   : > { %v510_v31 = vpop.permute.xlu1 %509 }
 0x349   : > { %793 = vst.msk [vmem:[%s377_s10 + $0x4] sm:$0xf] %vm487_vm2, %v510_v31 }
 0x34a   : > { %1104 = shalt.err (!%p1101_p6)
}
 0x34b   : > { %s1105_s10 = scalar_lea.hbm %s1564_s20, 128  ;;  %s1109_s8 = scalar_lea.hbm %s1700_s6, 256 }
 0x34c   : > { %p1106_p3 = scmp.ne.s32.totalorder %s1564_s20, %s1105_s10  ;;  %p1110_p0 = scmp.lt.u32.totalorder %s1564_s20, %s1700_s6 }
 0x34d   : > { %p1111_p5 = scmp.lt.u32.totalorder %s1109_s8, %s1105_s10  ;;  %p1113_p11 = scmp.lt.u32.totalorder %s1105_s10, %s1564_s20 }
 0x34e   : > { %p1107_p1 = pnand %p1106_p3, %p1732_p10 }
 0x34f   : > { %p1112_p7 = por %p1111_p5, %p1110_p0 }
 0x350   : > { %p1108_p12 = pneg %p1107_p1 }
 0x351   : > { %p1114_p13 = por %p1113_p11, %p1112_p7 }
 0x353   : > { %p1115_p2 = pnand %p1114_p13, %p1108_p12 }
 0x355   : > { %1118 = shalt.err (!%p1115_p2)
}
 0x356   : > { %s1258_s1 = smov 4   ;;  %s1733_s19 = smov 64   ;;  %v505_v32 = vpop.permute.xlu1 %504 }
 0x357   : > { %841 = dma.vmem_to_hbm [thread:$0]  (%p1732_p10), %s1556_s18, 128, %s1564_s20, %s1569_s27, %s1733_s19, %s1733_s19, %s1258_s1  }
 0x358   : > { %s1600_s30 = scalar_lea.hbm %s1699_s5, %s1549_s15  ;;  %s578_s8 = sshll.u32 %s1552_s12, 4  ;;  %792 = vst.msk [vmem:[%s1542_s21 + $0x4] sm:$0xf] %vm487_vm2, %v505_v32  ;;  %s1634_s8 = int_to_ptr.vmem [resolvable:$true] %s578_s8 }
 0x359   : > { %s520_s14 = scalar_lea.sflag [#allocation4], %s1518_s2  ;;  %s1119_s13 = scalar_lea.vmem %s1567_s11, 128 }
 0x35a   : > { %p1120_p8 = scmp.ne.s32.totalorder %s1567_s11, %s1119_s13  ;;  %s1259_s0 = smov [#allocation11]  }
 0x35b   : > { %s1123_s3 = sshll.u32 %s1259_s0, 4  ;;  %s1124_s3 = int_to_ptr.vmem [resolvable:$false] %s1123_s3 }
 0x35c   : > { %p1121_p9 = pnand %p1120_p8, %p1732_p10  ;;  %s1125_s4 = scalar_lea.vmem %s1124_s3, 256 }
 0x35d   : > { %p1126_p6 = scmp.lt.s32.totalorder %s1567_s11, %s1124_s3  ;;  %p1127_p3 = scmp.lt.s32.totalorder %s1125_s4, %s1119_s13 }
 0x35e   : > { %p1122_p4 = pneg %p1121_p9 }
 0x35f   : > { %p1128_p1 = por %p1127_p3, %p1126_p6 }
 0x361   : > { %p1129_p12 = pnand %p1128_p1, %p1122_p4 }
 0x363   : > { %1132 = shalt.err (!%p1129_p12)
}
 0x364   : > { %s1133_s21 = scalar_lea.hbm %s1600_s30, 128  ;;  %s1137_s0 = scalar_lea.hbm %s1699_s5, 256 }
 0x365   : > { %p1134_p0 = scmp.ne.s32.totalorder %s1600_s30, %s1133_s21  ;;  %p1138_p11 = scmp.lt.u32.totalorder %s1600_s30, %s1699_s5 }
 0x366   : > { %p1139_p13 = scmp.lt.u32.totalorder %s1137_s0, %s1133_s21  ;;  %p1141_p8 = scmp.lt.u32.totalorder %s1133_s21, %s1600_s30 }
 0x367   : > { %p1135_p5 = pnand %p1134_p0, %p1732_p10 }
 0x368   : > { %p1140_p2 = por %p1139_p13, %p1138_p11 }
 0x369   : > { %p1136_p7 = pneg %p1135_p5 }
 0x36a   : > { %p1142_p9 = por %p1141_p8, %p1140_p2 }
 0x36c   : > { %p1143_p4 = pnand %p1142_p9, %p1136_p7 }
 0x36e   : > { %1146 = shalt.err (!%p1143_p4)
}
 0x36f   : > { %840 = dma.vmem_to_hbm [thread:$0]  (%p1732_p10), %s1567_s11, 128, %s1600_s30, %s520_s14, %s1733_s19, %s1733_s19, %s1258_s1   ;;  %v515_v33 = vpop.permute.xlu1 %514 }
 0x370   : > { %s1640_s13 = scalar_lea.hbm %s1701_s7, %s1549_s15  ;;  %794 = vst.msk [vmem:[%s1552_s12 + $0x4] sm:$0xf] %vm487_vm2, %v515_v33  ;;  %s1147_s2 = scalar_lea.vmem %s1634_s8, 128 }
 0x371   : > { %p1148_p6 = scmp.ne.s32.totalorder %s1634_s8, %s1147_s2  ;;  %s1260_s11 = smov [#allocation14]  }
 0x372   : > { %s1151_s30 = sshll.u32 %s1260_s11, 4  ;;  %s1152_s30 = int_to_ptr.vmem [resolvable:$false] %s1151_s30 }
 0x373   : > { %p1149_p3 = pnand %p1148_p6, %p1732_p10  ;;  %s1153_s14 = scalar_lea.vmem %s1152_s30, 256 }
 0x374   : > { %p1154_p12 = scmp.lt.s32.totalorder %s1634_s8, %s1152_s30  ;;  %p1155_p0 = scmp.lt.s32.totalorder %s1153_s14, %s1147_s2 }
 0x375   : > { %p1150_p1 = pneg %p1149_p3 }
 0x376   : > { %p1156_p5 = por %p1155_p0, %p1154_p12 }
 0x378   : > { %p1157_p7 = pnand %p1156_p5, %p1150_p1 }
 0x37a   : > { %1160 = shalt.err (!%p1157_p7)
}
 0x37b   : > { %s1161_s15 = scalar_lea.hbm %s1640_s13, 128  ;;  %s1165_s18 = scalar_lea.hbm %s1701_s7, 256 }
 0x37c   : > { %p1162_p11 = scmp.ne.s32.totalorder %s1640_s13, %s1161_s15  ;;  %p1166_p8 = scmp.lt.u32.totalorder %s1640_s13, %s1701_s7 }
 0x37d   : > { %p1167_p9 = scmp.lt.u32.totalorder %s1165_s18, %s1161_s15  ;;  %p1169_p6 = scmp.lt.u32.totalorder %s1161_s15, %s1640_s13 }
 0x37e   : > { %p1163_p13 = pnand %p1162_p11, %p1732_p10 }
 0x37f   : > { %p1168_p4 = por %p1167_p9, %p1166_p8 }
 0x380   : > { %p1164_p2 = pneg %p1163_p13 }
 0x381   : > { %p1170_p3 = por %p1169_p6, %p1168_p4 }
 0x383   : > { %p1171_p1 = pnand %p1170_p3, %p1164_p2 }
 0x385   : > { %1174 = shalt.err (!%p1171_p1)
}
 0x386   : > { %842 = dma.vmem_to_hbm [thread:$0]  (%p1732_p10), %s1634_s8, 128, %s1640_s13, %s1569_s27, %s1733_s19, %s1733_s19, %s1258_s1  }
 0x387 PF: > { %s593_s10 = sand.u32 1, %s1221_s24   ;;  %p1734_p12 = scmp.ne.s32.totalorder %s1724_s9, 0 }
 0x388   : > { %p1735_p0 = scmp.ge.s32.totalorder %s1241_s29, 2  ;;  %s594_s3 = scalar_lea.sflag [#allocation4], %s593_s10 }
 0x38a   : > { %p864_p5 = pnand %p1735_p0, %p1734_p12 }
 0x38c   : > { %1212 = dma.done.wait (!%p864_p5), %s594_s3, 128  }
 0x38d   : > { %1214 = vsyncadd (!%p864_p5), %s594_s3, 4294967168  ;;  %s1736_s22 = sadd.s32 4294967294, %s1241_s29  }
 0x38e   : > { %s602_s4 = sand.u32 1, %s1736_s22  }
 0x38f   : > { %s603_s16 = scalar_lea.sflag [#allocation13], %s602_s4 }
 0x390   : > { %1216 = dma.done.wait (!%p864_p5), %s603_s16, 256  }
 0x391   : > { %1218 = vsyncadd (!%p864_p5), %s603_s16, 4294967040  ;;  %s29_s29 = sadd.s32 1, %s1241_s29   ;;  %s1737_s24 = smov %s1225_s25 }
 0x392   : > { %p26_p10 = scmp.ge.s32.totalorder %s29_s29, 4   ;;  %s1738_s25 = smov %s1229_s26 }
 0x393   : > { %s1739_s26 = smov %s1468_s23  ;;  %s1740_s27 = smov %s1237_s28 }
 0x394   : > { %s1741_s28 = smov %s1743_s17  ;;  %28 = sbr.rel (!%p26_p10) target bundleno = 16 (0x10), region = 136 }
 0x39b   :  { %617 = vsyncpa [#allocation3], 1 }
 0x39c   :  { %619 = vsyncpa [#allocation3 + $0x1], 1 }
 0x39d   :  { %620 = vsyncpa [#allocation6], 1 }
 0x39e   :  { %621 = vsyncpa [#allocation9], 1 }
 0x39f   :  { %622 = vsyncpa [#allocation4], 1 }
 0x3a0   :  { %624 = vsyncpa [#allocation4 + $0x1], 1 }
 0x3a1   :  { %625 = vsyncpa [#allocation13], 1 }
 0x3a2   :  { %627 = vsyncpa [#allocation13 + $0x1], 1 }

// kernel: gpt_forward.10
= control target key start
LH: loop header
LB: loop body
LE: loop exit
PB: predicated region body
PF: predicated region fallthrough
CT: control target
= control target key end

     0   :  { %s2269_s0 = inlined_call_operand.hbm [shape: f32[2,8,32], index: 0, kind: input, shape index: {}]   ;;  %s2270_s1 = inlined_call_operand.hbm [shape: bf16[2,8,32], index: 1, kind: input, shape index: {}]   ;;  %s2271_s2 = inlined_call_operand.hbm [shape: bf16[32,32], index: 2, kind: input, shape index: {}]   ;;  %s2272_s3 = inlined_call_operand.hbm [shape: f32[1,32], index: 3, kind: input, shape index: {}]   ;;  %s2273_s4 = inlined_call_operand.hbm [shape: f32[1,32], index: 4, kind: input, shape index: {}]   ;;  %s2274_s5 = inlined_call_operand.hbm [shape: f32[1,32], index: 5, kind: input, shape index: {}]   ;;  %s2275_s6 = inlined_call_operand.hbm [shape: bf16[32,128], index: 6, kind: input, shape index: {}]   ;;  %s2276_s7 = inlined_call_operand.hbm [shape: f32[1,128], index: 7, kind: input, shape index: {}]   ;;  %s2277_s8 = inlined_call_operand.hbm [shape: bf16[128,32], index: 8, kind: input, shape index: {}]   ;;  %s2278_s9 = inlined_call_operand.hbm [shape: f32[1,32], index: 9, kind: input, shape index: {}]   ;;  %s2279_s10 = inlined_call_operand.hbm [shape: f32[2,8,32], index: 10, kind: output, shape index: {}]  }
   0x1   :  { %2289 = sst [smem:[#allocation33_spill]] %s2269_s0 }
   0x2   :  { %2290 = sst [smem:[#allocation34_spill]] %s2270_s1 }
   0x3   :  { %2291 = sst [smem:[#allocation35_spill]] %s2271_s2 }
   0x4   :  { %2292 = sst [smem:[#allocation36_spill]] %s2272_s3 }
   0x5   :  { %2293 = sst [smem:[#allocation37_spill]] %s2273_s4 }
   0x6   :  { %2294 = sst [smem:[#allocation38_spill]] %s2274_s5 }
   0x7   :  { %2295 = sst [smem:[#allocation39_spill]] %s2279_s10 }
   0x8   :  { %15 = vsyncpa [#allocation6], 0 }
   0x9   :  { %17 = vsyncpa [#allocation6 + $0x1], 0 }
   0xa   :  { %18 = vsyncpa [#allocation9], 0 }
   0xb   :  { %20 = vsyncpa [#allocation9 + $0x1], 0 }
   0xc   :  { %21 = vsyncpa [#allocation12], 0 }
   0xd   :  { %22 = vsyncpa [#allocation15], 0 }
   0xe   :  { %23 = vsyncpa [#allocation18], 0 }
   0xf   :  { %24 = vsyncpa [#allocation21], 0 }
  0x10   :  { %25 = vsyncpa [#allocation7], 0 }
  0x11   :  { %27 = vsyncpa [#allocation7 + $0x1], 0  ;;  %s1814_s13 = smov 0   ;;  %s1816_s14 = smov 0  }
  0x12   :  { %s1818_s15 = smov 0   ;;  %s1820_s16 = smov 0  }
  0x13   :  { %s1822_s17 = smov 0   ;;  %s1824_s18 = smov 0  }
  0x14 LB: > { %2296 = sst [smem:[#allocation31_spill]] %s1734_s16  ;;  %s1845_s19 = sadd.s32 4294967295, %s1742_s18   ;;  %s1742_s18 = sphi %s1824_s18, %s33_s18   ;;  %s1738_s17 = sphi %s1822_s17, %s2338_s17   ;;  %s1734_s16 = sphi %s1820_s16, %s2337_s16   ;;  %s1730_s15 = sphi %s1818_s15, %s2336_s15   ;;  %s1726_s14 = sphi %s1816_s14, %s2335_s14   ;;  %s1722_s13 = sphi %s1814_s13, %s2334_s13  }
  0x15   : > { %p1084_p0 = scmp.ge.s32.totalorder %s1742_s18, 1  ;;  %p2283_p1 = scmp.eq.s32.totalorder %s1845_s19, 0 }
  0x16   : > { %p324_p2 = scmp.lt.s32.totalorder %s1742_s18, 3  ;;  %s1744_s21 = smov [#allocation10]  }
  0x17   : > { %s336_s22 = sshll.u32 %s1744_s21, 4  ;;  %s1745_s24 = smov [#allocation11]   ;;  %s1854_s22 = int_to_ptr.vmem [resolvable:$true] %s336_s22 }
  0x18   : > { %p1850_p3 = pnand %p1084_p0, %p324_p2  ;;  %s350_s25 = sshll.u32 %s1745_s24, 4  ;;  %s1865_s25 = int_to_ptr.vmem [resolvable:$true] %s350_s25 }
  0x19   : > { %s1746_s26 = smov [#allocation14]   ;;  %s2300_s2 = sld [smem:[#allocation35_spill]] }
  0x1a   : > { %s2297_s20 = scalar_select %p1850_p3, 1, 0 }
  0x1b   : > { %p1222_p4 = pneg %p1850_p3  ;;  %s1867_s27 = sshll.u32 %s1746_s26, 4  ;;  %s373_s27 = int_to_ptr.vmem [resolvable:$true] %s1867_s27 }
  0x1c   : > { %2298 = sst [smem:[#allocation32_spill]] %s2297_s20 }
  0x1d   : > { %p1861_p6 = pnand %p1222_p4, %p2283_p1 }
  0x1f   : > { %s1352_s30 = scalar_lea.hbm %s2300_s2, 256  ;;  %p1877_p8 = pneg %p1861_p6 }
  0x20   : > { %p1353_p7 = scmp.ne.s32.totalorder %s2300_s2, %s1352_s30  ;;  %p1359_p11 = scmp.lt.u32.totalorder %s1352_s30, %s2300_s2 }
  0x22   : > { %p1355_p9 = pnand %p1877_p8, %p1353_p7 }
  0x24   : > { %p1356_p10 = pneg %p1355_p9 }
  0x26   : > { %p1361_p12 = pnand %p1359_p11, %p1356_p10 }
  0x28   : > { %1364 = shalt.err (!%p1361_p12)
}
  0x29   : > { %s1365_s28 = scalar_lea.vmem %s1854_s22, 256  ;;  %p1373_p4 = scmp.lt.s32.totalorder %s1854_s22, %s1854_s22 }
  0x2a   : > { %p1366_p13 = scmp.ne.s32.totalorder %s1854_s22, %s1365_s28  ;;  %p1374_p5 = scmp.lt.s32.totalorder %s1365_s28, %s1365_s28 }
  0x2c   : > { %p1368_p0 = pnand %p1366_p13, %p1877_p8  ;;  %p1375_p7 = por %p1374_p5, %p1373_p4 }
  0x2e   : > { %p1369_p2 = pneg %p1368_p0 }
  0x30   : > { %p1376_p9 = pnand %p1375_p7, %p1369_p2 }
  0x32   : > { %1379 = shalt.err (!%p1376_p9)
}
  0x33   : > { %s2285_s29 = smov 64   ;;  %s1748_s30 = smov 4  }
  0x34   : > { %1225 = dma.hbm_to_vmem [thread:$0]  (!%p1861_p6), %s2300_s2, 256, %s1854_s22, [#allocation9], %s2285_s29, %s2285_s29, %s1748_s30  }
  0x35   : > { %s2302_s3 = sld [smem:[#allocation36_spill]] }
  0x3b   : > { %s1380_s28 = scalar_lea.hbm %s2302_s3, 16 }
  0x3c   : > { %p1381_p5 = scmp.ne.s32.totalorder %s2302_s3, %s1380_s28  ;;  %p1387_p12 = scmp.lt.u32.totalorder %s1380_s28, %s2302_s3 }
  0x3e   : > { %p1383_p10 = pnand %p1381_p5, %p1877_p8 }
  0x40   : > { %p1384_p11 = pneg %p1383_p10 }
  0x42   : > { %p1389_p13 = pnand %p1387_p12, %p1384_p11 }
  0x44   : > { %1392 = shalt.err (!%p1389_p13)
}
  0x45   : > { %s1393_s22 = scalar_lea.vmem %s1865_s25, 16  ;;  %s1400_s10 = scalar_lea.vmem %s1865_s25, 32 }
  0x46   : > { %p1394_p0 = scmp.ne.s32.totalorder %s1865_s25, %s1393_s22  ;;  %p1401_p7 = scmp.lt.s32.totalorder %s1865_s25, %s1865_s25 }
  0x47   : > { %p1402_p9 = scmp.lt.s32.totalorder %s1400_s10, %s1393_s22 }
  0x48   : > { %p1396_p2 = pnand %p1394_p0, %p1877_p8 }
  0x49   : > { %p1403_p5 = por %p1402_p9, %p1401_p7 }
  0x4a   : > { %p1397_p4 = pneg %p1396_p2 }
  0x4c   : > { %p1404_p10 = pnand %p1403_p5, %p1397_p4 }
  0x4e   : > { %1407 = shalt.err (!%p1404_p10)
}
  0x4f   : > { %1228 = dma.hbm_to_vmem [thread:$0]  (!%p1861_p6), %s2302_s3, 16, %s1865_s25, [#allocation12]  }
  0x50   : > { %s2303_s5 = sld [smem:[#allocation38_spill]] }
  0x56   : > { %s1408_s12 = scalar_lea.hbm %s2303_s5, 16 }
  0x57   : > { %p1409_p11 = scmp.ne.s32.totalorder %s2303_s5, %s1408_s12  ;;  %p1415_p0 = scmp.lt.u32.totalorder %s1408_s12, %s2303_s5 }
  0x59   : > { %p1411_p12 = pnand %p1409_p11, %p1877_p8 }
  0x5b   : > { %p1412_p13 = pneg %p1411_p12 }
  0x5d   : > { %p1417_p2 = pnand %p1415_p0, %p1412_p13 }
  0x5f   : > { %1420 = shalt.err (!%p1417_p2)
}
  0x60   : > { %s1421_s10 = scalar_lea.vmem %s373_s27, 16  ;;  %s1428_s25 = scalar_lea.vmem %s373_s27, 32 }
  0x61   : > { %p1422_p4 = scmp.ne.s32.totalorder %s373_s27, %s1421_s10  ;;  %p1429_p5 = scmp.lt.s32.totalorder %s373_s27, %s373_s27 }
  0x62   : > { %p1430_p10 = scmp.lt.s32.totalorder %s1428_s25, %s1421_s10 }
  0x63   : > { %p1424_p7 = pnand %p1422_p4, %p1877_p8 }
  0x64   : > { %p1431_p1 = por %p1430_p10, %p1429_p5 }
  0x65   : > { %p1425_p9 = pneg %p1424_p7 }
  0x67   : > { %p1432_p3 = pnand %p1431_p1, %p1425_p9 }
  0x69   : > { %1435 = shalt.err (!%p1432_p3)
}
  0x6a   : > { %1234 = dma.hbm_to_vmem [thread:$0]  (!%p1861_p6), %s2303_s5, 16, %s373_s27, [#allocation15]  }
  0x6b   : > { %s1749_s20 = smov [#allocation17]   ;;  %s1750_s12 = smov [#allocation13]  }
  0x6c   : > { %s400_s11 = sshll.u32 %s1749_s20, 4  ;;  %s361_s24 = sshll.u32 %s1750_s12, 4  ;;  %s401_s11 = int_to_ptr.vmem [resolvable:$true] %s400_s11  ;;  %s362_s24 = int_to_ptr.vmem [resolvable:$true] %s361_s24 }
  0x6d   : > { %s1436_s22 = scalar_lea.hbm %s2276_s7, 16 }
  0x6e   : > { %p1437_p1 = scmp.ne.s32.totalorder %s2276_s7, %s1436_s22  ;;  %p1443_p12 = scmp.lt.u32.totalorder %s1436_s22, %s2276_s7 }
  0x70   : > { %p1439_p3 = pnand %p1437_p1, %p1877_p8 }
  0x72   : > { %p1440_p11 = pneg %p1439_p3 }
  0x74   : > { %p1445_p13 = pnand %p1443_p12, %p1440_p11 }
  0x76   : > { %1448 = shalt.err (!%p1445_p13)
}
  0x77   : > { %s1449_s27 = scalar_lea.vmem %s401_s11, 16  ;;  %s1456_s16 = scalar_lea.vmem %s401_s11, 32 }
  0x78   : > { %p1450_p0 = scmp.ne.s32.totalorder %s401_s11, %s1449_s27  ;;  %p1457_p7 = scmp.lt.s32.totalorder %s401_s11, %s401_s11 }
  0x79   : > { %p1458_p9 = scmp.lt.s32.totalorder %s1456_s16, %s1449_s27 }
  0x7a   : > { %p1452_p2 = pnand %p1450_p0, %p1877_p8 }
  0x7b   : > { %p1459_p5 = por %p1458_p9, %p1457_p7 }
  0x7c   : > { %p1453_p4 = pneg %p1452_p2 }
  0x7e   : > { %p1460_p10 = pnand %p1459_p5, %p1453_p4 }
  0x80   : > { %1463 = shalt.err (!%p1460_p10)
}
  0x81   : > { %1240 = dma.hbm_to_vmem [thread:$0]  (!%p1861_p6), %s2276_s7, 16, %s401_s11, [#allocation18]  }
  0x82   : > { %s2304_s4 = sld [smem:[#allocation37_spill]] }
  0x88   : > { %s1464_s28 = scalar_lea.hbm %s2304_s4, 16 }
  0x89   : > { %p1465_p1 = scmp.ne.s32.totalorder %s2304_s4, %s1464_s28  ;;  %p1471_p12 = scmp.lt.u32.totalorder %s1464_s28, %s2304_s4 }
  0x8b   : > { %p1467_p3 = pnand %p1465_p1, %p1877_p8 }
  0x8d   : > { %p1468_p11 = pneg %p1467_p3 }
  0x8f   : > { %p1473_p13 = pnand %p1471_p12, %p1468_p11 }
  0x91   : > { %1476 = shalt.err (!%p1473_p13)
}
  0x92   : > { %s1477_s27 = scalar_lea.vmem %s362_s24, 16  ;;  %s1484_s11 = scalar_lea.vmem %s362_s24, 32 }
  0x93   : > { %p1478_p0 = scmp.ne.s32.totalorder %s362_s24, %s1477_s27  ;;  %p1485_p7 = scmp.lt.s32.totalorder %s362_s24, %s362_s24 }
  0x94   : > { %p1486_p9 = scmp.lt.s32.totalorder %s1484_s11, %s1477_s27 }
  0x95   : > { %p1480_p2 = pnand %p1478_p0, %p1877_p8 }
  0x96   : > { %p1487_p5 = por %p1486_p9, %p1485_p7 }
  0x97   : > { %p1481_p4 = pneg %p1480_p2 }
  0x99   : > { %p1488_p10 = pnand %p1487_p5, %p1481_p4 }
  0x9b   : > { %1491 = shalt.err (!%p1488_p10)
}
  0x9c   : > { %1231 = dma.hbm_to_vmem [thread:$0]  (!%p1861_p6), %s2304_s4, 16, %s362_s24, [#allocation12]  }
  0x9d   : > { %s1751_s12 = smov [#allocation16]   ;;  %s1752_s26 = smov [#allocation19]  }
  0x9e   : > { %s384_s29 = sshll.u32 %s1751_s12, 4  ;;  %s413_s28 = sshll.u32 %s1752_s26, 4  ;;  %s385_s29 = int_to_ptr.vmem [resolvable:$true] %s384_s29  ;;  %s414_s28 = int_to_ptr.vmem [resolvable:$true] %s413_s28 }
  0x9f   : > { %s1492_s25 = scalar_lea.hbm %s2275_s6, 256 }
  0xa0   : > { %p1493_p1 = scmp.ne.s32.totalorder %s2275_s6, %s1492_s25  ;;  %p1499_p12 = scmp.lt.u32.totalorder %s1492_s25, %s2275_s6 }
  0xa2   : > { %p1495_p3 = pnand %p1493_p1, %p1877_p8 }
  0xa4   : > { %p1496_p11 = pneg %p1495_p3 }
  0xa6   : > { %p1501_p13 = pnand %p1499_p12, %p1496_p11 }
  0xa8   : > { %1504 = shalt.err (!%p1501_p13)
}
  0xa9   : > { %s1505_s24 = scalar_lea.vmem %s385_s29, 256  ;;  %p1513_p7 = scmp.lt.s32.totalorder %s385_s29, %s385_s29 }
  0xaa   : > { %p1506_p0 = scmp.ne.s32.totalorder %s385_s29, %s1505_s24  ;;  %p1514_p9 = scmp.lt.s32.totalorder %s1505_s24, %s1505_s24 }
  0xac   : > { %p1508_p2 = pnand %p1506_p0, %p1877_p8  ;;  %p1515_p5 = por %p1514_p9, %p1513_p7 }
  0xae   : > { %p1509_p4 = pneg %p1508_p2 }
  0xb0   : > { %p1516_p10 = pnand %p1515_p5, %p1509_p4 }
  0xb2   : > { %1519 = shalt.err (!%p1516_p10)
}
  0xb3   : > { %s2305_s20 = smov 64   ;;  %s1520_s25 = scalar_lea.hbm %s2277_s8, 1024 }
  0xb4   : > { %1237 = dma.hbm_to_vmem [thread:$0]  (!%p1861_p6), %s2275_s6, 256, %s385_s29, [#allocation15], %s2305_s20, %s2305_s20, %s1748_s30  }
  0xb5   : > { %p1521_p1 = scmp.ne.s32.totalorder %s2277_s8, %s1520_s25  ;;  %p1527_p12 = scmp.lt.u32.totalorder %s1520_s25, %s2277_s8 }
  0xb7   : > { %p1523_p3 = pnand %p1521_p1, %p1877_p8 }
  0xb9   : > { %p1524_p11 = pneg %p1523_p3 }
  0xbb   : > { %p1529_p13 = pnand %p1527_p12, %p1524_p11 }
  0xbd   : > { %1532 = shalt.err (!%p1529_p13)
}
  0xbe   : > { %s1533_s24 = scalar_lea.vmem %s414_s28, 1024  ;;  %p1541_p7 = scmp.lt.s32.totalorder %s414_s28, %s414_s28 }
  0xbf   : > { %p1534_p0 = scmp.ne.s32.totalorder %s414_s28, %s1533_s24  ;;  %p1542_p9 = scmp.lt.s32.totalorder %s1533_s24, %s1533_s24 }
  0xc1   : > { %p1536_p2 = pnand %p1534_p0, %p1877_p8  ;;  %p1543_p5 = por %p1542_p9, %p1541_p7 }
  0xc3   : > { %p1537_p4 = pneg %p1536_p2 }
  0xc5   : > { %p1544_p10 = pnand %p1543_p5, %p1537_p4 }
  0xc7   : > { %1547 = shalt.err (!%p1544_p10)
}
  0xc8   : > { %1243 = dma.hbm_to_vmem [thread:$0]  (!%p1861_p6), %s2277_s8, 1024, %s414_s28, [#allocation18], %s2305_s20, %s2305_s20, %s1748_s30  }
  0xc9   : > { %s1753_s26 = smov [#allocation20]   ;;  %s1548_s1 = scalar_lea.hbm %s2278_s9, 16 }
  0xca   : > { %s427_s22 = sshll.u32 %s1753_s26, 4  ;;  %p1549_p1 = scmp.ne.s32.totalorder %s2278_s9, %s1548_s1  ;;  %s428_s22 = int_to_ptr.vmem [resolvable:$true] %s427_s22 }
  0xcb   : > { %p1555_p12 = scmp.lt.u32.totalorder %s1548_s1, %s2278_s9 }
  0xcc   : > { %p1551_p3 = pnand %p1549_p1, %p1877_p8 }
  0xce   : > { %p1552_p11 = pneg %p1551_p3 }
  0xd0   : > { %p1557_p13 = pnand %p1555_p12, %p1552_p11 }
  0xd2   : > { %1560 = shalt.err (!%p1557_p13)
}
  0xd3   : > { %s1561_s30 = scalar_lea.vmem %s428_s22, 16  ;;  %s1568_s28 = scalar_lea.vmem %s428_s22, 32 }
  0xd4   : > { %p1562_p0 = scmp.ne.s32.totalorder %s428_s22, %s1561_s30  ;;  %p1569_p7 = scmp.lt.s32.totalorder %s428_s22, %s428_s22 }
  0xd5   : > { %p1570_p9 = scmp.lt.s32.totalorder %s1568_s28, %s1561_s30 }
  0xd6   : > { %p1564_p2 = pnand %p1562_p0, %p1877_p8 }
  0xd7   : > { %p1571_p5 = por %p1570_p9, %p1569_p7 }
  0xd8   : > { %p1565_p4 = pneg %p1564_p2 }
  0xda   : > { %p1572_p10 = pnand %p1571_p5, %p1565_p4 }
  0xdc   : > { %1575 = shalt.err (!%p1572_p10)
}
  0xdd   : > { %1246 = dma.hbm_to_vmem [thread:$0]  (!%p1861_p6), %s2278_s9, 16, %s428_s22, [#allocation21]  }
  0xde   : > { %s1083_s21 = sadd.s32 4294967294, %s1742_s18   ;;  %s52_s12 = sadd.s32 1, %s1738_s17 }
  0xdf   : > { %p54_p8 = scmp.ge.s32.totalorder %s52_s12, 2  ;;  %s61_s23 = sadd.s32 1, %s1730_s15 }
  0xe0   : > { %p68_p1 = scmp.ne.s32.totalorder %s1730_s15, %s1726_s14  ;;  %p69_p3 = scmp.eq.s32.totalorder %s1742_s18, 0 }
  0xe1   : > { %s2340_s12 = smov (%p54_p8, %s52_s12), 0  ;;  %p74_p12 = scmp.ne.s32.totalorder %s1726_s14, %s1722_s13 }
  0xe2   : > { %p2048_p11 = por %p69_p3, %p68_p1  ;;  %s56_s22 = ssub.s32 %s1738_s17, %s2340_s12 }
  0xe3   : > { %p311_p6 = scmp.eq.s32.totalorder %s1845_s19, 1  ;;  %p59_p13 = scmp.eq.s32.totalorder %s56_s22, 0 }
  0xe4   : > { %p2307_p0 = scmp.eq.s32.totalorder %s1845_s19, 0  ;;  %p317_p7 = scmp.eq.s32.totalorder %s1083_s21, 1 }
  0xe5   : > { %p2063_p4 = por %p311_p6, %p68_p1  ;;  %p1266_p5 = scmp.lt.s32.totalorder %s1742_s18, 2 }
  0xe6   : > { %p2059_p2 = por %p2307_p0, %p74_p12  ;;  %p2070_p9 = por %p317_p7, %p74_p12 }
  0xe7   : > { %s2309_s25 = scalar_select %p2063_p4, 1, 0 }
  0xe8   : > { %s2308_s10 = scalar_select %p2059_p2, 1, 0 }
  0xe9   : > { %s2068_s1 = scalar_select %p59_p13, %s1730_s15, %s61_s23  }
  0xea   : > { %s2310_s27 = scalar_select %p2070_p9, 1, 0 }
  0xeb   : > { %s2076_s11 = sand.u32 1, %s1730_s15   ;;  %s1095_s16 = sshll.u32 %s1738_s17, 7 }
  0xec   : > { %s1094_s24 = sshll.u32 %s2076_s11, 3  ;;  %s2311_s0 = sld [smem:[#allocation33_spill]] }
  0xed   : > { %s442_s29 = scalar_lea.vmem [#allocation5], %s1094_s24  ;;  %p2087_p10 = pnand %p1266_p5, %p2048_p11 }
  0xee   : > { %s450_s21 = sshll.u32 %s442_s29, 4  ;;  %s439_s2 = scalar_lea.sflag [#allocation6], %s2076_s11  ;;  %s2091_s21 = int_to_ptr.vmem [resolvable:$true] %s450_s21 }
  0xef   : > { %p1578_p1 = pneg %p2087_p10 }
  0xf2   : > { %s2083_s20 = scalar_lea.hbm %s2311_s0, %s1095_s16  ;;  %s1581_s24 = scalar_lea.hbm %s2311_s0, 256 }
  0xf3   : > { %s1576_s30 = scalar_lea.hbm %s2083_s20, 128  ;;  %p1582_p11 = scmp.lt.u32.totalorder %s2083_s20, %s2311_s0 }
  0xf4   : > { %p1577_p8 = scmp.ne.s32.totalorder %s2083_s20, %s1576_s30  ;;  %p1583_p6 = scmp.lt.u32.totalorder %s1581_s24, %s1576_s30 }
  0xf5   : > { %p1585_p0 = scmp.lt.u32.totalorder %s1576_s30, %s2083_s20 }
  0xf6   : > { %p1579_p3 = pnand %p1578_p1, %p1577_p8  ;;  %p1584_p13 = por %p1583_p6, %p1582_p11 }
  0xf8   : > { %p1580_p12 = pneg %p1579_p3  ;;  %p1586_p7 = por %p1585_p0, %p1584_p13 }
  0xfa   : > { %p1587_p5 = pnand %p1586_p7, %p1580_p12 }
  0xfc   : > { %1590 = shalt.err (!%p1587_p5)
}
  0xfd   : > { %s1591_s22 = scalar_lea.vmem %s2091_s21, 128  ;;  %s1754_s16 = smov [#allocation5]  }
  0xfe   : > { %p1592_p8 = scmp.ne.s32.totalorder %s2091_s21, %s1591_s22  ;;  %s1596_s26 = sshll.u32 %s1754_s16, 4  ;;  %s1597_s26 = int_to_ptr.vmem [resolvable:$false] %s1596_s26 }
  0xff   : > { %s1598_s28 = scalar_lea.vmem %s1597_s26, 256  ;;  %p1599_p4 = scmp.lt.s32.totalorder %s2091_s21, %s1597_s26 }
 0x100   : > { %p1594_p3 = pnand %p1592_p8, %p1578_p1  ;;  %p1600_p11 = scmp.lt.s32.totalorder %s1598_s28, %s1591_s22 }
 0x102   : > { %p1595_p9 = pneg %p1594_p3  ;;  %p1601_p6 = por %p1600_p11, %p1599_p4 }
 0x104   : > { %p1602_p13 = pnand %p1601_p6, %p1595_p9 }
 0x106   : > { %1605 = shalt.err (!%p1602_p13)
}
 0x107   : > { %1250 = dma.hbm_to_vmem [thread:$0]  (!%p2087_p10), %s2083_s20, 128, %s2091_s21, %s439_s2  }
 0x108   : > { %s1096_s30 = sshll.u32 %s2076_s11, 2  ;;  %s1097_s24 = sshll.u32 %s1738_s17, 6 }
 0x109   : > { %s2313_s0 = sld [smem:[#allocation34_spill]]  ;;  %s461_s22 = scalar_lea.vmem [#allocation8], %s1096_s30 }
 0x10a   : > { %s469_s26 = sshll.u32 %s461_s22, 4  ;;  %s2314_s28 = sand.u32 1, %s1742_s18   ;;  %s470_s26 = int_to_ptr.vmem [resolvable:$true] %s469_s26 }
 0x10b   : > { %s458_s4 = scalar_lea.sflag [#allocation9], %s2314_s28 }
 0x10f   : > { %s2125_s3 = scalar_lea.hbm %s2313_s0, %s1097_s24  ;;  %s1611_s20 = scalar_lea.hbm %s2313_s0, 128 }
 0x110   : > { %s1606_s5 = scalar_lea.hbm %s2125_s3, 64  ;;  %p1612_p0 = scmp.lt.u32.totalorder %s2125_s3, %s2313_s0 }
 0x111   : > { %p1607_p4 = scmp.ne.s32.totalorder %s2125_s3, %s1606_s5  ;;  %p1613_p7 = scmp.lt.u32.totalorder %s1611_s20, %s1606_s5 }
 0x112   : > { %p1615_p8 = scmp.lt.u32.totalorder %s1606_s5, %s2125_s3 }
 0x113   : > { %p1609_p9 = pnand %p1607_p4, %p1578_p1  ;;  %p1614_p5 = por %p1613_p7, %p1612_p0 }
 0x115   : > { %p1610_p12 = pneg %p1609_p9  ;;  %p1616_p3 = por %p1615_p8, %p1614_p5 }
 0x117   : > { %p1617_p11 = pnand %p1616_p3, %p1610_p12 }
 0x119   : > { %1620 = shalt.err (!%p1617_p11)
}
 0x11a   : > { %s1621_s30 = scalar_lea.vmem %s470_s26, 64  ;;  %s1755_s29 = smov [#allocation8]  }
 0x11b   : > { %p1622_p6 = scmp.ne.s32.totalorder %s470_s26, %s1621_s30  ;;  %s1626_s16 = sshll.u32 %s1755_s29, 4  ;;  %s1627_s16 = int_to_ptr.vmem [resolvable:$false] %s1626_s16 }
 0x11c   : > { %s1628_s22 = scalar_lea.vmem %s1627_s16, 128  ;;  %p1629_p9 = scmp.lt.s32.totalorder %s470_s26, %s1627_s16 }
 0x11d   : > { %p1624_p13 = pnand %p1622_p6, %p1578_p1  ;;  %p1630_p2 = scmp.lt.s32.totalorder %s1628_s22, %s1621_s30 }
 0x11f   : > { %p1625_p4 = pneg %p1624_p13  ;;  %p1631_p0 = por %p1630_p2, %p1629_p9 }
 0x121   : > { %p1632_p7 = pnand %p1631_p0, %p1625_p4 }
 0x123   : > { %1635 = shalt.err (!%p1632_p7)
}
 0x124   : > { %1253 = dma.hbm_to_vmem [thread:$0]  (!%p2087_p10), %s2125_s3, 64, %s470_s26, %s458_s4  }
 0x125   : > { %s2315_s5 = sld [smem:[#allocation32_spill]] }
 0x12b   : > { %p2316_p12 = scmp.ne.s32.totalorder %s2315_s5, 0 }
 0x12c   : > { %s2151_s28 = sand.u32 (!%p2316_p12), 1, %s1726_s14   ;;  %p2317_p2 = scmp.ne.s32.totalorder (!%p2316_p12), %s2308_s10, 0 }
 0x12d   : > { %478 = sbr.rel (%p2316_p12) target bundleno = 1358 (0x54e), region = 60  ;;  %s1099_s2 = sshll.u32 (!%p2316_p12), %s2151_s28, 3 }
 0x12e   : > { %s481_s11 = scalar_lea.sflag (!%p2316_p12), [#allocation6], %s2151_s28  ;;  %s2157_s20 = scalar_lea.vmem (!%p2316_p12), [#allocation5], %s1099_s2 }
 0x134   : > { %1689 = dma.done.wait (%p2317_p2), %s481_s11, 128  }
 0x135   : > { %1691 = vsyncadd (%p2317_p2), %s481_s11, 4294967168  ;;  %s489_s3 = sand.u32 1, %s1845_s19   ;;  %s1100_s4 = sshll.u32 %s2151_s28, 2 }
 0x136   : > { %s490_s23 = scalar_lea.sflag [#allocation9], %s489_s3  ;;  %s493_s26 = scalar_lea.vmem [#allocation8], %s1100_s4 }
 0x137   : > { %1693 = dma.done.wait (%p2317_p2), %s490_s23, 64  }
 0x138   : > { %1695 = vsyncadd (%p2317_p2), %s490_s23, 4294967232  ;;  %p2318_p10 = scmp.eq.s32.totalorder %s1845_s19, 0 }
 0x13a   : > { %1697 = dma.done.wait (%p2318_p10), [#allocation9], 256   ;;  %p2319_p1 = pmov %p2318_p10 }
 0x13c   : > { %1699 = vsyncadd (%p2319_p1), [#allocation9], 4294967040  ;;  %p2320_p5 = pmov %p2319_p1 }
 0x13d   : > { %p2321_p8 = pmov %p2319_p1 }
 0x13e   : > { %1701 = dma.done.wait (%p2320_p5), [#allocation12], 32  }
 0x13f   : > { %1703 = vsyncadd (%p2321_p8), [#allocation12], 4294967264  ;;  %p2322_p3 = pmov %p2319_p1 }
 0x140   : > { %p2323_p11 = pmov %p2319_p1 }
 0x141   : > { %1705 = dma.done.wait (%p2322_p3), [#allocation15], 272  }
 0x142   : > { %1707 = vsyncadd (%p2323_p11), [#allocation15], 4294967024  ;;  %p2324_p6 = pmov %p2319_p1 }
 0x143   : > { %p2325_p13 = pmov %p2319_p1 }
 0x144   : > { %1709 = dma.done.wait (%p2324_p6), [#allocation18], 1040  }
 0x145   : > { %1711 = vsyncadd (%p2325_p13), [#allocation18], 4294966256  ;;  %p2326_p4 = pmov %p2319_p1 }
 0x146   : > { %p2327_p9 = pmov %p2319_p1 }
 0x147   : > { %1713 = dma.done.wait (%p2326_p4), [#allocation21], 16  }
 0x148   : > { %1715 = vsyncadd (%p2327_p9), [#allocation21], 4294967280  ;;  %vm598_vm0 = vcmask 261120   ;;  %v1756_v0 = vmov 0.0   ;;  %vm1757_vm1 = vmmov 0   ;;  %v1336_v1 = vld [vmem:[#allocation10] sm:$0xff]  }
 0x149   : > { %1148 = vmatprep.subr.bf16.mxu1 %v1756_v0  ;;  %1152 = vmatprep.mubr.msk.bf16.mxu1 %vm1757_vm1, %v1756_v0  ;;  %677 = vst.msk [vmem:[#allocation4] sm:$0xff] %vm598_vm0, %v1756_v0  ;;  %v1337_v2 = vld [vmem:[#allocation10 + $0x8] sm:$0xff]   ;;  %v574_v3 = vld [vmem:[%s493_s26] sm:$0xf]  ;;  %v1110_v4 = vld [vmem:[#allocation11] ss:$0 sm:$0xff] }
 0x14a   : > { %1164 = vmatprep.subr.bf16.mxu0 %v1756_v0  ;;  %1180 = vmatprep.mubr.msk.bf16.mxu0 %vm1757_vm1, %v1756_v0  ;;  %v573_v5 = vld [vmem:[%s2157_s20] sm:$0xff]  ;;  %v1339_v19 = vld [vmem:[#allocation16 + $0x8] sm:$0xff]   ;;  %vm675_vm2 = vcmask 257024   ;;  %v1116_v39 = vld [vmem:[#allocation17] ss:$0 sm:$0xff]  ;;  %s2328_s19 = sld [smem:[#allocation31_spill]] }
 0x14b   : > { %1149 = vmatpush3.bf16.msra.mxu1 %v1336_v1  ;;  %v1338_v18 = vld [vmem:[#allocation16] sm:$0xff]   ;;  %v1340_v20 = vld [vmem:[#allocation19] sm:$0xff]   ;;  %v1114_v25 = vld [vmem:[#allocation13] ss:$0 sm:$0xff]  ;;  %s566_s21 = scalar_lea.vmem [#allocation22], %s1099_s2  ;;  %s2329_s16 = sld [smem:[#allocation39_spill]] }
 0x14c   : > { %1150 = vmatprep.subr.bf16.mxu1 %v1756_v0  ;;  %1165 = vmatpush3.bf16.msra.mxu0 %v1340_v20  ;;  %v1115_v27 = vld [vmem:[#allocation14] ss:$0 sm:$0xff]  ;;  %v1342_v33 = vld [vmem:[#allocation19 + $0x10] sm:$0xff]   ;;  %v1343_v34 = vld [vmem:[#allocation19 + $0x18] sm:$0xff]   ;;  %s893_s24 = sshll.u32 %s566_s21, 4  ;;  %s879_s11 = scalar_lea.sflag [#allocation7], %s2151_s28  ;;  %s2221_s24 = int_to_ptr.vmem [resolvable:$true] %s893_s24 }
 0x14d   : > { %1166 = vmatprep.subr.bf16.mxu0 %v1756_v0  ;;  %v1341_v32 = vld [vmem:[#allocation19 + $0x8] sm:$0xff]   ;;  %v1344_v35 = vld [vmem:[#allocation19 + $0x20] sm:$0xff]   ;;  %v1346_v37 = vld [vmem:[#allocation19 + $0x30] sm:$0xff]   ;;  %s1636_s20 = scalar_lea.vmem %s2221_s24, 128  ;;  %p2331_p7 = scmp.ne.s32.totalorder %s2309_s25, 0 }
 0x14e   : > { %v1345_v36 = vld [vmem:[#allocation19 + $0x28] sm:$0xff]   ;;  %v1347_v38 = vld [vmem:[#allocation19 + $0x38] sm:$0xff]   ;;  %v1128_v63 = vld [vmem:[#allocation20] ss:$0 sm:$0xff]  ;;  %p1637_p0 = scmp.ne.s32.totalorder %s2221_s24, %s1636_s20  ;;  %s1758_s2 = smov [#allocation22]  }
 0x14f   : > { %1151 = vmatpush3.bf16.msra.mxu1 %v1337_v2  ;;  %s1640_s3 = sshll.u32 %s1758_s2, 4  ;;  %s1641_s3 = int_to_ptr.vmem [resolvable:$false] %s1640_s3 }
 0x150   : > { %1156 = vmatprep.subr.bf16.mxu1 %v1756_v0  ;;  %1167 = vmatpush3.bf16.msra.mxu0 %v1341_v32  ;;  %v756_v55 = vld [vmem:[#allocation4] sm:$0xff]  ;;  %s1130_s10 = sshll.u32 %s2328_s19, 7  ;;  %p1638_p12 = pnand %p1637_p0, %p2331_p7 }
 0x151   : > { %1168 = vmatprep.subr.bf16.mxu0 %v1756_v0  ;;  %s2330_s22 = smov %s2329_s16  ;;  %s2219_s5 = scalar_lea.hbm %s2329_s16, %s1130_s10 }
 0x152   : > { %1153 = vmatmul.mubr.msk.bf16.vlgmr.msra.gmra.mrb[0].mxu1 %vm598_vm0, %v574_v3  ;;  %p1639_p2 = pneg %p1638_p12  ;;  %s1642_s4 = scalar_lea.vmem %s1641_s3, 256 }
 0x153   : > { %1160 = vmatprep.mubr.msk.bf16.mxu1 %vm1757_vm1, %v1756_v0  ;;  %1157 = vmatpush3.bf16.msra.mxu1 %v1338_v18  ;;  %p1643_p10 = scmp.lt.s32.totalorder %s2221_s24, %s1641_s3  ;;  %p1644_p1 = scmp.lt.s32.totalorder %s1642_s4, %s1636_s20 }
 0x154   : > { %1158 = vmatprep.subr.bf16.mxu1 %v1756_v0  ;;  %1169 = vmatpush3.bf16.msra.mxu0 %v1342_v33 }
 0x155   : > { %1170 = vmatprep.subr.bf16.mxu0 %v1756_v0  ;;  %p1645_p5 = por %p1644_p1, %p1643_p10 }
 0x157   : > { %1159 = vmatpush3.bf16.msra.mxu1 %v1339_v19  ;;  %p1646_p8 = pnand %p1645_p5, %p1639_p2 }
 0x158   : > { %1171 = vmatpush3.bf16.msra.mxu0 %v1343_v34 }
 0x159   : > { %1172 = vmatprep.subr.bf16.mxu0 %v1756_v0 }
 0x15c   : > { %1173 = vmatpush3.bf16.msra.mxu0 %v1344_v35 }
 0x15d   : > { %1174 = vmatprep.subr.bf16.mxu0 %v1756_v0 }
 0x160   : > { %1175 = vmatpush3.bf16.msra.mxu0 %v1345_v36 }
 0x161   : > { %1176 = vmatprep.subr.bf16.mxu0 %v1756_v0 }
 0x164   : > { %1177 = vmatpush3.bf16.msra.mxu0 %v1346_v37 }
 0x165   : > { %1178 = vmatprep.subr.bf16.mxu0 %v1756_v0 }
 0x168   : > { %1179 = vmatpush3.bf16.msra.mxu0 %v1347_v38 }
 0x225   : > { %v636_v6 = vpop.f32.mrb[0].mxu1 }
 0x226   : > { %v637_v7 = vadd.f32 %v1110_v4, %v636_v6  ;;  %v1154_v8 = vpop.f32.mrb[1].mxu1 }
 0x227   : > { %v639_v9 = vpop.f32.mrb[2].mxu1 }
 0x228   : > { %v642_v10 = vadd.f32 %v637_v7, %v573_v5  ;;  %v1155_v11 = vpop.f32.mrb[3].mxu1 }
 0x22a   : > { %643 = vst.msk [vmem:[#allocation2] sm:$0xff] %vm598_vm0, %v642_v10  ;;  %v646_v12 = vsel %vm598_vm0, %v642_v10, 0.0 }
 0x22b   : > { %647 = vadd.xlane.f32.xlu0 %v646_v12 }
 0x231   : > { %v866_v61 = vld [vmem:[#allocation2] sm:$0xff] }
 0x2b8   : > { %v648_v13 = vpop.xlane.xlu0 %647 }
 0x2b9   : > { %v650_v14 = vmul.f32 0.03125, %v648_v13 }
 0x2bb   : > { %v651_v15 = vsub.f32 %v642_v10, %v650_v14 }
 0x2bd   : > { %v652_v16 = vmul.f32 %v651_v15, %v651_v15 }
 0x2bf   : > { %v653_v17 = vsel %vm598_vm0, %v652_v16, 0.0 }
 0x2c0   : > { %654 = vadd.xlane.f32.xlu0 %v653_v17 }
 0x34d   : > { %v655_v21 = vpop.xlane.xlu0 %654 }
 0x34e   : > { %v656_v22 = vmul.f32 0.03125, %v655_v21 }
 0x350   : > { %v657_v23 = vadd.f32 1e-05, %v656_v22 }
 0x352   : > { %1348 = vrsqrt.f32 %v657_v23 }
 0x35c   : > { %v1349_v24 = vpop.eup %1348 }
 0x35d   : > { %v659_v26 = vmul.f32 %v1349_v24, %v651_v15 }
 0x35f   : > { %v666_v28 = vmul.f32 %v1114_v25, %v659_v26 }
 0x361   : > { %v673_v29 = vadd.f32 %v1115_v27, %v666_v28 }
 0x363   : > { %v674_v30 = vpack.c.bf16 %v673_v29, %v673_v29 }
 0x365   : > { %676 = vst.msk [vmem:[#allocation3] sm:$0xf] %vm675_vm2, %v674_v30 }
 0x36c   : > { %v678_v31 = vld [vmem:[#allocation3] sm:$0xf] }
 0x36d   : > { %1161 = vmatmul.mubr.msk.bf16.vlgmr.msra.gmra.mrb[4].mxu1 %vm598_vm0, %v678_v31 }
 0x440   : > { %v740_v40 = vpop.f32.mrb[4].mxu1 }
 0x441   : > { %v741_v41 = vadd.f32 %v1116_v39, %v740_v40  ;;  %v1162_v42 = vpop.f32.mrb[5].mxu1 }
 0x442   : > { %v743_v43 = vpop.f32.mrb[6].mxu1 }
 0x443   : > { %v747_v44 = vmul.f32 0.044715, %v741_v41  ;;  %v1163_v45 = vpop.f32.mrb[7].mxu1  ;;  %v746_v51 = vmul.f32 0.5, %v741_v41 }
 0x445   : > { %v748_v46 = vmul.f32 %v747_v44, %v741_v41 }
 0x447   : > { %v749_v47 = vmul.f32 %v748_v46, %v741_v41 }
 0x449   : > { %v750_v48 = vadd.f32 %v749_v47, %v741_v41 }
 0x44b   : > { %v751_v49 = vmul.f32 0.7978846, %v750_v48 }
 0x44d   : > { %1350 = vtanh.f32 %v751_v49 }
 0x457   : > { %v1351_v50 = vpop.eup %1350 }
 0x458   : > { %v753_v52 = vadd.f32 1.0, %v1351_v50 }
 0x45a   : > { %v754_v53 = vmul.f32 %v753_v52, %v746_v51 }
 0x45c   : > { %v755_v54 = vpack.c.bf16 %v754_v53, %v754_v53 }
 0x45e   : > { %1181 = vmatmul.mubr.bf16.vlgmr.msra.gmra.mrb[0].mxu0 %v755_v54 }
 0x531   : > { %v855_v56 = vpop.f32.mrb[0].mxu0 }
 0x532   : > { %v861_v57 = vadd.f32 %v855_v56, %v756_v55  ;;  %v1182_v58 = vpop.f32.mrb[1].mxu0 }
 0x533   : > { %v858_v59 = vpop.f32.mrb[2].mxu0 }
 0x534   : > { %862 = vst.msk [vmem:[#allocation4] sm:$0xff] %vm598_vm0, %v861_v57  ;;  %v1183_v60 = vpop.f32.mrb[3].mxu0 }
 0x53b   : > { %v867_v62 = vld [vmem:[#allocation4] sm:$0xff] }
 0x53c   : > { %v868_v0 = vadd.f32 %v867_v62, %v866_v61 }
 0x53e   : > { %v876_v1 = vadd.f32 %v1128_v63, %v868_v0 }
 0x540   : > { %877 = vst.msk [vmem:[%s566_s21] sm:$0xff] %vm598_vm0, %v876_v1 }
 0x541   : > { %1649 = shalt.err (!%p1646_p8)
}
 0x542   : > { %s1650_s28 = scalar_lea.hbm %s2219_s5, 128  ;;  %s1654_s19 = scalar_lea.hbm %s2330_s22, 256 }
 0x543   : > { %p1651_p3 = scmp.ne.s32.totalorder %s2219_s5, %s1650_s28  ;;  %p1655_p13 = scmp.lt.u32.totalorder %s2219_s5, %s2330_s22 }
 0x544   : > { %p1656_p4 = scmp.lt.u32.totalorder %s1654_s19, %s1650_s28  ;;  %p1658_p0 = scmp.lt.u32.totalorder %s1650_s28, %s2219_s5 }
 0x545   : > { %p1652_p11 = pnand %p1651_p3, %p2331_p7 }
 0x546   : > { %p1657_p9 = por %p1656_p4, %p1655_p13 }
 0x547   : > { %p1653_p6 = pneg %p1652_p11 }
 0x548   : > { %p1659_p12 = por %p1658_p0, %p1657_p9 }
 0x54a   : > { %p1660_p2 = pnand %p1659_p12, %p1653_p6 }
 0x54c   : > { %1663 = shalt.err (!%p1660_p2)
}
 0x54d   : > { %1220 = dma.vmem_to_hbm [thread:$0]  (%p2331_p7), %s2221_s24, 128, %s2219_s5, %s879_s11  }
 0x54e PF: > { %s905_s30 = sand.u32 1, %s1722_s13   ;;  %p2332_p10 = scmp.ne.s32.totalorder %s2310_s27, 0 }
 0x54f   : > { %p2333_p1 = scmp.ge.s32.totalorder %s1742_s18, 2  ;;  %s906_s29 = scalar_lea.sflag [#allocation7], %s905_s30 }
 0x551   : > { %p1255_p5 = pnand %p2333_p1, %p2332_p10 }
 0x553   : > { %1717 = dma.done.wait (!%p1255_p5), %s906_s29, 128  }
 0x554   : > { %1719 = vsyncadd (!%p1255_p5), %s906_s29, 4294967168  ;;  %s33_s18 = sadd.s32 1, %s1742_s18   ;;  %s2334_s13 = smov %s1726_s14 }
 0x555   : > { %p30_p8 = scmp.ge.s32.totalorder %s33_s18, 4   ;;  %s2335_s14 = smov %s1730_s15 }
 0x556   : > { %s2336_s15 = smov %s2068_s1  ;;  %s2337_s16 = smov %s1738_s17 }
 0x557   : > { %s2338_s17 = smov %s2340_s12  ;;  %32 = sbr.rel (!%p30_p8) target bundleno = 20 (0x14), region = 161 }
 0x55e   :  { %911 = vsyncpa [#allocation6], 1 }
 0x55f   :  { %913 = vsyncpa [#allocation6 + $0x1], 1 }
 0x560   :  { %914 = vsyncpa [#allocation9], 1 }
 0x561   :  { %916 = vsyncpa [#allocation9 + $0x1], 1 }
 0x562   :  { %917 = vsyncpa [#allocation12], 1 }
 0x563   :  { %918 = vsyncpa [#allocation15], 1 }
 0x564   :  { %919 = vsyncpa [#allocation18], 1 }
 0x565   :  { %920 = vsyncpa [#allocation21], 1 }
 0x566   :  { %921 = vsyncpa [#allocation7], 1 }
 0x567   :  { %923 = vsyncpa [#allocation7 + $0x1], 1 }

// kernel: gpt_forward.15
= control target key start
LH: loop header
LB: loop body
LE: loop exit
PB: predicated region body
PF: predicated region fallthrough
CT: control target
= control target key end

     0   :  { %7 = vsyncpa [#allocation3], 0  ;;  %s887_s0 = inlined_call_operand.hbm [shape: bf16[2,8,32], index: 0, kind: input, shape index: {}]   ;;  %s888_s1 = inlined_call_operand.hbm [shape: bf16[32,256], index: 1, kind: input, shape index: {}]   ;;  %s889_s2 = inlined_call_operand.hbm [shape: f32[2,8,256], index: 2, kind: output, shape index: {}]  }
   0x1   :  { %9 = vsyncpa [#allocation3 + $0x1], 0 }
   0x2   :  { %10 = vsyncpa [#allocation6], 0 }
   0x3   :  { %11 = vsyncpa [#allocation4], 0 }
   0x4   :  { %13 = vsyncpa [#allocation4 + $0x1], 0  ;;  %s672_s9 = smov 0   ;;  %s674_s10 = smov 0  }
   0x5   :  { %s676_s11 = smov 0   ;;  %s678_s12 = smov 0  }
   0x6   :  { %s680_s13 = smov 0   ;;  %s682_s14 = smov 0  }
   0x7 LB: > { %s401_s15 = sadd.s32 4294967295, %s649_s14   ;;  %s402_s16 = sadd.s32 4294967294, %s649_s14   ;;  %s649_s14 = sphi %s682_s14, %s19_s14   ;;  %s645_s13 = sphi %s680_s13, %s913_s13   ;;  %s641_s12 = sphi %s678_s12, %s912_s12   ;;  %s637_s11 = sphi %s676_s11, %s911_s11   ;;  %s633_s10 = sphi %s674_s10, %s910_s10   ;;  %s629_s9 = sphi %s672_s9, %s909_s9  }
   0x8   : > { %p60_p0 = scmp.ne.s32.totalorder %s633_s10, %s629_s9  ;;  %p706_p1 = scmp.eq.s32.totalorder %s401_s15, 0 }
   0x9   : > { %p710_p2 = scmp.eq.s32.totalorder %s401_s15, 1  ;;  %p120_p3 = scmp.eq.s32.totalorder %s402_s16, 1 }
   0xa   : > { %s894_s17 = scalar_select %p706_p1, 1, 0 }
   0xb   : > { %s895_s18 = scalar_select %p710_p2, 1, 0 }
   0xc   : > { %p716_p4 = por %p706_p1, %p60_p0  ;;  %p403_p5 = scmp.ge.s32.totalorder %s649_s14, 1 }
   0xd   : > { %p721_p6 = por %p120_p3, %p60_p0  ;;  %p127_p7 = scmp.lt.s32.totalorder %s649_s14, 3 }
   0xe   : > { %s896_s19 = scalar_select %p716_p4, 1, 0 }
   0xf   : > { %s897_s20 = scalar_select %p721_p6, 1, 0 }
  0x10   : > { %p726_p8 = pnand %p403_p5, %p127_p7  ;;  %s651_s22 = smov [#allocation5]  }
  0x11   : > { %s142_s23 = sshll.u32 %s651_s22, 4  ;;  %s34_s25 = sadd.s32 1, %s645_s13  ;;  %s143_s23 = int_to_ptr.vmem [resolvable:$true] %s142_s23 }
  0x12   : > { %s898_s21 = scalar_select %p726_p8, 1, 0 }
  0x13   : > { %p431_p9 = pneg %p726_p8  ;;  %s505_s28 = scalar_lea.hbm %s888_s1, 512 }
  0x14   : > { %p506_p12 = scmp.ne.s32.totalorder %s888_s1, %s505_s28  ;;  %p512_p5 = scmp.lt.u32.totalorder %s505_s28, %s888_s1 }
  0x15   : > { %p735_p11 = pnand %p431_p9, %p706_p1 }
  0x17   : > { %p507_p13 = pneg %p735_p11 }
  0x19   : > { %p508_p0 = pnand %p507_p13, %p506_p12 }
  0x1b   : > { %p509_p3 = pneg %p508_p0 }
  0x1d   : > { %p514_p7 = pnand %p512_p5, %p509_p3 }
  0x1f   : > { %517 = shalt.err (!%p514_p7)
}
  0x20   : > { %s518_s5 = scalar_lea.vmem %s143_s23, 512  ;;  %p526_p1 = scmp.lt.s32.totalorder %s143_s23, %s143_s23 }
  0x21   : > { %p519_p9 = scmp.ne.s32.totalorder %s143_s23, %s518_s5  ;;  %p527_p4 = scmp.lt.s32.totalorder %s518_s5, %s518_s5 }
  0x23   : > { %p521_p10 = pnand %p519_p9, %p507_p13  ;;  %p528_p8 = por %p527_p4, %p526_p1 }
  0x25   : > { %p522_p6 = pneg %p521_p10 }
  0x27   : > { %p529_p2 = pnand %p528_p8, %p522_p6 }
  0x29   : > { %532 = shalt.err (!%p529_p2)
}
  0x2a   : > { %s652_s6 = smov 128   ;;  %s653_s7 = smov 8  }
  0x2b   : > { %434 = dma.hbm_to_vmem [thread:$0]  (!%p735_p11), %s888_s1, 512, %s143_s23, [#allocation6], %s652_s6, %s652_s6, %s653_s7  }
  0x2c   : > { %p36_p1 = scmp.ge.s32.totalorder %s34_s25, 2  ;;  %s47_s16 = sadd.s32 1, %s637_s11 }
  0x2d   : > { %p54_p2 = scmp.ne.s32.totalorder %s637_s11, %s633_s10  ;;  %p55_p4 = scmp.eq.s32.totalorder %s649_s14, 0 }
  0x2e   : > { %s915_s25 = smov (%p36_p1, %s34_s25), 0  ;;  %p901_p8 = scmp.ne.s32.totalorder %s895_s18, 0 }
  0x2f   : > { %p762_p6 = por %p55_p4, %p54_p2  ;;  %s42_s24 = ssub.s32 %s645_s13, %s915_s25 }
  0x30   : > { %p768_p10 = por %p901_p8, %p54_p2  ;;  %p444_p12 = scmp.lt.s32.totalorder %s649_s14, 2 }
  0x31   : > { %p45_p11 = scmp.eq.s32.totalorder %s42_s24, 0  ;;  %s156_s23 = sand.u32 1, %s637_s11  }
  0x32   : > { %s406_s27 = sshll.u32 %s156_s23, 2  ;;  %s407_s29 = sshll.u32 %s645_s13, 6 }
  0x33   : > { %s777_s28 = scalar_select %p45_p11, %s637_s11, %s47_s16  }
  0x34   : > { %s783_s4 = scalar_lea.hbm %s887_s0, %s407_s29  ;;  %s160_s18 = scalar_lea.vmem [#allocation2], %s406_s27 }
  0x35   : > { %s168_s5 = sshll.u32 %s160_s18, 4  ;;  %p789_p13 = pnand %p444_p12, %p762_p6  ;;  %s785_s5 = int_to_ptr.vmem [resolvable:$true] %s168_s5 }
  0x36   : > { %s157_s7 = scalar_lea.sflag [#allocation3], %s156_s23  ;;  %s533_s8 = scalar_lea.hbm %s783_s4, 64 }
  0x37   : > { %p534_p0 = scmp.ne.s32.totalorder %s783_s4, %s533_s8  ;;  %p535_p3 = pneg %p789_p13 }
  0x38   : > { %s538_s24 = scalar_lea.hbm %s887_s0, 128  ;;  %p539_p9 = scmp.lt.u32.totalorder %s783_s4, %s887_s0 }
  0x39   : > { %p536_p5 = pnand %p535_p3, %p534_p0  ;;  %p540_p1 = scmp.lt.u32.totalorder %s538_s24, %s533_s8 }
  0x3a   : > { %p542_p4 = scmp.lt.u32.totalorder %s533_s8, %s783_s4 }
  0x3b   : > { %p537_p7 = pneg %p536_p5  ;;  %p541_p2 = por %p540_p1, %p539_p9 }
  0x3d   : > { %p543_p6 = por %p542_p4, %p541_p2 }
  0x3f   : > { %p544_p8 = pnand %p543_p6, %p537_p7 }
  0x41   : > { %547 = shalt.err (!%p544_p8)
}
  0x42   : > { %s548_s23 = scalar_lea.vmem %s785_s5, 64  ;;  %s654_s29 = smov [#allocation2]  }
  0x43   : > { %p549_p12 = scmp.ne.s32.totalorder %s785_s5, %s548_s23  ;;  %s553_s30 = sshll.u32 %s654_s29, 4  ;;  %s554_s30 = int_to_ptr.vmem [resolvable:$false] %s553_s30 }
  0x44   : > { %s555_s3 = scalar_lea.vmem %s554_s30, 128  ;;  %p556_p5 = scmp.lt.s32.totalorder %s785_s5, %s554_s30 }
  0x45   : > { %p551_p11 = pnand %p549_p12, %p535_p3  ;;  %p557_p9 = scmp.lt.s32.totalorder %s555_s3, %s548_s23 }
  0x47   : > { %p552_p0 = pneg %p551_p11  ;;  %p558_p1 = por %p557_p9, %p556_p5 }
  0x49   : > { %p559_p2 = pnand %p558_p1, %p552_p0 }
  0x4b   : > { %562 = shalt.err (!%p559_p2)
}
  0x4c   : > { %438 = dma.hbm_to_vmem [thread:$0]  (!%p789_p13), %s783_s4, 64, %s785_s5, %s157_s7  }
  0x4d   : > { %p904_p7 = scmp.ne.s32.totalorder %s898_s21, 0 }
  0x4e   : > { %s821_s18 = sand.u32 (!%p904_p7), 1, %s633_s10   ;;  %p905_p3 = scmp.ne.s32.totalorder (!%p904_p7), %s896_s19, 0 }
  0x4f   : > { %177 = sbr.rel (%p904_p7) target bundleno = 327 (0x147), region = 28  ;;  %s409_s8 = sshll.u32 (!%p904_p7), %s821_s18, 2 }
  0x50   : > { %s180_s15 = scalar_lea.sflag (!%p904_p7), [#allocation3], %s821_s18  ;;  %s183_s16 = scalar_lea.vmem (!%p904_p7), [#allocation2], %s409_s8 }
  0x56   : > { %616 = dma.done.wait (%p905_p3), %s180_s15, 64  }
  0x57   : > { %618 = vsyncadd (%p905_p3), %s180_s15, 4294967232  ;;  %p906_p4 = scmp.ne.s32.totalorder %s894_s17, 0 }
  0x59   : > { %620 = dma.done.wait (%p906_p4), [#allocation6], 512  }
  0x5a   : > { %622 = vsyncadd (%p906_p4), [#allocation6], 4294966784  ;;  %v655_v0 = vmov 0   ;;  %v499_v1 = vld [vmem:[#allocation5 + $0x4] ss:$8 sps:$4 sm:$0xff]   ;;  %vm236_vm0 = vcmask 261120  }
  0x5b   : > { %272 = vmatprep.mubr.bf16.mxu0 %v655_v0  ;;  %v501_v2 = vld [vmem:[#allocation5] ss:$8 sps:$4 sm:$0xff]   ;;  %240 = vmatprep.subr.bf16.mxu0 %v499_v1  ;;  %v502_v3 = vld [vmem:[#allocation5 + $0x14] ss:$8 sps:$4 sm:$0xff]   ;;  %v504_v4 = vld [vmem:[#allocation5 + $0x10] ss:$8 sps:$4 sm:$0xff]  }
  0x5c   : > { %241 = vmatpush1.bf16.msra.mxu0 %v501_v2  ;;  %v211_v5 = vld [vmem:[%s183_s16] sm:$0xf]  ;;  %s411_s19 = sshll.u32 %s821_s18, 4  ;;  %s422_s4 = sshll.u32 %s641_s12, 8 }
  0x5d   : > { %242 = vmatprep.subr.bf16.mxu0 %v502_v3  ;;  %s207_s17 = scalar_lea.vmem [#allocation7], %s411_s19  ;;  %s840_s7 = scalar_lea.hbm %s889_s2, %s422_s4 }
  0x5e   : > { %s302_s21 = sshll.u32 %s207_s17, 4  ;;  %s284_s24 = scalar_lea.sflag [#allocation4], %s821_s18  ;;  %s835_s21 = int_to_ptr.vmem [resolvable:$true] %s302_s21 }
  0x5f   : > { %s563_s22 = scalar_lea.vmem %s835_s21, 256  ;;  %s656_s12 = smov [#allocation7]  }
  0x60   : > { %243 = vmatpush1.bf16.msra.mxu0 %v504_v4  ;;  %p564_p13 = scmp.ne.s32.totalorder %s835_s21, %s563_s22  ;;  %s567_s27 = sshll.u32 %s656_s12, 4  ;;  %s568_s27 = int_to_ptr.vmem [resolvable:$false] %s567_s27 }
  0x61   : > { %s569_s23 = scalar_lea.vmem %s568_s27, 512  ;;  %p570_p12 = scmp.lt.s32.totalorder %s835_s21, %s568_s27 }
  0x62   : > { %p565_p6 = pnand %p564_p13, %p768_p10  ;;  %p571_p11 = scmp.lt.s32.totalorder %s569_s23, %s563_s22 }
  0x63   : > { %416 = vmatmul.mubr.msk.bf16.vlgmr.msra.gmra.mrb[0].mxu0 %vm236_vm0, %v211_v5 }
  0x64   : > { %p566_p8 = pneg %p565_p6  ;;  %p572_p0 = por %p571_p11, %p570_p12 }
  0x66   : > { %p573_p5 = pnand %p572_p0, %p566_p8 }
 0x136   : > { %v274_v6 = vpop.f32.mrb[0].mxu0 }
 0x137   : > { %281 = vst [vmem:[%s207_s17] sm:$0xff] %v274_v6  ;;  %v276_v7 = vpop.f32.mrb[1].mxu0 }
 0x138   : > { %282 = vst [vmem:[%s207_s17 + $0x8] sm:$0xff] %v276_v7  ;;  %v278_v8 = vpop.f32.mrb[2].mxu0 }
 0x139   : > { %v279_v9 = vpop.f32.mrb[3].mxu0 }
 0x13a   : > { %576 = shalt.err (!%p573_p5)
}
 0x13b   : > { %s577_s29 = scalar_lea.hbm %s840_s7, 256  ;;  %s581_s18 = scalar_lea.hbm %s889_s2, 512 }
 0x13c   : > { %p578_p9 = scmp.ne.s32.totalorder %s840_s7, %s577_s29  ;;  %p582_p7 = scmp.lt.u32.totalorder %s840_s7, %s889_s2 }
 0x13d   : > { %p583_p3 = scmp.lt.u32.totalorder %s581_s18, %s577_s29  ;;  %p585_p13 = scmp.lt.u32.totalorder %s577_s29, %s840_s7 }
 0x13e   : > { %p579_p1 = pnand %p578_p9, %p768_p10 }
 0x13f   : > { %p584_p4 = por %p583_p3, %p582_p7 }
 0x140   : > { %p580_p2 = pneg %p579_p1 }
 0x141   : > { %p586_p6 = por %p585_p13, %p584_p4 }
 0x143   : > { %p587_p8 = pnand %p586_p6, %p580_p2 }
 0x145   : > { %590 = shalt.err (!%p587_p8)
}
 0x146   : > { %429 = dma.vmem_to_hbm [thread:$0]  (%p768_p10), %s835_s21, 256, %s840_s7, %s284_s24  }
 0x147 PF: > { %s314_s16 = sand.u32 1, %s629_s9   ;;  %p907_p12 = scmp.ne.s32.totalorder %s897_s20, 0 }
 0x148   : > { %p908_p11 = scmp.ge.s32.totalorder %s649_s14, 2  ;;  %s315_s19 = scalar_lea.sflag [#allocation4], %s314_s16 }
 0x14a   : > { %p440_p0 = pnand %p908_p11, %p907_p12 }
 0x14c   : > { %624 = dma.done.wait (!%p440_p0), %s315_s19, 256  }
 0x14d   : > { %626 = vsyncadd (!%p440_p0), %s315_s19, 4294967040  ;;  %s19_s14 = sadd.s32 1, %s649_s14   ;;  %s909_s9 = smov %s633_s10 }
 0x14e   : > { %p16_p5 = scmp.ge.s32.totalorder %s19_s14, 4   ;;  %s910_s10 = smov %s637_s11 }
 0x14f   : > { %s911_s11 = smov %s777_s28  ;;  %s912_s12 = smov %s645_s13 }
 0x150   : > { %s913_s13 = smov %s915_s25  ;;  %18 = sbr.rel (!%p16_p5) target bundleno = 7 (0x7), region = 78 }
 0x157   :  { %320 = vsyncpa [#allocation3], 1 }
 0x158   :  { %322 = vsyncpa [#allocation3 + $0x1], 1 }
 0x159   :  { %323 = vsyncpa [#allocation6], 1 }
 0x15a   :  { %324 = vsyncpa [#allocation4], 1 }
 0x15b   :  { %326 = vsyncpa [#allocation4 + $0x1], 1 }

</bundles_post_ra>
